<compile_context>
chip_gen: v7x
topology: tpu7x:2x2x1
jax: 0.10.0
libtpu: 0.0.40
codegen_flags: <defaults>
</compile_context>

<pallas_src>
import jax
import jax.numpy as jnp
import numpy as np
from jax.experimental import pallas as pl
from jax.experimental.pallas import tpu as pltpu

# ---------------- problem sizes (small, synthetic) ----------------
B = 2            # batch
T = 16           # sequence length
D = 32           # dim_in == dim_out
K = 17           # depthwise conv kernel size
H = 4            # attention heads
HD = D // H      # head dim (8)
BT = B * T       # flattened rows
LN_EPS = 1e-5
BN_EPS = 1e-5

# ---- vector-slab row indices (each row is a (D,) parameter vector) ----
(V_CLN_G, V_CLN_B,
 V_EXP_B_OUT, V_EXP_B_GATE,
 V_CONV_B,
 V_BN_SCALE, V_BN_SHIFT,
 V_PROJ_B,
 V_MLN_G, V_MLN_B,
 V_CF1_B_OUT, V_CF1_B_GATE,
 V_CF2_B,
 V_AN1_G, V_AN1_B,
 V_AN2_G, V_AN2_B,
 V_AF1_B_OUT, V_AF1_B_GATE,
 V_AF2_B) = range(20)
V_HMASK0 = 20                 # H rows: per-head lane masks (0/1)
V_CONVW0 = V_HMASK0 + H       # K rows: depthwise conv taps
N_VEC = V_CONVW0 + K

# ---- square-weight slab indices ((D, D) matrices; LayerScale / softmax-scale folded) ----
(W_EXP_OUT, W_EXP_GATE, W_CPROJ,
 W_CF1_OUT, W_CF1_GATE, W_CF2,
 W_Q, W_QR, W_K, W_KR, W_V, W_O,
 W_AF1_OUT, W_AF1_GATE, W_AF2) = range(15)
N_W = 15


# ---------------- small math helpers ----------------
def _ln_ref(v, g, b):
    # reference LayerNorm (two-pass variance, like torch.nn.LayerNorm)
    mu = jnp.mean(v, axis=-1, keepdims=True)
    var = jnp.mean((v - mu) ** 2, axis=-1, keepdims=True)
    return (v - mu) * jax.lax.rsqrt(var + LN_EPS) * g + b


def _silu(v):
    return v * jax.nn.sigmoid(v)


def _gelu_tanh(v):
    # tanh-approximate GELU (PyTorch's exact-erf GELU differs by <1e-3).
    c = 0.7978845608028654  # sqrt(2/pi)
    return 0.5 * v * (1.0 + jnp.tanh(c * (v + 0.044715 * v * v * v)))


# ---------------- fused kernel ----------------
def squeezeformer_kernel(x_ref, w_ref, vec_ref, shiftT_ref, rope_ref, bias_ref,
                         o_ref, hs_ref):
    f32 = jnp.float32

    def vrow(i):                       # (1, D) parameter row, static index
        return vec_ref[i:i + 1, :]

    def mm(a, w):
        return jnp.dot(a, w, preferred_element_type=f32)

    def ln(v, g, b):
        # one-pass variance: two independent reductions instead of a serial
        # reduce -> subtract -> reduce chain (5 LNs on the critical path).
        mu = jnp.mean(v, axis=-1, keepdims=True)
        var = jnp.mean(v * v, axis=-1, keepdims=True) - mu * mu
        return (v - mu) * jax.lax.rsqrt(var + LN_EPS) * g + b

    x = x_ref[...]                     # (BT, D)

    # ======================= ConvBlock =======================
    shortcut = x
    h = ln(x, vrow(V_CLN_G), vrow(V_CLN_B))

    # expand_conv + GLU(silu): two aligned (D,D) matmuls (weights pre-split).
    out = mm(h, w_ref[W_EXP_OUT]) + vrow(V_EXP_B_OUT)
    gate = mm(h, w_ref[W_EXP_GATE]) + vrow(V_EXP_B_GATE)
    h = out * _silu(gate)              # (BT, D)

    # Depthwise causal conv1d (kernel K, left pad K-1): pre-scale h by every tap
    # into a (K*BT, D) VMEM scratch (17 aligned stores), then one MXU matmul with
    # the hstacked shift-operator constant contracts over (tap, time') at once.
    # Only 4 result vregs are drained; no big live intermediate, no serial FMA chain.
    for k in range(K):
        hs_ref[k * BT:(k + 1) * BT, :] = h * vrow(V_CONVW0 + k)
    h = mm(shiftT_ref[...], hs_ref[...]) + vrow(V_CONV_B)          # (BT, D)

    # masked batchnorm (eval mode, running stats folded) + silu
    h = _silu(h * vrow(V_BN_SCALE) + vrow(V_BN_SHIFT))

    # conv_proj (LayerScale folded into W/b) + residual
    conv_out = mm(h, w_ref[W_CPROJ]) + vrow(V_PROJ_B) + shortcut

    # mlp_ln + GLUFFN(silu) (LayerScale folded into ffn2), residual
    h = ln(conv_out, vrow(V_MLN_G), vrow(V_MLN_B))
    out = mm(h, w_ref[W_CF1_OUT]) + vrow(V_CF1_B_OUT)
    gate = mm(h, w_ref[W_CF1_GATE]) + vrow(V_CF1_B_GATE)
    h = out * _silu(gate)
    h = mm(h, w_ref[W_CF2]) + vrow(V_CF2_B)
    x = conv_out + h                   # ConvBlock output, (BT, D)

    # =================== AttnBlock (llama attention + RoPE) ===================
    residual = x
    hx = ln(x, vrow(V_AN1_G), vrow(V_AN1_B))
    cos = rope_ref[0]                  # (BT, D), per-head tiled
    sin = rope_ref[1]

    # Full-width projections; rotate_half folded into W_QR / W_KR (W @ blockdiag(P)),
    # softmax scale folded into W_Q / W_QR.  RoPE is two full-width FMAs each.
    q = mm(hx, w_ref[W_Q]) * cos + mm(hx, w_ref[W_QR]) * sin       # (BT, D)
    kmat = mm(hx, w_ref[W_K]) * cos + mm(hx, w_ref[W_KR]) * sin    # (BT, D)
    v = mm(hx, w_ref[W_V])                                         # (BT, D)

    # Per-head scores via full 32-lane contraction with head-masked q, batched over
    # heads along sublanes: S_all[h*BT+i, j] = q_h[i] . k_h[j].
    q_big = jnp.concatenate([q * vrow(V_HMASK0 + hh) for hh in range(H)],
                            axis=0)                                # (H*BT, D)
    s = jax.lax.dot_general(q_big, kmat, (((1,), (1,)), ((), ())),
                            preferred_element_type=f32)            # (H*BT, BT)
    s = s + bias_ref[...]              # -1e30 at cross-batch positions

    # single softmax chain over the whole (H*BT, BT) tile
    s = s - jnp.max(s, axis=-1, keepdims=True)
    p = jnp.exp(s)
    p = p * pl.reciprocal(jnp.sum(p, axis=-1, keepdims=True), approx=True)

    o_all = mm(p, v)                                               # (H*BT, D)
    # keep only head h's lanes from its row block, sum over heads -> concat layout
    attn = o_all[0:BT, :] * vrow(V_HMASK0)
    for hh in range(1, H):
        attn = attn + o_all[hh * BT:(hh + 1) * BT, :] * vrow(V_HMASK0 + hh)

    attn_out = residual + mm(attn, w_ref[W_O])   # ls_attn folded into W_O

    # norm2 + GLUFFN(gelu) (LayerScale folded into ffn2), residual
    h = ln(attn_out, vrow(V_AN2_G), vrow(V_AN2_B))
    out = mm(h, w_ref[W_AF1_OUT]) + vrow(V_AF1_B_OUT)
    gate = mm(h, w_ref[W_AF1_GATE]) + vrow(V_AF1_B_GATE)
    h = out * _gelu_tanh(gate)
    h = mm(h, w_ref[W_AF2]) + vrow(V_AF2_B)

    o_ref[...] = (attn_out + h).astype(o_ref.dtype)


# ---------------- host-side packing ----------------
def make_rope(seq_len, head_dim):
    inv_freq = 1.0 / (10000.0 ** (np.arange(0, head_dim, 2, dtype=np.float32)
                                  / head_dim))
    t = np.arange(seq_len, dtype=np.float32)
    freqs = np.outer(t, inv_freq)                        # (T, HD/2)
    emb = np.concatenate([freqs, freqs], axis=-1)        # (T, HD)
    return jnp.asarray(np.cos(emb)), jnp.asarray(np.sin(emb))


def make_shiftT_matrix():
    """(BT, K*BT) hstack of block-diagonal causal shift operators.

    Column block k applied to (h * w_k) stacked along the contraction axis yields
    sum_k shift_{K-1-k}(h) * w_k within each batch block (causal left pad)."""
    blocks = []
    for k in range(K):
        s = K - 1 - k
        S = np.zeros((T, T), np.float32)
        if s < T:
            S[np.arange(s, T), np.arange(0, T - s)] = 1.0
        blocks.append(np.kron(np.eye(B, dtype=np.float32), S))   # (BT, BT)
    return jnp.asarray(np.concatenate(blocks, axis=1))           # (BT, K*BT)


def pack_params(p, cos, sin):
    scale = HD ** -0.5
    half = HD // 2

    # rotate_half as an (HD, HD) matrix, block-diagonal expanded to (D, D)
    P = np.zeros((HD, HD), np.float32)
    P[np.arange(half), np.arange(half) + half] = 1.0
    P[np.arange(half) + half, np.arange(half)] = -1.0
    P_big = jnp.asarray(np.kron(np.eye(H, dtype=np.float32), P))   # (D, D)

    w_q = p["w_q"] * scale          # fold softmax scale into q projection
    w_qr = w_q @ P_big
    w_k = p["w_k"]
    w_kr = w_k @ P_big

    w = jnp.stack([
        p["w_exp"][:, :D], p["w_exp"][:, D:],
        p["w_cproj"] * p["ls_cproj"][None, :],
        p["w_cf1"][:, :D], p["w_cf1"][:, D:],
        p["w_cf2"] * p["ls_cmlp"][None, :],
        w_q, w_qr, w_k, w_kr, p["w_v"],
        p["w_o"] * p["ls_attn"][None, :],
        p["w_af1"][:, :D], p["w_af1"][:, D:],
        p["w_af2"] * p["ls_amlp"][None, :],
    ])                                                    # (N_W, D, D)

    head_masks = []
    for hh in range(H):
        m = np.zeros((D,), np.float32)
        m[hh * HD:(hh + 1) * HD] = 1.0
        head_masks.append(jnp.asarray(m))

    vec_rows = [
        p["conv_ln_g"], p["conv_ln_b"],
        p["b_exp"][:D], p["b_exp"][D:],
        p["conv_b"],
        p["bn_scale"], p["bn_shift"],
        p["b_cproj"] * p["ls_cproj"],
        p["mlp_ln_g"], p["mlp_ln_b"],
        p["b_cf1"][:D], p["b_cf1"][D:],
        p["b_cf2"] * p["ls_cmlp"],
        p["an1_g"], p["an1_b"],
        p["an2_g"], p["an2_b"],
        p["b_af1"][:D], p["b_af1"][D:],
        p["b_af2"] * p["ls_amlp"],
    ] + head_masks + [p["conv_w"][k] for k in range(K)]
    vec = jnp.stack(vec_rows)                             # (N_VEC, D)
    assert vec.shape[0] == N_VEC

    shiftT = make_shiftT_matrix()                         # (BT, K*BT)

    # rope tiled per head: (2, BT, D)
    cosf = jnp.tile(cos, (B, H))
    sinf = jnp.tile(sin, (B, H))
    rope = jnp.stack([cosf, sinf])

    # cross-batch attention bias, tiled per head along sublanes: (H*BT, BT)
    same_batch = np.equal.outer(np.arange(BT) // T, np.arange(BT) // T)
    blk = np.where(same_batch, 0.0, -1e30).astype(np.float32)
    attn_bias = jnp.asarray(np.tile(blk, (H, 1)))

    return w, vec, shiftT, rope, attn_bias


def squeezeformer_block(x, p, cos, sin):
    """x: (B, T, D) float32.  Returns (y, attention_mask=None)."""
    w, vec, shiftT, rope, attn_bias = pack_params(p, cos, sin)
    x2d = x.reshape(BT, D)
    inputs = (x2d, w, vec, shiftT, rope, attn_bias)

    def full_spec(a):
        nd = a.ndim
        return pl.BlockSpec(a.shape, lambda i, _nd=nd: (0,) * _nd)

    flops = int(2 * BT * D * D * N_W                   # fifteen (D,D) matmuls
                + 2 * BT * (K * BT) * D                # causal-conv contraction
                + 2 * (H * BT) * BT * D * 2            # scores + attn @ v
                + 64 * BT * D)                         # elementwise (rough)
    transcendentals = int(H * BT * BT + 12 * BT * D)
    bytes_accessed = int(sum(a.size * a.dtype.itemsize for a in inputs)
                         + BT * D * 4)

    # NOTE: grid=(1,) single step.  On v7x one could use grid=(B,) with
    # dimension_semantics=("parallel",) to shard the two batch samples across the
    # two TensorCores; kept single-step here (single TC on v5e/v6e).
    y2d = pl.pallas_call(
        squeezeformer_kernel,
        out_shape=jax.ShapeDtypeStruct((BT, D), jnp.float32),
        grid=(1,),
        in_specs=[full_spec(a) for a in inputs],
        out_specs=pl.BlockSpec((BT, D), lambda i: (0, 0)),
        scratch_shapes=[pltpu.VMEM((K * BT, D), jnp.float32)],
        compiler_params=pltpu.CompilerParams(
            dimension_semantics=("arbitrary",)),
        cost_estimate=pl.CostEstimate(flops=flops,
                                      transcendentals=transcendentals,
                                      bytes_accessed=bytes_accessed),
    )(*inputs)
    return y2d.reshape(B, T, D), None


# ---------------- pure-JAX reference (mirrors the PyTorch forward) ----------------
def squeezeformer_ref(x, p, cos, sin):
    prec = jax.lax.Precision.HIGHEST
    mm = lambda a, w: jnp.matmul(a, w, precision=prec)

    # ---- ConvBlock ----
    shortcut = x
    h = _ln_ref(x, p["conv_ln_g"], p["conv_ln_b"])
    h = mm(h, p["w_exp"]) + p["b_exp"]
    out, gate = h[..., :D], h[..., D:]
    h = out * _silu(gate)
    hp = jnp.pad(h, ((0, 0), (K - 1, 0), (0, 0)))
    conv = sum(hp[:, k:k + T, :] * p["conv_w"][k] for k in range(K)) + p["conv_b"]
    h = conv * p["bn_scale"] + p["bn_shift"]
    h = _silu(h)
    h = mm(h, p["w_cproj"]) + p["b_cproj"]
    h = h * p["ls_cproj"]
    conv_out = h + shortcut
    h = _ln_ref(conv_out, p["mlp_ln_g"], p["mlp_ln_b"])
    h = mm(h, p["w_cf1"]) + p["b_cf1"]
    out, gate = h[..., :D], h[..., D:]
    h = out * _silu(gate)
    h = mm(h, p["w_cf2"]) + p["b_cf2"]
    h = h * p["ls_cmlp"]
    x = conv_out + h

    # ---- AttnBlock (llama attention, RoPE) ----
    residual = x
    h = _ln_ref(x, p["an1_g"], p["an1_b"])
    q = mm(h, p["w_q"]).reshape(B, T, H, HD).transpose(0, 2, 1, 3)
    k = mm(h, p["w_k"]).reshape(B, T, H, HD).transpose(0, 2, 1, 3)
    v = mm(h, p["w_v"]).reshape(B, T, H, HD).transpose(0, 2, 1, 3)

    def rotate_half(u):
        return jnp.concatenate([-u[..., HD // 2:], u[..., :HD // 2]], axis=-1)

    cos4, sin4 = cos[None, None], sin[None, None]
    q = q * cos4 + rotate_half(q) * sin4
    k = k * cos4 + rotate_half(k) * sin4
    attn = jnp.einsum("bhqd,bhkd->bhqk", q, k, precision=prec) * (HD ** -0.5)
    attn = jax.nn.softmax(attn, axis=-1)
    o = jnp.einsum("bhqk,bhkd->bhqd", attn, v, precision=prec)
    o = o.transpose(0, 2, 1, 3).reshape(B, T, D)
    o = mm(o, p["w_o"])
    o = o * p["ls_attn"]
    x = residual + o
    attn_out = x
    h = _ln_ref(x, p["an2_g"], p["an2_b"])
    h = mm(h, p["w_af1"]) + p["b_af1"]
    out, gate = h[..., :D], h[..., D:]
    h = out * _gelu_tanh(gate)
    h = mm(h, p["w_af2"]) + p["b_af2"]
    h = h * p["ls_amlp"]
    return attn_out + h


# ---------------- parameter construction ----------------
def init_params(key):
    keys = iter(jax.random.split(key, 40))
    n = lambda shape, s=0.05: jax.random.normal(next(keys), shape, jnp.float32) * s
    p = {}
    # ConvBlock
    p["conv_ln_g"] = 1.0 + n((D,), 0.1)
    p["conv_ln_b"] = n((D,), 0.1)
    p["w_exp"] = n((D, 2 * D))
    p["b_exp"] = n((2 * D,))
    p["conv_w"] = n((K, D), 0.1)
    p["conv_b"] = n((D,), 0.1)
    bn_gamma = 1.0 + n((D,), 0.1)
    bn_beta = n((D,), 0.1)
    bn_mean = n((D,), 0.1)
    bn_var = 1.0 + jnp.abs(n((D,), 0.1))
    p["bn_scale"] = bn_gamma / jnp.sqrt(bn_var + BN_EPS)
    p["bn_shift"] = bn_beta - bn_mean * p["bn_scale"]
    p["w_cproj"] = n((D, D))
    p["b_cproj"] = n((D,))
    p["ls_cproj"] = jnp.full((D,), 0.1, jnp.float32)
    p["mlp_ln_g"] = 1.0 + n((D,), 0.1)
    p["mlp_ln_b"] = n((D,), 0.1)
    p["w_cf1"] = n((D, 2 * D))
    p["b_cf1"] = n((2 * D,))
    p["w_cf2"] = n((D, D))
    p["b_cf2"] = n((D,))
    p["ls_cmlp"] = jnp.full((D,), 0.1, jnp.float32)
    # AttnBlock
    p["an1_g"] = 1.0 + n((D,), 0.1)
    p["an1_b"] = n((D,), 0.1)
    p["w_q"] = n((D, D))
    p["w_k"] = n((D, D))
    p["w_v"] = n((D, D))
    p["w_o"] = n((D, D))
    p["ls_attn"] = jnp.full((D,), 0.1, jnp.float32)
    p["an2_g"] = 1.0 + n((D,), 0.1)
    p["an2_b"] = n((D,), 0.1)
    p["w_af1"] = n((D, 2 * D))
    p["b_af1"] = n((2 * D,))
    p["w_af2"] = n((D, D))
    p["b_af2"] = n((D,))
    p["ls_amlp"] = jnp.full((D,), 0.1, jnp.float32)
    return p


if __name__ == "__main__":
    key = jax.random.PRNGKey(0)
    k_x, k_p = jax.random.split(key)
    x = jax.random.normal(k_x, (B, T, D), jnp.float32)
    params = init_params(k_p)
    cos, sin = make_rope(T, HD)

    y, mask = squeezeformer_block(x, params, cos, sin)
    y = jax.block_until_ready(y)

    y_ref = squeezeformer_ref(x, params, cos, sin)
    np.testing.assert_allclose(np.asarray(y), np.asarray(y_ref),
                               rtol=2e-3, atol=2e-3)
    assert mask is None
    print("KERNEL_OK")
</pallas_src>

<mosaic_0001>
module attributes {stable_mosaic.version = 11 : i64} {
  func.func @squeezeformer_kernel(%arg0: i32, %arg1: memref<32x32xf32, #tpu.memory_space<vmem>>, %arg2: memref<15x32x32xf32, #tpu.memory_space<vmem>>, %arg3: memref<41x32xf32, #tpu.memory_space<vmem>>, %arg4: memref<32x544xf32, #tpu.memory_space<vmem>>, %arg5: memref<2x32x32xf32, #tpu.memory_space<vmem>>, %arg6: memref<128x32xf32, #tpu.memory_space<vmem>>, %arg7: memref<32x32xf32, #tpu.memory_space<vmem>>, %arg8: memref<544x32xf32, #tpu.memory_space<vmem>>) attributes {dimension_semantics = [#tpu.dimension_semantics<arbitrary>], iteration_bounds = array<i64: 1>, scalar_prefetch = 0 : i64, scratch_operands = 1 : i64, tpu.core_type = #tpu.core_type<tc>, window_params = [{pipeline_mode = #tpu.pipeline_mode<synchronous>, transform_indices = @transform_0, window_bounds = array<i64: 32, 32>}, {pipeline_mode = #tpu.pipeline_mode<synchronous>, transform_indices = @transform_1, window_bounds = array<i64: 15, 32, 32>}, {pipeline_mode = #tpu.pipeline_mode<synchronous>, transform_indices = @transform_2, window_bounds = array<i64: 41, 32>}, {pipeline_mode = #tpu.pipeline_mode<synchronous>, transform_indices = @transform_3, window_bounds = array<i64: 32, 544>}, {pipeline_mode = #tpu.pipeline_mode<synchronous>, transform_indices = @transform_4, window_bounds = array<i64: 2, 32, 32>}, {pipeline_mode = #tpu.pipeline_mode<synchronous>, transform_indices = @transform_5, window_bounds = array<i64: 128, 32>}, {pipeline_mode = #tpu.pipeline_mode<synchronous>, transform_indices = @transform_6, window_bounds = array<i64: 32, 32>}]} {
    %c0 = arith.constant 0 : index
    %c0_0 = arith.constant 0 : index
    %0 = vector.load %arg1[%c0, %c0_0] : memref<32x32xf32, #tpu.memory_space<vmem>>, vector<32x32xf32>
    %c0_1 = arith.constant 0 : index
    %c0_2 = arith.constant 0 : index
    %1 = vector.load %arg3[%c0_1, %c0_2] : memref<41x32xf32, #tpu.memory_space<vmem>>, vector<1x32xf32>
    %c1 = arith.constant 1 : index
    %c0_3 = arith.constant 0 : index
    %2 = vector.load %arg3[%c1, %c0_3] : memref<41x32xf32, #tpu.memory_space<vmem>>, vector<1x32xf32>
    %cst = arith.constant dense<0.000000e+00> : vector<32xf32>
    %3 = vector.multi_reduction <add>, %0, %cst [1] : vector<32x32xf32> to vector<32xf32>
    %4 = vector.shape_cast %3 : vector<32xf32> to vector<32x1xf32>
    %cst_4 = arith.constant 3.200000e+01 : f32
    %5 = vector.broadcast %cst_4 : f32 to vector<32x1xf32>
    %6 = arith.divf %4, %5 : vector<32x1xf32>
    %7 = arith.mulf %0, %0 : vector<32x32xf32>
    %cst_5 = arith.constant dense<0.000000e+00> : vector<32xf32>
    %8 = vector.multi_reduction <add>, %7, %cst_5 [1] : vector<32x32xf32> to vector<32xf32>
    %9 = vector.shape_cast %8 : vector<32xf32> to vector<32x1xf32>
    %cst_6 = arith.constant 3.200000e+01 : f32
    %10 = vector.broadcast %cst_6 : f32 to vector<32x1xf32>
    %11 = arith.divf %9, %10 : vector<32x1xf32>
    %12 = arith.mulf %6, %6 : vector<32x1xf32>
    %13 = arith.subf %11, %12 : vector<32x1xf32>
    %14 = vector.broadcast %6 : vector<32x1xf32> to vector<32x32xf32>
    %15 = arith.subf %0, %14 : vector<32x32xf32>
    %cst_7 = arith.constant 9.99999974E-6 : f32
    %16 = vector.broadcast %cst_7 : f32 to vector<32x1xf32>
    %17 = arith.addf %13, %16 : vector<32x1xf32>
    %18 = math.rsqrt %17 : vector<32x1xf32>
    %19 = vector.broadcast %18 : vector<32x1xf32> to vector<32x32xf32>
    %20 = arith.mulf %15, %19 : vector<32x32xf32>
    %21 = vector.broadcast %1 : vector<1x32xf32> to vector<32x32xf32>
    %22 = arith.mulf %20, %21 : vector<32x32xf32>
    %23 = vector.broadcast %2 : vector<1x32xf32> to vector<32x32xf32>
    %24 = arith.addf %22, %23 : vector<32x32xf32>
    %c0_8 = arith.constant 0 : index
    %c0_9 = arith.constant 0 : index
    %c0_10 = arith.constant 0 : index
    %25 = vector.load %arg2[%c0_8, %c0_9, %c0_10] : memref<15x32x32xf32, #tpu.memory_space<vmem>>, vector<1x32x32xf32>
    %26 = vector.shape_cast %25 : vector<1x32x32xf32> to vector<32x32xf32>
    %cst_11 = arith.constant dense<0.000000e+00> : vector<32x32xf32>
    %27 = tpu.matmul %24, %26, %cst_11 {dimension_numbers = #tpu.dot_dimension_numbers<[1], [0], [0], [1], [0, 0, 1, 1], [], []>} : vector<32x32xf32>, vector<32x32xf32>, vector<32x32xf32> -> vector<32x32xf32>
    %c2 = arith.constant 2 : index
    %c0_12 = arith.constant 0 : index
    %28 = vector.load %arg3[%c2, %c0_12] : memref<41x32xf32, #tpu.memory_space<vmem>>, vector<1x32xf32>
    %29 = vector.broadcast %28 : vector<1x32xf32> to vector<32x32xf32>
    %30 = arith.addf %27, %29 : vector<32x32xf32>
    %c1_13 = arith.constant 1 : index
    %c0_14 = arith.constant 0 : index
    %c0_15 = arith.constant 0 : index
    %31 = vector.load %arg2[%c1_13, %c0_14, %c0_15] : memref<15x32x32xf32, #tpu.memory_space<vmem>>, vector<1x32x32xf32>
    %32 = vector.shape_cast %31 : vector<1x32x32xf32> to vector<32x32xf32>
    %cst_16 = arith.constant dense<0.000000e+00> : vector<32x32xf32>
    %33 = tpu.matmul %24, %32, %cst_16 {dimension_numbers = #tpu.dot_dimension_numbers<[1], [0], [0], [1], [0, 0, 1, 1], [], []>} : vector<32x32xf32>, vector<32x32xf32>, vector<32x32xf32> -> vector<32x32xf32>
    %c3 = arith.constant 3 : index
    %c0_17 = arith.constant 0 : index
    %34 = vector.load %arg3[%c3, %c0_17] : memref<41x32xf32, #tpu.memory_space<vmem>>, vector<1x32xf32>
    %35 = vector.broadcast %34 : vector<1x32xf32> to vector<32x32xf32>
    %36 = arith.addf %33, %35 : vector<32x32xf32>
    %37 = arith.negf %36 : vector<32x32xf32>
    %38 = math.exp %37 : vector<32x32xf32>
    %cst_18 = arith.constant 1.000000e+00 : f32
    %39 = vector.broadcast %cst_18 : f32 to vector<32x32xf32>
    %40 = arith.addf %39, %38 : vector<32x32xf32>
    %41 = arith.divf %39, %40 : vector<32x32xf32>
    %42 = arith.mulf %36, %41 : vector<32x32xf32>
    %43 = arith.mulf %30, %42 : vector<32x32xf32>
    %c24 = arith.constant 24 : index
    %c0_19 = arith.constant 0 : index
    %44 = vector.load %arg3[%c24, %c0_19] : memref<41x32xf32, #tpu.memory_space<vmem>>, vector<1x32xf32>
    %45 = vector.broadcast %44 : vector<1x32xf32> to vector<32x32xf32>
    %46 = arith.mulf %43, %45 : vector<32x32xf32>
    %c0_20 = arith.constant 0 : index
    %c0_21 = arith.constant 0 : index
    %47 = vector.load %arg8[%c0_20, %c0_21] : memref<544x32xf32, #tpu.memory_space<vmem>>, vector<32x32xf32>
    tpu.vector_store %arg8[%c0_20, %c0_21], %46 {strides = array<i32>} : memref<544x32xf32, #tpu.memory_space<vmem>>, vector<32x32xf32>,
    %c25 = arith.constant 25 : index
    %c0_22 = arith.constant 0 : index
    %48 = vector.load %arg3[%c25, %c0_22] : memref<41x32xf32, #tpu.memory_space<vmem>>, vector<1x32xf32>
    %49 = vector.broadcast %48 : vector<1x32xf32> to vector<32x32xf32>
    %50 = arith.mulf %43, %49 : vector<32x32xf32>
    %c32 = arith.constant 32 : index
    %c0_23 = arith.constant 0 : index
    %51 = vector.load %arg8[%c32, %c0_23] : memref<544x32xf32, #tpu.memory_space<vmem>>, vector<32x32xf32>
    tpu.vector_store %arg8[%c32, %c0_23], %50 {strides = array<i32>} : memref<544x32xf32, #tpu.memory_space<vmem>>, vector<32x32xf32>,
    %c26 = arith.constant 26 : index
    %c0_24 = arith.constant 0 : index
    %52 = vector.load %arg3[%c26, %c0_24] : memref<41x32xf32, #tpu.memory_space<vmem>>, vector<1x32xf32>
    %53 = vector.broadcast %52 : vector<1x32xf32> to vector<32x32xf32>
    %54 = arith.mulf %43, %53 : vector<32x32xf32>
    %c64 = arith.constant 64 : index
    %c0_25 = arith.constant 0 : index
    %55 = vector.load %arg8[%c64, %c0_25] : memref<544x32xf32, #tpu.memory_space<vmem>>, vector<32x32xf32>
    tpu.vector_store %arg8[%c64, %c0_25], %54 {strides = array<i32>} : memref<544x32xf32, #tpu.memory_space<vmem>>, vector<32x32xf32>,
    %c27 = arith.constant 27 : index
    %c0_26 = arith.constant 0 : index
    %56 = vector.load %arg3[%c27, %c0_26] : memref<41x32xf32, #tpu.memory_space<vmem>>, vector<1x32xf32>
    %57 = vector.broadcast %56 : vector<1x32xf32> to vector<32x32xf32>
    %58 = arith.mulf %43, %57 : vector<32x32xf32>
    %c96 = arith.constant 96 : index
    %c0_27 = arith.constant 0 : index
    %59 = vector.load %arg8[%c96, %c0_27] : memref<544x32xf32, #tpu.memory_space<vmem>>, vector<32x32xf32>
    tpu.vector_store %arg8[%c96, %c0_27], %58 {strides = array<i32>} : memref<544x32xf32, #tpu.memory_space<vmem>>, vector<32x32xf32>,
    %c28 = arith.constant 28 : index
    %c0_28 = arith.constant 0 : index
    %60 = vector.load %arg3[%c28, %c0_28] : memref<41x32xf32, #tpu.memory_space<vmem>>, vector<1x32xf32>
    %61 = vector.broadcast %60 : vector<1x32xf32> to vector<32x32xf32>
    %62 = arith.mulf %43, %61 : vector<32x32xf32>
    %c128 = arith.constant 128 : index
    %c0_29 = arith.constant 0 : index
    %63 = vector.load %arg8[%c128, %c0_29] : memref<544x32xf32, #tpu.memory_space<vmem>>, vector<32x32xf32>
    tpu.vector_store %arg8[%c128, %c0_29], %62 {strides = array<i32>} : memref<544x32xf32, #tpu.memory_space<vmem>>, vector<32x32xf32>,
    %c29 = arith.constant 29 : index
    %c0_30 = arith.constant 0 : index
    %64 = vector.load %arg3[%c29, %c0_30] : memref<41x32xf32, #tpu.memory_space<vmem>>, vector<1x32xf32>
    %65 = vector.broadcast %64 : vector<1x32xf32> to vector<32x32xf32>
    %66 = arith.mulf %43, %65 : vector<32x32xf32>
    %c160 = arith.constant 160 : index
    %c0_31 = arith.constant 0 : index
    %67 = vector.load %arg8[%c160, %c0_31] : memref<544x32xf32, #tpu.memory_space<vmem>>, vector<32x32xf32>
    tpu.vector_store %arg8[%c160, %c0_31], %66 {strides = array<i32>} : memref<544x32xf32, #tpu.memory_space<vmem>>, vector<32x32xf32>,
    %c30 = arith.constant 30 : index
    %c0_32 = arith.constant 0 : index
    %68 = vector.load %arg3[%c30, %c0_32] : memref<41x32xf32, #tpu.memory_space<vmem>>, vector<1x32xf32>
    %69 = vector.broadcast %68 : vector<1x32xf32> to vector<32x32xf32>
    %70 = arith.mulf %43, %69 : vector<32x32xf32>
    %c192 = arith.constant 192 : index
    %c0_33 = arith.constant 0 : index
    %71 = vector.load %arg8[%c192, %c0_33] : memref<544x32xf32, #tpu.memory_space<vmem>>, vector<32x32xf32>
    tpu.vector_store %arg8[%c192, %c0_33], %70 {strides = array<i32>} : memref<544x32xf32, #tpu.memory_space<vmem>>, vector<32x32xf32>,
    %c31 = arith.constant 31 : index
    %c0_34 = arith.constant 0 : index
    %72 = vector.load %arg3[%c31, %c0_34] : memref<41x32xf32, #tpu.memory_space<vmem>>, vector<1x32xf32>
    %73 = vector.broadcast %72 : vector<1x32xf32> to vector<32x32xf32>
    %74 = arith.mulf %43, %73 : vector<32x32xf32>
    %c224 = arith.constant 224 : index
    %c0_35 = arith.constant 0 : index
    %75 = vector.load %arg8[%c224, %c0_35] : memref<544x32xf32, #tpu.memory_space<vmem>>, vector<32x32xf32>
    tpu.vector_store %arg8[%c224, %c0_35], %74 {strides = array<i32>} : memref<544x32xf32, #tpu.memory_space<vmem>>, vector<32x32xf32>,
    %c32_36 = arith.constant 32 : index
    %c0_37 = arith.constant 0 : index
    %76 = vector.load %arg3[%c32_36, %c0_37] : memref<41x32xf32, #tpu.memory_space<vmem>>, vector<1x32xf32>
    %77 = vector.broadcast %76 : vector<1x32xf32> to vector<32x32xf32>
    %78 = arith.mulf %43, %77 : vector<32x32xf32>
    %c256 = arith.constant 256 : index
    %c0_38 = arith.constant 0 : index
    %79 = vector.load %arg8[%c256, %c0_38] : memref<544x32xf32, #tpu.memory_space<vmem>>, vector<32x32xf32>
    tpu.vector_store %arg8[%c256, %c0_38], %78 {strides = array<i32>} : memref<544x32xf32, #tpu.memory_space<vmem>>, vector<32x32xf32>,
    %c33 = arith.constant 33 : index
    %c0_39 = arith.constant 0 : index
    %80 = vector.load %arg3[%c33, %c0_39] : memref<41x32xf32, #tpu.memory_space<vmem>>, vector<1x32xf32>
    %81 = vector.broadcast %80 : vector<1x32xf32> to vector<32x32xf32>
    %82 = arith.mulf %43, %81 : vector<32x32xf32>
    %c288 = arith.constant 288 : index
    %c0_40 = arith.constant 0 : index
    %83 = vector.load %arg8[%c288, %c0_40] : memref<544x32xf32, #tpu.memory_space<vmem>>, vector<32x32xf32>
    tpu.vector_store %arg8[%c288, %c0_40], %82 {strides = array<i32>} : memref<544x32xf32, #tpu.memory_space<vmem>>, vector<32x32xf32>,
    %c34 = arith.constant 34 : index
    %c0_41 = arith.constant 0 : index
    %84 = vector.load %arg3[%c34, %c0_41] : memref<41x32xf32, #tpu.memory_space<vmem>>, vector<1x32xf32>
    %85 = vector.broadcast %84 : vector<1x32xf32> to vector<32x32xf32>
    %86 = arith.mulf %43, %85 : vector<32x32xf32>
    %c320 = arith.constant 320 : index
    %c0_42 = arith.constant 0 : index
    %87 = vector.load %arg8[%c320, %c0_42] : memref<544x32xf32, #tpu.memory_space<vmem>>, vector<32x32xf32>
    tpu.vector_store %arg8[%c320, %c0_42], %86 {strides = array<i32>} : memref<544x32xf32, #tpu.memory_space<vmem>>, vector<32x32xf32>,
    %c35 = arith.constant 35 : index
    %c0_43 = arith.constant 0 : index
    %88 = vector.load %arg3[%c35, %c0_43] : memref<41x32xf32, #tpu.memory_space<vmem>>, vector<1x32xf32>
    %89 = vector.broadcast %88 : vector<1x32xf32> to vector<32x32xf32>
    %90 = arith.mulf %43, %89 : vector<32x32xf32>
    %c352 = arith.constant 352 : index
    %c0_44 = arith.constant 0 : index
    %91 = vector.load %arg8[%c352, %c0_44] : memref<544x32xf32, #tpu.memory_space<vmem>>, vector<32x32xf32>
    tpu.vector_store %arg8[%c352, %c0_44], %90 {strides = array<i32>} : memref<544x32xf32, #tpu.memory_space<vmem>>, vector<32x32xf32>,
    %c36 = arith.constant 36 : index
    %c0_45 = arith.constant 0 : index
    %92 = vector.load %arg3[%c36, %c0_45] : memref<41x32xf32, #tpu.memory_space<vmem>>, vector<1x32xf32>
    %93 = vector.broadcast %92 : vector<1x32xf32> to vector<32x32xf32>
    %94 = arith.mulf %43, %93 : vector<32x32xf32>
    %c384 = arith.constant 384 : index
    %c0_46 = arith.constant 0 : index
    %95 = vector.load %arg8[%c384, %c0_46] : memref<544x32xf32, #tpu.memory_space<vmem>>, vector<32x32xf32>
    tpu.vector_store %arg8[%c384, %c0_46], %94 {strides = array<i32>} : memref<544x32xf32, #tpu.memory_space<vmem>>, vector<32x32xf32>,
    %c37 = arith.constant 37 : index
    %c0_47 = arith.constant 0 : index
    %96 = vector.load %arg3[%c37, %c0_47] : memref<41x32xf32, #tpu.memory_space<vmem>>, vector<1x32xf32>
    %97 = vector.broadcast %96 : vector<1x32xf32> to vector<32x32xf32>
    %98 = arith.mulf %43, %97 : vector<32x32xf32>
    %c416 = arith.constant 416 : index
    %c0_48 = arith.constant 0 : index
    %99 = vector.load %arg8[%c416, %c0_48] : memref<544x32xf32, #tpu.memory_space<vmem>>, vector<32x32xf32>
    tpu.vector_store %arg8[%c416, %c0_48], %98 {strides = array<i32>} : memref<544x32xf32, #tpu.memory_space<vmem>>, vector<32x32xf32>,
    %c38 = arith.constant 38 : index
    %c0_49 = arith.constant 0 : index
    %100 = vector.load %arg3[%c38, %c0_49] : memref<41x32xf32, #tpu.memory_space<vmem>>, vector<1x32xf32>
    %101 = vector.broadcast %100 : vector<1x32xf32> to vector<32x32xf32>
    %102 = arith.mulf %43, %101 : vector<32x32xf32>
    %c448 = arith.constant 448 : index
    %c0_50 = arith.constant 0 : index
    %103 = vector.load %arg8[%c448, %c0_50] : memref<544x32xf32, #tpu.memory_space<vmem>>, vector<32x32xf32>
    tpu.vector_store %arg8[%c448, %c0_50], %102 {strides = array<i32>} : memref<544x32xf32, #tpu.memory_space<vmem>>, vector<32x32xf32>,
    %c39 = arith.constant 39 : index
    %c0_51 = arith.constant 0 : index
    %104 = vector.load %arg3[%c39, %c0_51] : memref<41x32xf32, #tpu.memory_space<vmem>>, vector<1x32xf32>
    %105 = vector.broadcast %104 : vector<1x32xf32> to vector<32x32xf32>
    %106 = arith.mulf %43, %105 : vector<32x32xf32>
    %c480 = arith.constant 480 : index
    %c0_52 = arith.constant 0 : index
    %107 = vector.load %arg8[%c480, %c0_52] : memref<544x32xf32, #tpu.memory_space<vmem>>, vector<32x32xf32>
    tpu.vector_store %arg8[%c480, %c0_52], %106 {strides = array<i32>} : memref<544x32xf32, #tpu.memory_space<vmem>>, vector<32x32xf32>,
    %c40 = arith.constant 40 : index
    %c0_53 = arith.constant 0 : index
    %108 = vector.load %arg3[%c40, %c0_53] : memref<41x32xf32, #tpu.memory_space<vmem>>, vector<1x32xf32>
    %109 = vector.broadcast %108 : vector<1x32xf32> to vector<32x32xf32>
    %110 = arith.mulf %43, %109 : vector<32x32xf32>
    %c512 = arith.constant 512 : index
    %c0_54 = arith.constant 0 : index
    %111 = vector.load %arg8[%c512, %c0_54] : memref<544x32xf32, #tpu.memory_space<vmem>>, vector<32x32xf32>
    tpu.vector_store %arg8[%c512, %c0_54], %110 {strides = array<i32>} : memref<544x32xf32, #tpu.memory_space<vmem>>, vector<32x32xf32>,
    %c0_55 = arith.constant 0 : index
    %c0_56 = arith.constant 0 : index
    %112 = vector.load %arg4[%c0_55, %c0_56] : memref<32x544xf32, #tpu.memory_space<vmem>>, vector<32x544xf32>
    %c0_57 = arith.constant 0 : index
    %c0_58 = arith.constant 0 : index
    %113 = vector.load %arg8[%c0_57, %c0_58] : memref<544x32xf32, #tpu.memory_space<vmem>>, vector<544x32xf32>
    %cst_59 = arith.constant dense<0.000000e+00> : vector<32x32xf32>
    %114 = tpu.matmul %112, %113, %cst_59 {dimension_numbers = #tpu.dot_dimension_numbers<[1], [0], [0], [1], [0, 0, 1, 1], [], []>} : vector<32x544xf32>, vector<544x32xf32>, vector<32x32xf32> -> vector<32x32xf32>
    %c4 = arith.constant 4 : index
    %c0_60 = arith.constant 0 : index
    %115 = vector.load %arg3[%c4, %c0_60] : memref<41x32xf32, #tpu.memory_space<vmem>>, vector<1x32xf32>
    %116 = vector.broadcast %115 : vector<1x32xf32> to vector<32x32xf32>
    %117 = arith.addf %114, %116 : vector<32x32xf32>
    %c5 = arith.constant 5 : index
    %c0_61 = arith.constant 0 : index
    %118 = vector.load %arg3[%c5, %c0_61] : memref<41x32xf32, #tpu.memory_space<vmem>>, vector<1x32xf32>
    %119 = vector.broadcast %118 : vector<1x32xf32> to vector<32x32xf32>
    %120 = arith.mulf %117, %119 : vector<32x32xf32>
    %c6 = arith.constant 6 : index
    %c0_62 = arith.constant 0 : index
    %121 = vector.load %arg3[%c6, %c0_62] : memref<41x32xf32, #tpu.memory_space<vmem>>, vector<1x32xf32>
    %122 = vector.broadcast %121 : vector<1x32xf32> to vector<32x32xf32>
    %123 = arith.addf %120, %122 : vector<32x32xf32>
    %124 = arith.negf %123 : vector<32x32xf32>
    %125 = math.exp %124 : vector<32x32xf32>
    %cst_63 = arith.constant 1.000000e+00 : f32
    %126 = vector.broadcast %cst_63 : f32 to vector<32x32xf32>
    %127 = arith.addf %126, %125 : vector<32x32xf32>
    %128 = arith.divf %126, %127 : vector<32x32xf32>
    %129 = arith.mulf %123, %128 : vector<32x32xf32>
    %c2_64 = arith.constant 2 : index
    %c0_65 = arith.constant 0 : index
    %c0_66 = arith.constant 0 : index
    %130 = vector.load %arg2[%c2_64, %c0_65, %c0_66] : memref<15x32x32xf32, #tpu.memory_space<vmem>>, vector<1x32x32xf32>
    %131 = vector.shape_cast %130 : vector<1x32x32xf32> to vector<32x32xf32>
    %cst_67 = arith.constant dense<0.000000e+00> : vector<32x32xf32>
    %132 = tpu.matmul %129, %131, %cst_67 {dimension_numbers = #tpu.dot_dimension_numbers<[1], [0], [0], [1], [0, 0, 1, 1], [], []>} : vector<32x32xf32>, vector<32x32xf32>, vector<32x32xf32> -> vector<32x32xf32>
    %c7 = arith.constant 7 : index
    %c0_68 = arith.constant 0 : index
    %133 = vector.load %arg3[%c7, %c0_68] : memref<41x32xf32, #tpu.memory_space<vmem>>, vector<1x32xf32>
    %134 = vector.broadcast %133 : vector<1x32xf32> to vector<32x32xf32>
    %135 = arith.addf %132, %134 : vector<32x32xf32>
    %136 = arith.addf %135, %0 : vector<32x32xf32>
    %c8 = arith.constant 8 : index
    %c0_69 = arith.constant 0 : index
    %137 = vector.load %arg3[%c8, %c0_69] : memref<41x32xf32, #tpu.memory_space<vmem>>, vector<1x32xf32>
    %c9 = arith.constant 9 : index
    %c0_70 = arith.constant 0 : index
    %138 = vector.load %arg3[%c9, %c0_70] : memref<41x32xf32, #tpu.memory_space<vmem>>, vector<1x32xf32>
    %cst_71 = arith.constant dense<0.000000e+00> : vector<32xf32>
    %139 = vector.multi_reduction <add>, %136, %cst_71 [1] : vector<32x32xf32> to vector<32xf32>
    %140 = vector.shape_cast %139 : vector<32xf32> to vector<32x1xf32>
    %cst_72 = arith.constant 3.200000e+01 : f32
    %141 = vector.broadcast %cst_72 : f32 to vector<32x1xf32>
    %142 = arith.divf %140, %141 : vector<32x1xf32>
    %143 = arith.mulf %136, %136 : vector<32x32xf32>
    %cst_73 = arith.constant dense<0.000000e+00> : vector<32xf32>
    %144 = vector.multi_reduction <add>, %143, %cst_73 [1] : vector<32x32xf32> to vector<32xf32>
    %145 = vector.shape_cast %144 : vector<32xf32> to vector<32x1xf32>
    %cst_74 = arith.constant 3.200000e+01 : f32
    %146 = vector.broadcast %cst_74 : f32 to vector<32x1xf32>
    %147 = arith.divf %145, %146 : vector<32x1xf32>
    %148 = arith.mulf %142, %142 : vector<32x1xf32>
    %149 = arith.subf %147, %148 : vector<32x1xf32>
    %150 = vector.broadcast %142 : vector<32x1xf32> to vector<32x32xf32>
    %151 = arith.subf %136, %150 : vector<32x32xf32>
    %cst_75 = arith.constant 9.99999974E-6 : f32
    %152 = vector.broadcast %cst_75 : f32 to vector<32x1xf32>
    %153 = arith.addf %149, %152 : vector<32x1xf32>
    %154 = math.rsqrt %153 : vector<32x1xf32>
    %155 = vector.broadcast %154 : vector<32x1xf32> to vector<32x32xf32>
    %156 = arith.mulf %151, %155 : vector<32x32xf32>
    %157 = vector.broadcast %137 : vector<1x32xf32> to vector<32x32xf32>
    %158 = arith.mulf %156, %157 : vector<32x32xf32>
    %159 = vector.broadcast %138 : vector<1x32xf32> to vector<32x32xf32>
    %160 = arith.addf %158, %159 : vector<32x32xf32>
    %c3_76 = arith.constant 3 : index
    %c0_77 = arith.constant 0 : index
    %c0_78 = arith.constant 0 : index
    %161 = vector.load %arg2[%c3_76, %c0_77, %c0_78] : memref<15x32x32xf32, #tpu.memory_space<vmem>>, vector<1x32x32xf32>
    %162 = vector.shape_cast %161 : vector<1x32x32xf32> to vector<32x32xf32>
    %cst_79 = arith.constant dense<0.000000e+00> : vector<32x32xf32>
    %163 = tpu.matmul %160, %162, %cst_79 {dimension_numbers = #tpu.dot_dimension_numbers<[1], [0], [0], [1], [0, 0, 1, 1], [], []>} : vector<32x32xf32>, vector<32x32xf32>, vector<32x32xf32> -> vector<32x32xf32>
    %c10 = arith.constant 10 : index
    %c0_80 = arith.constant 0 : index
    %164 = vector.load %arg3[%c10, %c0_80] : memref<41x32xf32, #tpu.memory_space<vmem>>, vector<1x32xf32>
    %165 = vector.broadcast %164 : vector<1x32xf32> to vector<32x32xf32>
    %166 = arith.addf %163, %165 : vector<32x32xf32>
    %c4_81 = arith.constant 4 : index
    %c0_82 = arith.constant 0 : index
    %c0_83 = arith.constant 0 : index
    %167 = vector.load %arg2[%c4_81, %c0_82, %c0_83] : memref<15x32x32xf32, #tpu.memory_space<vmem>>, vector<1x32x32xf32>
    %168 = vector.shape_cast %167 : vector<1x32x32xf32> to vector<32x32xf32>
    %cst_84 = arith.constant dense<0.000000e+00> : vector<32x32xf32>
    %169 = tpu.matmul %160, %168, %cst_84 {dimension_numbers = #tpu.dot_dimension_numbers<[1], [0], [0], [1], [0, 0, 1, 1], [], []>} : vector<32x32xf32>, vector<32x32xf32>, vector<32x32xf32> -> vector<32x32xf32>
    %c11 = arith.constant 11 : index
    %c0_85 = arith.constant 0 : index
    %170 = vector.load %arg3[%c11, %c0_85] : memref<41x32xf32, #tpu.memory_space<vmem>>, vector<1x32xf32>
    %171 = vector.broadcast %170 : vector<1x32xf32> to vector<32x32xf32>
    %172 = arith.addf %169, %171 : vector<32x32xf32>
    %173 = arith.negf %172 : vector<32x32xf32>
    %174 = math.exp %173 : vector<32x32xf32>
    %cst_86 = arith.constant 1.000000e+00 : f32
    %175 = vector.broadcast %cst_86 : f32 to vector<32x32xf32>
    %176 = arith.addf %175, %174 : vector<32x32xf32>
    %177 = arith.divf %175, %176 : vector<32x32xf32>
    %178 = arith.mulf %172, %177 : vector<32x32xf32>
    %179 = arith.mulf %166, %178 : vector<32x32xf32>
    %c5_87 = arith.constant 5 : index
    %c0_88 = arith.constant 0 : index
    %c0_89 = arith.constant 0 : index
    %180 = vector.load %arg2[%c5_87, %c0_88, %c0_89] : memref<15x32x32xf32, #tpu.memory_space<vmem>>, vector<1x32x32xf32>
    %181 = vector.shape_cast %180 : vector<1x32x32xf32> to vector<32x32xf32>
    %cst_90 = arith.constant dense<0.000000e+00> : vector<32x32xf32>
    %182 = tpu.matmul %179, %181, %cst_90 {dimension_numbers = #tpu.dot_dimension_numbers<[1], [0], [0], [1], [0, 0, 1, 1], [], []>} : vector<32x32xf32>, vector<32x32xf32>, vector<32x32xf32> -> vector<32x32xf32>
    %c12 = arith.constant 12 : index
    %c0_91 = arith.constant 0 : index
    %183 = vector.load %arg3[%c12, %c0_91] : memref<41x32xf32, #tpu.memory_space<vmem>>, vector<1x32xf32>
    %184 = vector.broadcast %183 : vector<1x32xf32> to vector<32x32xf32>
    %185 = arith.addf %182, %184 : vector<32x32xf32>
    %186 = arith.addf %136, %185 : vector<32x32xf32>
    %c13 = arith.constant 13 : index
    %c0_92 = arith.constant 0 : index
    %187 = vector.load %arg3[%c13, %c0_92] : memref<41x32xf32, #tpu.memory_space<vmem>>, vector<1x32xf32>
    %c14 = arith.constant 14 : index
    %c0_93 = arith.constant 0 : index
    %188 = vector.load %arg3[%c14, %c0_93] : memref<41x32xf32, #tpu.memory_space<vmem>>, vector<1x32xf32>
    %cst_94 = arith.constant dense<0.000000e+00> : vector<32xf32>
    %189 = vector.multi_reduction <add>, %186, %cst_94 [1] : vector<32x32xf32> to vector<32xf32>
    %190 = vector.shape_cast %189 : vector<32xf32> to vector<32x1xf32>
    %cst_95 = arith.constant 3.200000e+01 : f32
    %191 = vector.broadcast %cst_95 : f32 to vector<32x1xf32>
    %192 = arith.divf %190, %191 : vector<32x1xf32>
    %193 = arith.mulf %186, %186 : vector<32x32xf32>
    %cst_96 = arith.constant dense<0.000000e+00> : vector<32xf32>
    %194 = vector.multi_reduction <add>, %193, %cst_96 [1] : vector<32x32xf32> to vector<32xf32>
    %195 = vector.shape_cast %194 : vector<32xf32> to vector<32x1xf32>
    %cst_97 = arith.constant 3.200000e+01 : f32
    %196 = vector.broadcast %cst_97 : f32 to vector<32x1xf32>
    %197 = arith.divf %195, %196 : vector<32x1xf32>
    %198 = arith.mulf %192, %192 : vector<32x1xf32>
    %199 = arith.subf %197, %198 : vector<32x1xf32>
    %200 = vector.broadcast %192 : vector<32x1xf32> to vector<32x32xf32>
    %201 = arith.subf %186, %200 : vector<32x32xf32>
    %cst_98 = arith.constant 9.99999974E-6 : f32
    %202 = vector.broadcast %cst_98 : f32 to vector<32x1xf32>
    %203 = arith.addf %199, %202 : vector<32x1xf32>
    %204 = math.rsqrt %203 : vector<32x1xf32>
    %205 = vector.broadcast %204 : vector<32x1xf32> to vector<32x32xf32>
    %206 = arith.mulf %201, %205 : vector<32x32xf32>
    %207 = vector.broadcast %187 : vector<1x32xf32> to vector<32x32xf32>
    %208 = arith.mulf %206, %207 : vector<32x32xf32>
    %209 = vector.broadcast %188 : vector<1x32xf32> to vector<32x32xf32>
    %210 = arith.addf %208, %209 : vector<32x32xf32>
    %c0_99 = arith.constant 0 : index
    %c0_100 = arith.constant 0 : index
    %c0_101 = arith.constant 0 : index
    %211 = vector.load %arg5[%c0_99, %c0_100, %c0_101] : memref<2x32x32xf32, #tpu.memory_space<vmem>>, vector<1x32x32xf32>
    %212 = vector.shape_cast %211 : vector<1x32x32xf32> to vector<32x32xf32>
    %c1_102 = arith.constant 1 : index
    %c0_103 = arith.constant 0 : index
    %c0_104 = arith.constant 0 : index
    %213 = vector.load %arg5[%c1_102, %c0_103, %c0_104] : memref<2x32x32xf32, #tpu.memory_space<vmem>>, vector<1x32x32xf32>
    %214 = vector.shape_cast %213 : vector<1x32x32xf32> to vector<32x32xf32>
    %c6_105 = arith.constant 6 : index
    %c0_106 = arith.constant 0 : index
    %c0_107 = arith.constant 0 : index
    %215 = vector.load %arg2[%c6_105, %c0_106, %c0_107] : memref<15x32x32xf32, #tpu.memory_space<vmem>>, vector<1x32x32xf32>
    %216 = vector.shape_cast %215 : vector<1x32x32xf32> to vector<32x32xf32>
    %cst_108 = arith.constant dense<0.000000e+00> : vector<32x32xf32>
    %217 = tpu.matmul %210, %216, %cst_108 {dimension_numbers = #tpu.dot_dimension_numbers<[1], [0], [0], [1], [0, 0, 1, 1], [], []>} : vector<32x32xf32>, vector<32x32xf32>, vector<32x32xf32> -> vector<32x32xf32>
    %218 = arith.mulf %217, %212 : vector<32x32xf32>
    %c7_109 = arith.constant 7 : index
    %c0_110 = arith.constant 0 : index
    %c0_111 = arith.constant 0 : index
    %219 = vector.load %arg2[%c7_109, %c0_110, %c0_111] : memref<15x32x32xf32, #tpu.memory_space<vmem>>, vector<1x32x32xf32>
    %220 = vector.shape_cast %219 : vector<1x32x32xf32> to vector<32x32xf32>
    %cst_112 = arith.constant dense<0.000000e+00> : vector<32x32xf32>
    %221 = tpu.matmul %210, %220, %cst_112 {dimension_numbers = #tpu.dot_dimension_numbers<[1], [0], [0], [1], [0, 0, 1, 1], [], []>} : vector<32x32xf32>, vector<32x32xf32>, vector<32x32xf32> -> vector<32x32xf32>
    %222 = arith.mulf %221, %214 : vector<32x32xf32>
    %223 = arith.addf %218, %222 : vector<32x32xf32>
    %c8_113 = arith.constant 8 : index
    %c0_114 = arith.constant 0 : index
    %c0_115 = arith.constant 0 : index
    %224 = vector.load %arg2[%c8_113, %c0_114, %c0_115] : memref<15x32x32xf32, #tpu.memory_space<vmem>>, vector<1x32x32xf32>
    %225 = vector.shape_cast %224 : vector<1x32x32xf32> to vector<32x32xf32>
    %cst_116 = arith.constant dense<0.000000e+00> : vector<32x32xf32>
    %226 = tpu.matmul %210, %225, %cst_116 {dimension_numbers = #tpu.dot_dimension_numbers<[1], [0], [0], [1], [0, 0, 1, 1], [], []>} : vector<32x32xf32>, vector<32x32xf32>, vector<32x32xf32> -> vector<32x32xf32>
    %227 = arith.mulf %226, %212 : vector<32x32xf32>
    %c9_117 = arith.constant 9 : index
    %c0_118 = arith.constant 0 : index
    %c0_119 = arith.constant 0 : index
    %228 = vector.load %arg2[%c9_117, %c0_118, %c0_119] : memref<15x32x32xf32, #tpu.memory_space<vmem>>, vector<1x32x32xf32>
    %229 = vector.shape_cast %228 : vector<1x32x32xf32> to vector<32x32xf32>
    %cst_120 = arith.constant dense<0.000000e+00> : vector<32x32xf32>
    %230 = tpu.matmul %210, %229, %cst_120 {dimension_numbers = #tpu.dot_dimension_numbers<[1], [0], [0], [1], [0, 0, 1, 1], [], []>} : vector<32x32xf32>, vector<32x32xf32>, vector<32x32xf32> -> vector<32x32xf32>
    %231 = arith.mulf %230, %214 : vector<32x32xf32>
    %232 = arith.addf %227, %231 : vector<32x32xf32>
    %c10_121 = arith.constant 10 : index
    %c0_122 = arith.constant 0 : index
    %c0_123 = arith.constant 0 : index
    %233 = vector.load %arg2[%c10_121, %c0_122, %c0_123] : memref<15x32x32xf32, #tpu.memory_space<vmem>>, vector<1x32x32xf32>
    %234 = vector.shape_cast %233 : vector<1x32x32xf32> to vector<32x32xf32>
    %cst_124 = arith.constant dense<0.000000e+00> : vector<32x32xf32>
    %235 = tpu.matmul %210, %234, %cst_124 {dimension_numbers = #tpu.dot_dimension_numbers<[1], [0], [0], [1], [0, 0, 1, 1], [], []>} : vector<32x32xf32>, vector<32x32xf32>, vector<32x32xf32> -> vector<32x32xf32>
    %c20 = arith.constant 20 : index
    %c0_125 = arith.constant 0 : index
    %236 = vector.load %arg3[%c20, %c0_125] : memref<41x32xf32, #tpu.memory_space<vmem>>, vector<1x32xf32>
    %237 = vector.broadcast %236 : vector<1x32xf32> to vector<32x32xf32>
    %238 = arith.mulf %223, %237 : vector<32x32xf32>
    %c21 = arith.constant 21 : index
    %c0_126 = arith.constant 0 : index
    %239 = vector.load %arg3[%c21, %c0_126] : memref<41x32xf32, #tpu.memory_space<vmem>>, vector<1x32xf32>
    %240 = vector.broadcast %239 : vector<1x32xf32> to vector<32x32xf32>
    %241 = arith.mulf %223, %240 : vector<32x32xf32>
    %c22 = arith.constant 22 : index
    %c0_127 = arith.constant 0 : index
    %242 = vector.load %arg3[%c22, %c0_127] : memref<41x32xf32, #tpu.memory_space<vmem>>, vector<1x32xf32>
    %243 = vector.broadcast %242 : vector<1x32xf32> to vector<32x32xf32>
    %244 = arith.mulf %223, %243 : vector<32x32xf32>
    %c23 = arith.constant 23 : index
    %c0_128 = arith.constant 0 : index
    %245 = vector.load %arg3[%c23, %c0_128] : memref<41x32xf32, #tpu.memory_space<vmem>>, vector<1x32xf32>
    %246 = vector.broadcast %245 : vector<1x32xf32> to vector<32x32xf32>
    %247 = arith.mulf %223, %246 : vector<32x32xf32>
    %248 = tpu.concatenate %238, %241, %244, %247 in 0 : vector<32x32xf32>, vector<32x32xf32>, vector<32x32xf32>, vector<32x32xf32> -> vector<128x32xf32>
    %cst_129 = arith.constant dense<0.000000e+00> : vector<128x32xf32>
    %249 = tpu.matmul %248, %232, %cst_129 {dimension_numbers = #tpu.dot_dimension_numbers<[1], [1], [0], [0], [0, 0, 1, 0], [], []>} : vector<128x32xf32>, vector<32x32xf32>, vector<128x32xf32> -> vector<128x32xf32>
    %c0_130 = arith.constant 0 : index
    %c0_131 = arith.constant 0 : index
    %250 = vector.load %arg6[%c0_130, %c0_131] : memref<128x32xf32, #tpu.memory_space<vmem>>, vector<128x32xf32>
    %251 = arith.addf %249, %250 : vector<128x32xf32>
    %cst_132 = arith.constant dense<0xFF800000> : vector<128xf32>
    %252 = vector.multi_reduction <maximumf>, %251, %cst_132 [1] : vector<128x32xf32> to vector<128xf32>
    %253 = vector.shape_cast %252 : vector<128xf32> to vector<128x1xf32>
    %254 = vector.broadcast %253 : vector<128x1xf32> to vector<128x32xf32>
    %255 = arith.subf %251, %254 : vector<128x32xf32>
    %256 = math.exp %255 : vector<128x32xf32>
    %cst_133 = arith.constant dense<0.000000e+00> : vector<128xf32>
    %257 = vector.multi_reduction <add>, %256, %cst_133 [1] : vector<128x32xf32> to vector<128xf32>
    %258 = vector.shape_cast %257 : vector<128xf32> to vector<128x1xf32>
    %259 = tpu.reciprocal %258 {approx = true} : vector<128x1xf32> -> vector<128x1xf32>
    %260 = vector.broadcast %259 : vector<128x1xf32> to vector<128x32xf32>
    %261 = arith.mulf %256, %260 : vector<128x32xf32>
    %cst_134 = arith.constant dense<0.000000e+00> : vector<128x32xf32>
    %262 = tpu.matmul %261, %235, %cst_134 {dimension_numbers = #tpu.dot_dimension_numbers<[1], [0], [0], [1], [0, 0, 1, 1], [], []>} : vector<128x32xf32>, vector<32x32xf32>, vector<128x32xf32> -> vector<128x32xf32>
    %263 = vector.extract_strided_slice %262 {offsets = [0, 0], sizes = [32, 32], strides = [1, 1]} : vector<128x32xf32> to vector<32x32xf32>
    %c20_135 = arith.constant 20 : index
    %c0_136 = arith.constant 0 : index
    %264 = vector.load %arg3[%c20_135, %c0_136] : memref<41x32xf32, #tpu.memory_space<vmem>>, vector<1x32xf32>
    %265 = vector.broadcast %264 : vector<1x32xf32> to vector<32x32xf32>
    %266 = arith.mulf %263, %265 : vector<32x32xf32>
    %267 = vector.extract_strided_slice %262 {offsets = [32, 0], sizes = [32, 32], strides = [1, 1]} : vector<128x32xf32> to vector<32x32xf32>
    %c21_137 = arith.constant 21 : index
    %c0_138 = arith.constant 0 : index
    %268 = vector.load %arg3[%c21_137, %c0_138] : memref<41x32xf32, #tpu.memory_space<vmem>>, vector<1x32xf32>
    %269 = vector.broadcast %268 : vector<1x32xf32> to vector<32x32xf32>
    %270 = arith.mulf %267, %269 : vector<32x32xf32>
    %271 = arith.addf %266, %270 : vector<32x32xf32>
    %272 = vector.extract_strided_slice %262 {offsets = [64, 0], sizes = [32, 32], strides = [1, 1]} : vector<128x32xf32> to vector<32x32xf32>
    %c22_139 = arith.constant 22 : index
    %c0_140 = arith.constant 0 : index
    %273 = vector.load %arg3[%c22_139, %c0_140] : memref<41x32xf32, #tpu.memory_space<vmem>>, vector<1x32xf32>
    %274 = vector.broadcast %273 : vector<1x32xf32> to vector<32x32xf32>
    %275 = arith.mulf %272, %274 : vector<32x32xf32>
    %276 = arith.addf %271, %275 : vector<32x32xf32>
    %277 = vector.extract_strided_slice %262 {offsets = [96, 0], sizes = [32, 32], strides = [1, 1]} : vector<128x32xf32> to vector<32x32xf32>
    %c23_141 = arith.constant 23 : index
    %c0_142 = arith.constant 0 : index
    %278 = vector.load %arg3[%c23_141, %c0_142] : memref<41x32xf32, #tpu.memory_space<vmem>>, vector<1x32xf32>
    %279 = vector.broadcast %278 : vector<1x32xf32> to vector<32x32xf32>
    %280 = arith.mulf %277, %279 : vector<32x32xf32>
    %281 = arith.addf %276, %280 : vector<32x32xf32>
    %c11_143 = arith.constant 11 : index
    %c0_144 = arith.constant 0 : index
    %c0_145 = arith.constant 0 : index
    %282 = vector.load %arg2[%c11_143, %c0_144, %c0_145] : memref<15x32x32xf32, #tpu.memory_space<vmem>>, vector<1x32x32xf32>
    %283 = vector.shape_cast %282 : vector<1x32x32xf32> to vector<32x32xf32>
    %cst_146 = arith.constant dense<0.000000e+00> : vector<32x32xf32>
    %284 = tpu.matmul %281, %283, %cst_146 {dimension_numbers = #tpu.dot_dimension_numbers<[1], [0], [0], [1], [0, 0, 1, 1], [], []>} : vector<32x32xf32>, vector<32x32xf32>, vector<32x32xf32> -> vector<32x32xf32>
    %285 = arith.addf %186, %284 : vector<32x32xf32>
    %c15 = arith.constant 15 : index
    %c0_147 = arith.constant 0 : index
    %286 = vector.load %arg3[%c15, %c0_147] : memref<41x32xf32, #tpu.memory_space<vmem>>, vector<1x32xf32>
    %c16 = arith.constant 16 : index
    %c0_148 = arith.constant 0 : index
    %287 = vector.load %arg3[%c16, %c0_148] : memref<41x32xf32, #tpu.memory_space<vmem>>, vector<1x32xf32>
    %cst_149 = arith.constant dense<0.000000e+00> : vector<32xf32>
    %288 = vector.multi_reduction <add>, %285, %cst_149 [1] : vector<32x32xf32> to vector<32xf32>
    %289 = vector.shape_cast %288 : vector<32xf32> to vector<32x1xf32>
    %cst_150 = arith.constant 3.200000e+01 : f32
    %290 = vector.broadcast %cst_150 : f32 to vector<32x1xf32>
    %291 = arith.divf %289, %290 : vector<32x1xf32>
    %292 = arith.mulf %285, %285 : vector<32x32xf32>
    %cst_151 = arith.constant dense<0.000000e+00> : vector<32xf32>
    %293 = vector.multi_reduction <add>, %292, %cst_151 [1] : vector<32x32xf32> to vector<32xf32>
    %294 = vector.shape_cast %293 : vector<32xf32> to vector<32x1xf32>
    %cst_152 = arith.constant 3.200000e+01 : f32
    %295 = vector.broadcast %cst_152 : f32 to vector<32x1xf32>
    %296 = arith.divf %294, %295 : vector<32x1xf32>
    %297 = arith.mulf %291, %291 : vector<32x1xf32>
    %298 = arith.subf %296, %297 : vector<32x1xf32>
    %299 = vector.broadcast %291 : vector<32x1xf32> to vector<32x32xf32>
    %300 = arith.subf %285, %299 : vector<32x32xf32>
    %cst_153 = arith.constant 9.99999974E-6 : f32
    %301 = vector.broadcast %cst_153 : f32 to vector<32x1xf32>
    %302 = arith.addf %298, %301 : vector<32x1xf32>
    %303 = math.rsqrt %302 : vector<32x1xf32>
    %304 = vector.broadcast %303 : vector<32x1xf32> to vector<32x32xf32>
    %305 = arith.mulf %300, %304 : vector<32x32xf32>
    %306 = vector.broadcast %286 : vector<1x32xf32> to vector<32x32xf32>
    %307 = arith.mulf %305, %306 : vector<32x32xf32>
    %308 = vector.broadcast %287 : vector<1x32xf32> to vector<32x32xf32>
    %309 = arith.addf %307, %308 : vector<32x32xf32>
    %c12_154 = arith.constant 12 : index
    %c0_155 = arith.constant 0 : index
    %c0_156 = arith.constant 0 : index
    %310 = vector.load %arg2[%c12_154, %c0_155, %c0_156] : memref<15x32x32xf32, #tpu.memory_space<vmem>>, vector<1x32x32xf32>
    %311 = vector.shape_cast %310 : vector<1x32x32xf32> to vector<32x32xf32>
    %cst_157 = arith.constant dense<0.000000e+00> : vector<32x32xf32>
    %312 = tpu.matmul %309, %311, %cst_157 {dimension_numbers = #tpu.dot_dimension_numbers<[1], [0], [0], [1], [0, 0, 1, 1], [], []>} : vector<32x32xf32>, vector<32x32xf32>, vector<32x32xf32> -> vector<32x32xf32>
    %c17 = arith.constant 17 : index
    %c0_158 = arith.constant 0 : index
    %313 = vector.load %arg3[%c17, %c0_158] : memref<41x32xf32, #tpu.memory_space<vmem>>, vector<1x32xf32>
    %314 = vector.broadcast %313 : vector<1x32xf32> to vector<32x32xf32>
    %315 = arith.addf %312, %314 : vector<32x32xf32>
    %c13_159 = arith.constant 13 : index
    %c0_160 = arith.constant 0 : index
    %c0_161 = arith.constant 0 : index
    %316 = vector.load %arg2[%c13_159, %c0_160, %c0_161] : memref<15x32x32xf32, #tpu.memory_space<vmem>>, vector<1x32x32xf32>
    %317 = vector.shape_cast %316 : vector<1x32x32xf32> to vector<32x32xf32>
    %cst_162 = arith.constant dense<0.000000e+00> : vector<32x32xf32>
    %318 = tpu.matmul %309, %317, %cst_162 {dimension_numbers = #tpu.dot_dimension_numbers<[1], [0], [0], [1], [0, 0, 1, 1], [], []>} : vector<32x32xf32>, vector<32x32xf32>, vector<32x32xf32> -> vector<32x32xf32>
    %c18 = arith.constant 18 : index
    %c0_163 = arith.constant 0 : index
    %319 = vector.load %arg3[%c18, %c0_163] : memref<41x32xf32, #tpu.memory_space<vmem>>, vector<1x32xf32>
    %320 = vector.broadcast %319 : vector<1x32xf32> to vector<32x32xf32>
    %321 = arith.addf %318, %320 : vector<32x32xf32>
    %cst_164 = arith.constant 5.000000e-01 : f32
    %322 = vector.broadcast %cst_164 : f32 to vector<32x32xf32>
    %323 = arith.mulf %322, %321 : vector<32x32xf32>
    %cst_165 = arith.constant 4.471500e-02 : f32
    %324 = vector.broadcast %cst_165 : f32 to vector<32x32xf32>
    %325 = arith.mulf %324, %321 : vector<32x32xf32>
    %326 = arith.mulf %325, %321 : vector<32x32xf32>
    %327 = arith.mulf %326, %321 : vector<32x32xf32>
    %328 = arith.addf %321, %327 : vector<32x32xf32>
    %cst_166 = arith.constant 0.797884583 : f32
    %329 = vector.broadcast %cst_166 : f32 to vector<32x32xf32>
    %330 = arith.mulf %329, %328 : vector<32x32xf32>
    %331 = math.tanh %330 : vector<32x32xf32>
    %cst_167 = arith.constant 1.000000e+00 : f32
    %332 = vector.broadcast %cst_167 : f32 to vector<32x32xf32>
    %333 = arith.addf %332, %331 : vector<32x32xf32>
    %334 = arith.mulf %323, %333 : vector<32x32xf32>
    %335 = arith.mulf %315, %334 : vector<32x32xf32>
    %c14_168 = arith.constant 14 : index
    %c0_169 = arith.constant 0 : index
    %c0_170 = arith.constant 0 : index
    %336 = vector.load %arg2[%c14_168, %c0_169, %c0_170] : memref<15x32x32xf32, #tpu.memory_space<vmem>>, vector<1x32x32xf32>
    %337 = vector.shape_cast %336 : vector<1x32x32xf32> to vector<32x32xf32>
    %cst_171 = arith.constant dense<0.000000e+00> : vector<32x32xf32>
    %338 = tpu.matmul %335, %337, %cst_171 {dimension_numbers = #tpu.dot_dimension_numbers<[1], [0], [0], [1], [0, 0, 1, 1], [], []>} : vector<32x32xf32>, vector<32x32xf32>, vector<32x32xf32> -> vector<32x32xf32>
    %c19 = arith.constant 19 : index
    %c0_172 = arith.constant 0 : index
    %339 = vector.load %arg3[%c19, %c0_172] : memref<41x32xf32, #tpu.memory_space<vmem>>, vector<1x32xf32>
    %340 = vector.broadcast %339 : vector<1x32xf32> to vector<32x32xf32>
    %341 = arith.addf %338, %340 : vector<32x32xf32>
    %342 = arith.addf %285, %341 : vector<32x32xf32>
    %c0_173 = arith.constant 0 : index
    %c0_174 = arith.constant 0 : index
    %343 = vector.load %arg7[%c0_173, %c0_174] : memref<32x32xf32, #tpu.memory_space<vmem>>, vector<32x32xf32>
    tpu.vector_store %arg7[%c0_173, %c0_174], %342 {strides = array<i32>} : memref<32x32xf32, #tpu.memory_space<vmem>>, vector<32x32xf32>,
    return
  }
  func.func @transform_0(%arg0: i32) -> (i32, i32) {
    %c0_i32 = arith.constant 0 : i32
    %c0_i32_0 = arith.constant 0 : i32
    %c0_i32_1 = arith.constant 0 : i32
    return %c0_i32, %c0_i32_0 : i32, i32
  }
  func.func @transform_1(%arg0: i32) -> (i32, i32, i32) {
    %c0_i32 = arith.constant 0 : i32
    %c0_i32_0 = arith.constant 0 : i32
    %c0_i32_1 = arith.constant 0 : i32
    %c0_i32_2 = arith.constant 0 : i32
    return %c0_i32, %c0_i32_0, %c0_i32_1 : i32, i32, i32
  }
  func.func @transform_2(%arg0: i32) -> (i32, i32) {
    %c0_i32 = arith.constant 0 : i32
    %c0_i32_0 = arith.constant 0 : i32
    %c0_i32_1 = arith.constant 0 : i32
    return %c0_i32, %c0_i32_0 : i32, i32
  }
  func.func @transform_3(%arg0: i32) -> (i32, i32) {
    %c0_i32 = arith.constant 0 : i32
    %c0_i32_0 = arith.constant 0 : i32
    %c0_i32_1 = arith.constant 0 : i32
    return %c0_i32, %c0_i32_0 : i32, i32
  }
  func.func @transform_4(%arg0: i32) -> (i32, i32, i32) {
    %c0_i32 = arith.constant 0 : i32
    %c0_i32_0 = arith.constant 0 : i32
    %c0_i32_1 = arith.constant 0 : i32
    %c0_i32_2 = arith.constant 0 : i32
    return %c0_i32, %c0_i32_0, %c0_i32_1 : i32, i32, i32
  }
  func.func @transform_5(%arg0: i32) -> (i32, i32) {
    %c0_i32 = arith.constant 0 : i32
    %c0_i32_0 = arith.constant 0 : i32
    %c0_i32_1 = arith.constant 0 : i32
    return %c0_i32, %c0_i32_0 : i32, i32
  }
  func.func @transform_6(%arg0: i32) -> (i32, i32) {
    %c0_i32 = arith.constant 0 : i32
    %c0_i32_0 = arith.constant 0 : i32
    %c0_i32_1 = arith.constant 0 : i32
    return %c0_i32, %c0_i32_0 : i32, i32
  }
}

</mosaic_0001>

<bundles_post_ra>
// kernel: tpu_custom_call.1
= control target key start
LH: loop header
LB: loop body
LE: loop exit
PB: predicated region body
PF: predicated region fallthrough
CT: control target
= control target key end

     0   :  { %11 = vsyncpa [#allocation4], 0  ;;  %s5508_s0 = inlined_call_operand.hbm [shape: f32[32,32], index: 0, kind: input, shape index: {}]   ;;  %s5509_s1 = inlined_call_operand.hbm [shape: f32[15,32,32], index: 1, kind: input, shape index: {}]   ;;  %s5510_s2 = inlined_call_operand.vmem [shape: f32[41,32], index: 2, kind: input, shape index: {}]   ;;  %s5511_s3 = inlined_call_operand.vmem [shape: f32[32,544], index: 3, kind: input, shape index: {}]   ;;  %s5512_s4 = inlined_call_operand.vmem [shape: f32[2,32,32], index: 4, kind: input, shape index: {}]   ;;  %s5513_s5 = inlined_call_operand.vmem [shape: f32[128,32], index: 5, kind: input, shape index: {}]   ;;  %s5514_s6 = inlined_call_operand.hbm [shape: f32[32,32], index: 6, kind: output, shape index: {}]  }
   0x1   :  { %12 = vsyncpa [#allocation7], 0 }
   0x2   :  { %13 = vsyncpa [#allocation5], 0  ;;  %s4466_s21 = smov [#allocation3]   ;;  %s4394_s25 = scalar_lea.hbm %s5508_s0, 512 }
   0x3   :  { %s19_s22 = sshll.u32 %s4466_s21, 4  ;;  %p4395_p0 = scmp.ne.s32.totalorder %s5508_s0, %s4394_s25  ;;  %s20_s22 = int_to_ptr.vmem [resolvable:$true] %s19_s22 }
   0x4   :  { %p4398_p1 = scmp.lt.u32.totalorder %s4394_s25, %s5508_s0 }
   0x6   :  { %p4400_p2 = pnand %p4398_p1, %p4395_p0 }
   0x8   :  { %4403 = shalt.err (!%p4400_p2)
}
   0x9   :  { %s4404_s30 = scalar_lea.vmem %s20_s22, 512  ;;  %p4409_p4 = scmp.lt.s32.totalorder %s20_s22, %s20_s22 }
   0xa   :  { %p4405_p3 = scmp.ne.s32.totalorder %s20_s22, %s4404_s30  ;;  %p4410_p5 = scmp.lt.s32.totalorder %s4404_s30, %s4404_s30 }
   0xc   :  { %p4411_p6 = por %p4410_p5, %p4409_p4 }
   0xe   :  { %p4412_p7 = pnand %p4411_p6, %p4405_p3 }
  0x10   :  { %4415 = shalt.err (!%p4412_p7)
}
  0x11   :  { %s4467_s7 = smov 128   ;;  %s4468_s8 = smov 8  }
  0x12   :  { %25 = dma.hbm_to_vmem [thread:$0]  %s5508_s0, 512, %s20_s22, [#allocation4], %s4467_s7, %s4467_s7, %s4468_s8  }
  0x13   :  { %s4469_s11 = smov [#allocation6]   ;;  %s4416_s15 = scalar_lea.hbm %s5509_s1, 7680 }
  0x14   :  { %s31_s12 = sshll.u32 %s4469_s11, 4  ;;  %p4417_p8 = scmp.ne.s32.totalorder %s5509_s1, %s4416_s15  ;;  %s32_s12 = int_to_ptr.vmem [resolvable:$true] %s31_s12 }
  0x15   :  { %p4420_p9 = scmp.lt.u32.totalorder %s4416_s15, %s5509_s1 }
  0x17   :  { %p4422_p10 = pnand %p4420_p9, %p4417_p8 }
  0x19   :  { %4425 = shalt.err (!%p4422_p10)
}
  0x1a   :  { %s4426_s20 = scalar_lea.vmem %s32_s12, 7680  ;;  %p4431_p12 = scmp.lt.s32.totalorder %s32_s12, %s32_s12 }
  0x1b   :  { %p4427_p11 = scmp.ne.s32.totalorder %s32_s12, %s4426_s20  ;;  %p4432_p13 = scmp.lt.s32.totalorder %s4426_s20, %s4426_s20 }
  0x1d   :  { %p4433_p0 = por %p4432_p13, %p4431_p12 }
  0x1f   :  { %p4434_p1 = pnand %p4433_p0, %p4427_p11 }
  0x21   :  { %4437 = shalt.err (!%p4434_p1)
}
  0x22   :  { %37 = dma.hbm_to_vmem [thread:$0]  %s5509_s1, 7680, %s32_s12, [#allocation7], %s4467_s7, %s4467_s7, %s4468_s8  }
  0x23   :  { %4460 = dma.done.wait [#allocation4], 512  }
  0x24   :  { %4461 = vsyncadd [#allocation4], 4294966784 }
  0x25   :  { %4462 = dma.done.wait [#allocation7], 7680  }
  0x26   :  { %4463 = vsyncadd [#allocation7], 4294959616  ;;  %vm58_vm0 = vcmask 261120   ;;  %v4536_v0 = vld [vmem:[#allocation3 + $0x18] sm:$0xff]  ;;  %v4538_v1 = vld [vmem:[#allocation3] sm:$0xff]  ;;  %s4470_s18 = smov [#allocation8]  }
  0x27   :  { %v4540_v2 = vld [vmem:[#allocation3 + $0x8] sm:$0xff]  ;;  %v68_v3 = vsel %vm58_vm0, %v4536_v0, 0.0  ;;  %v59_v4 = vsel %vm58_vm0, %v4538_v1, 0.0  ;;  %v76_v5 = vmul.f32 %v4538_v1, %v4538_v1  ;;  %v4553_v9 = vld [vmem:[#allocation3 + $0x10] sm:$0xff]  ;;  %v79_v12 = vmul.f32 %v4536_v0, %v4536_v0  ;;  %v136_v16 = vld [vmem:[#allocation6] sm:$0xff]  ;;  %s3303_s19 = sshll.u32 %s4470_s18, 4  ;;  %s3304_s19 = int_to_ptr.vmem [resolvable:$true] %s3303_s19 }
  0x28   :  { %69 = vadd.xlane.f32.xlu1 %v68_v3  ;;  %60 = vadd.xlane.f32.xlu0 %v59_v4  ;;  %v62_v7 = vsel %vm58_vm0, %v4540_v2, 0.0  ;;  %v77_v8 = vmul.f32 %v4540_v2, %v4540_v2  ;;  %v65_v11 = vsel %vm58_vm0, %v4553_v9, 0.0  ;;  %v78_v13 = vmul.f32 %v4553_v9, %v4553_v9  ;;  %v137_v17 = vld [vmem:[#allocation6 + $0x8] sm:$0xff]  ;;  %v243_v18 = vld [vmem:[#allocation6 + $0x20] sm:$0xff]  ;;  %v138_v21 = vld [vmem:[#allocation6 + $0x10] sm:$0xff]  ;;  %p4443_p3 = scmp.lt.s32.totalorder %s3304_s19, %s3304_s19 }
  0x29   :  { %v80_v6 = vsel %vm58_vm0, %v76_v5, 0.0  ;;  %v89_v14 = vsel %vm58_vm0, %v79_v12, 0.0  ;;  %v4017_v19 = vpack.c.bf16 %v137_v17, %v136_v16  ;;  %v244_v20 = vld [vmem:[#allocation6 + $0x28] sm:$0xff]  ;;  %v139_v22 = vld [vmem:[#allocation6 + $0x18] sm:$0xff]  ;;  %v245_v25 = vld [vmem:[#allocation6 + $0x30] sm:$0xff] }
  0x2a   :  { %v83_v10 = vsel %vm58_vm0, %v77_v8, 0.0  ;;  %v86_v15 = vsel %vm58_vm0, %v78_v13, 0.0  ;;  %v4025_v23 = vpack.c.bf16 %v244_v20, %v243_v18  ;;  %v4021_v24 = vpack.c.bf16 %v139_v22, %v138_v21  ;;  %v246_v26 = vld [vmem:[#allocation6 + $0x38] sm:$0xff]  ;;  %v3316_v58 = vld [vmem:[%s5510_s2] ss:$0 sm:$0xff]  ;;  %vm5106_vm1 = vmpackc.low %vm58_vm0, %vm58_vm0 }
  0x2b   :  { %4018 = vmatprep.subr.bf16.mxu0 %v4017_v19  ;;  %v4029_v27 = vpack.c.bf16 %v246_v26, %v245_v25  ;;  %v3317_v60 = vld [vmem:[%s5510_s2 + $0x1] ss:$0 sm:$0xff]  ;;  %v3323_v16 = vld [vmem:[%s5510_s2 + $0x3] ss:$0 sm:$0xff] }
  0x2c   :  { %81 = vadd.xlane.f32.xlu1 %v80_v6  ;;  %63 = vadd.xlane.f32.xlu0 %v62_v7 }
  0x2d   :  { %4026 = vmatprep.subr.bf16.mxu1 %v4025_v23  ;;  %4020 = vmatpush3.bf16.msra.mxu0 %v4017_v19 }
  0x2e   :  { %4028 = vmatpush3.bf16.msra.mxu1 %v4025_v23  ;;  %4022 = vmatprep.subr.bf16.mxu0 %v4021_v24 }
  0x2f   :  { %4030 = vmatprep.subr.bf16.mxu1 %v4029_v27 }
  0x30   :  { %84 = vadd.xlane.f32.xlu1 %v83_v10  ;;  %66 = vadd.xlane.f32.xlu0 %v65_v11 }
  0x31   :  { %4024 = vmatpush3.bf16.msra.mxu0 %v4021_v24 }
  0x32   :  { %4032 = vmatpush3.bf16.msra.mxu1 %v4029_v27 }
  0x34   :  { %90 = vadd.xlane.f32.xlu1 %v89_v14  ;;  %87 = vadd.xlane.f32.xlu0 %v86_v15  ;;  %v593_v15 = vld [vmem:[%s5511_s3 + $0x18] sm:$0xff] }
  0xb5   :  { %v70_v28 = vpop.xlane.xlu1 %69  ;;  %v61_v29 = vpop.xlane.xlu0 %60 }
  0xb6   :  { %v72_v30 = vmul.f32 0.03125, %v61_v29  ;;  %v75_v37 = vmul.f32 0.03125, %v70_v28 }
  0xb8   :  { %v96_v33 = vmul.f32 %v72_v30, %v72_v30  ;;  %v99_v45 = vmul.f32 %v75_v37, %v75_v37  ;;  %v104_v56 = vsub.f32 %v4538_v1, %v72_v30  ;;  %v107_v5 = vsub.f32 %v4536_v0, %v75_v37 }
  0xb9   :  { %v82_v31 = vpop.xlane.xlu1 %81  ;;  %v64_v32 = vpop.xlane.xlu0 %63 }
  0xba   :  { %v92_v34 = vmul.f32 0.03125, %v82_v31  ;;  %v73_v35 = vmul.f32 0.03125, %v64_v32 }
  0xbc   :  { %v100_v36 = vsub.f32 %v92_v34, %v96_v33  ;;  %v97_v41 = vmul.f32 %v73_v35, %v73_v35  ;;  %v105_v61 = vsub.f32 %v4540_v2, %v73_v35 }
  0xbd   :  { %v85_v38 = vpop.xlane.xlu1 %84  ;;  %v67_v39 = vpop.xlane.xlu0 %66 }
  0xbe   :  { %v108_v40 = vadd.f32 1e-05, %v100_v36  ;;  %v93_v42 = vmul.f32 0.03125, %v85_v38  ;;  %v74_v43 = vmul.f32 0.03125, %v67_v39 }
  0xc0   :  { %4238 = vrsqrt.f32 %v108_v40  ;;  %v101_v44 = vsub.f32 %v93_v42, %v97_v41  ;;  %v98_v49 = vmul.f32 %v74_v43, %v74_v43  ;;  %v106_v7 = vsub.f32 %v4553_v9, %v74_v43  ;;  %v591_v9 = vld [vmem:[%s5511_s3 + $0x8] sm:$0xff]  ;;  %v3318_v41 = vld [vmem:[%s5510_s2 + $0x2] ss:$0 sm:$0xff] }
  0xc1   :  { %v91_v46 = vpop.xlane.xlu1 %90  ;;  %v88_v47 = vpop.xlane.xlu0 %87 }
  0xc2   :  { %v109_v48 = vadd.f32 1e-05, %v101_v44  ;;  %v95_v50 = vmul.f32 0.03125, %v91_v46  ;;  %v94_v51 = vmul.f32 0.03125, %v88_v47  ;;  %v4597_v46 = vld [vmem:[%s5510_s2 + $0x1c] ss:$0 sm:$0xff] }
  0xc4   :  { %4240 = vrsqrt.f32 %v109_v48  ;;  %v103_v52 = vsub.f32 %v95_v50, %v99_v45  ;;  %v102_v53 = vsub.f32 %v94_v51, %v98_v49  ;;  %v3344_v49 = vld [vmem:[%s5510_s2 + $0x24] ss:$0 sm:$0xff]  ;;  %v3332_v50 = vld [vmem:[%s5510_s2 + $0x18] ss:$0 sm:$0xff]  ;;  %v3340_v51 = vld [vmem:[%s5510_s2 + $0x20] ss:$0 sm:$0xff] }
  0xc6   :  { %v111_v54 = vadd.f32 1e-05, %v103_v52  ;;  %v110_v55 = vadd.f32 1e-05, %v102_v53 }
  0xc8   :  { %4242 = vrsqrt.f32 %v111_v54 }
  0xc9   :  { %4244 = vrsqrt.f32 %v110_v55 }
  0xca   :  { %v4239_v57 = vpop.eup %4238 }
  0xcb   :  { %v116_v59 = vmul.f32 %v4239_v57, %v104_v56  ;;  %v4615_v56 = vld [vmem:[%s5510_s2 + $0x1d] ss:$0 sm:$0xff]  ;;  %v4620_v57 = vld [vmem:[%s5510_s2 + $0x25] ss:$0 sm:$0xff] }
  0xcd   :  { %v124_v62 = vmul.f32 %v3316_v58, %v116_v59 }
  0xce   :  { %v4241_v63 = vpop.eup %4240 }
  0xcf   :  { %v132_v3 = vadd.f32 %v3317_v60, %v124_v62  ;;  %v117_v4 = vmul.f32 %v4241_v63, %v105_v61  ;;  %v4630_v62 = vld [vmem:[%s5510_s2 + $0x19] ss:$0 sm:$0xff] }
  0xd1   :  { %3737 = vmatprep.mubr.msk.f32.mxu0 %vm58_vm0, %v132_v3  ;;  %3751 = vmatprep.mubr.msk.f32.mxu1 %vm58_vm0, %v132_v3  ;;  %v125_v1 = vmul.f32 %v3316_v58, %v117_v4 }
  0xd2   :  { %v4243_v6 = vpop.eup %4242 }
  0xd3   :  { %v4245_v8 = vpop.eup %4244  ;;  %v133_v10 = vadd.f32 %v3317_v60, %v125_v1  ;;  %v119_v11 = vmul.f32 %v4243_v6, %v107_v5  ;;  %v4640_v6 = vld [vmem:[%s5510_s2 + $0x21] ss:$0 sm:$0xff] }
  0xd4   :  { %v118_v12 = vmul.f32 %v4245_v8, %v106_v7  ;;  %v4645_v7 = vld [vmem:[%s5510_s2 + $0x1e] ss:$0 sm:$0xff] }
  0xd5   :  { %3738 = vmatmul.mubr.msk.f32.vlgmr.msra.gmra.mrb[0].mxu0 %vm58_vm0, %v133_v10  ;;  %3752 = vmatmul.mubr.msk.f32.vlgmr.msra.gmra.mrb[0].mxu1 %vm58_vm0, %v133_v10  ;;  %v127_v2 = vmul.f32 %v3316_v58, %v119_v11 }
  0xd6   :  { %v126_v13 = vmul.f32 %v3316_v58, %v118_v12 }
  0xd7   :  { %v135_v14 = vadd.f32 %v3317_v60, %v127_v2 }
  0xd8   :  { %v134_v0 = vadd.f32 %v3317_v60, %v126_v13  ;;  %v4660_v13 = vld [vmem:[%s5510_s2 + $0x26] ss:$0 sm:$0xff] }
  0xda   :  { %3740 = vmatprep.mubr.msk.f32.mxu0 %vm58_vm0, %v134_v0  ;;  %3754 = vmatprep.mubr.msk.f32.mxu1 %vm58_vm0, %v134_v0 }
  0xdb   :  { %3741 = vmatmul.mubr.msk.f32.gmra.mrb[2].mxu0 %vm58_vm0, %v135_v14  ;;  %3755 = vmatmul.mubr.msk.f32.gmra.mrb[2].mxu1 %vm58_vm0, %v135_v14 }
  0xdc   :  { %759 = vmatprep.mubr.f32.mxu0 %v591_v9  ;;  %844 = vmatprep.mubr.f32.mxu1 %v593_v15 }
 0x1a8   :  { %v3739_v17 = vpop.f32.mrb[0].mxu0  ;;  %v3753_v18 = vpop.f32.mrb[0].mxu1 }
 0x1a9   :  { %v324_v19 = vadd.f32 %v3753_v18, %v3323_v16  ;;  %v223_v20 = vpop.f32.mrb[1].mxu0  ;;  %v318_v21 = vpop.f32.mrb[1].mxu1  ;;  %v229_v44 = vadd.f32 %v3739_v17, %v3318_v41 }
 0x1aa   :  { %v319_v22 = vadd.f32 %v3323_v16, %v318_v21  ;;  %v224_v47 = vadd.f32 %v3318_v41, %v223_v20 }
 0x1ab   :  { %v3329_v23 = vmul.f32 -1.442695, %v324_v19 }
 0x1ac   :  { %v3328_v24 = vmul.f32 -1.442695, %v319_v22 }
 0x1ad   :  { %4246 = vpow2.f32 %v3329_v23 }
 0x1ae   :  { %4248 = vpow2.f32 %v3328_v24  ;;  %v3742_v25 = vpop.f32.mrb[2].mxu0  ;;  %v3756_v26 = vpop.f32.mrb[2].mxu1 }
 0x1af   :  { %v334_v27 = vadd.f32 %v3756_v26, %v3323_v16  ;;  %v233_v28 = vpop.f32.mrb[3].mxu0  ;;  %v328_v29 = vpop.f32.mrb[3].mxu1  ;;  %v239_v54 = vadd.f32 %v3742_v25, %v3318_v41 }
 0x1b0   :  { %v329_v30 = vadd.f32 %v3323_v16, %v328_v29  ;;  %v234_v55 = vadd.f32 %v3318_v41, %v233_v28 }
 0x1b1   :  { %v3331_v31 = vmul.f32 -1.442695, %v334_v27 }
 0x1b2   :  { %v3330_v32 = vmul.f32 -1.442695, %v329_v30 }
 0x1b3   :  { %4250 = vpow2.f32 %v3331_v31 }
 0x1b4   :  { %4252 = vpow2.f32 %v3330_v32  ;;  %v4713_v32 = vld [vmem:[%s5510_s2 + $0x1a] ss:$0 sm:$0xff] }
 0x1b7   :  { %v4247_v33 = vpop.eup %4246 }
 0x1b8   :  { %v4249_v34 = vpop.eup %4248  ;;  %v350_v35 = vadd.f32 1.0, %v4247_v33  ;;  %v4718_v33 = vld [vmem:[%s5510_s2 + $0x22] ss:$0 sm:$0xff] }
 0x1b9   :  { %v349_v36 = vadd.f32 1.0, %v4249_v34 }
 0x1ba   :  { %4254 = vrcp.f32 %v350_v35 }
 0x1bb   :  { %4256 = vrcp.f32 %v349_v36 }
 0x1bd   :  { %v4251_v37 = vpop.eup %4250 }
 0x1be   :  { %v4253_v38 = vpop.eup %4252  ;;  %v352_v39 = vadd.f32 1.0, %v4251_v37 }
 0x1bf   :  { %v351_v40 = vadd.f32 1.0, %v4253_v38 }
 0x1c0   :  { %4258 = vrcp.f32 %v352_v39 }
 0x1c1   :  { %4260 = vrcp.f32 %v351_v40 }
 0x1c4   :  { %v4255_v42 = vpop.eup %4254 }
 0x1c5   :  { %v4257_v43 = vpop.eup %4256  ;;  %v362_v45 = vmul.f32 %v4255_v42, %v324_v19 }
 0x1c6   :  { %v361_v48 = vmul.f32 %v4257_v43, %v319_v22 }
 0x1c7   :  { %v4608_v52 = vmul.f32 %v362_v45, %v229_v44 }
 0x1c8   :  { %v4610_v53 = vmul.f32 %v361_v48, %v224_v47 }
 0x1c9   :  { %v427_v58 = vmul.f32 %v4597_v46, %v4608_v52  ;;  %v531_v59 = vmul.f32 %v3344_v49, %v4608_v52  ;;  %v375_v60 = vmul.f32 %v3332_v50, %v4608_v52  ;;  %v479_v61 = vmul.f32 %v3340_v51, %v4608_v52 }
 0x1ca   :  { %v4259_v63 = vpop.eup %4258  ;;  %v426_v3 = vmul.f32 %v4597_v46, %v4610_v53  ;;  %v530_v4 = vmul.f32 %v3344_v49, %v4610_v53  ;;  %v374_v5 = vmul.f32 %v3332_v50, %v4610_v53  ;;  %v478_v1 = vmul.f32 %v3340_v51, %v4610_v53 }
 0x1cb   :  { %v4261_v8 = vpop.eup %4260  ;;  %v364_v10 = vmul.f32 %v4259_v63, %v334_v27  ;;  %431 = vst.msk [vmem:[#allocation2 + $0x88] sm:$0xff] %vm58_vm0, %v427_v58  ;;  %535 = vst.msk [vmem:[#allocation2 + $0x188] sm:$0xff] %vm58_vm0, %v531_v59  ;;  %v439_v11 = vmul.f32 %v4615_v56, %v4610_v53  ;;  %v440_v12 = vmul.f32 %v4615_v56, %v4608_v52 }
 0x1cc   :  { %379 = vst.msk [vmem:[#allocation2 + $0x8] sm:$0xff] %vm58_vm0, %v375_v60  ;;  %483 = vst.msk [vmem:[#allocation2 + $0x108] sm:$0xff] %vm58_vm0, %v479_v61  ;;  %v543_v2 = vmul.f32 %v4620_v57, %v4610_v53  ;;  %v363_v14 = vmul.f32 %v4261_v8, %v329_v30  ;;  %v544_v0 = vmul.f32 %v4620_v57, %v4608_v52 }
 0x1cd   :  { %430 = vst.msk [vmem:[#allocation2 + $0x80] sm:$0xff] %vm58_vm0, %v426_v3  ;;  %534 = vst.msk [vmem:[#allocation2 + $0x180] sm:$0xff] %vm58_vm0, %v530_v4  ;;  %v387_v9 = vmul.f32 %v4630_v62, %v4610_v53  ;;  %v388_v15 = vmul.f32 %v4630_v62, %v4608_v52  ;;  %v4672_v16 = vmul.f32 %v364_v10, %v239_v54  ;;  %v3339_v3 = vld [vmem:[%s5510_s2 + $0x1f] ss:$0 sm:$0xff] }
 0x1ce   :  { %378 = vst.msk [vmem:[#allocation2] sm:$0xff] %vm58_vm0, %v374_v5  ;;  %482 = vst.msk [vmem:[#allocation2 + $0x100] sm:$0xff] %vm58_vm0, %v478_v1  ;;  %v491_v17 = vmul.f32 %v4640_v6, %v4610_v53  ;;  %v492_v18 = vmul.f32 %v4640_v6, %v4608_v52  ;;  %v452_v19 = vmul.f32 %v4645_v7, %v4610_v53  ;;  %v4781_v5 = vld [vmem:[%s5510_s2 + $0x27] ss:$0 sm:$0xff]  ;;  %v4786_v1 = vld [vmem:[%s5510_s2 + $0x1b] ss:$0 sm:$0xff] }
 0x1cf   :  { %443 = vst.msk [vmem:[#allocation2 + $0xa0] sm:$0xff] %vm58_vm0, %v439_v11  ;;  %444 = vst.msk [vmem:[#allocation2 + $0xa8] sm:$0xff] %vm58_vm0, %v440_v12  ;;  %v4683_v20 = vmul.f32 %v363_v14, %v234_v55  ;;  %v453_v21 = vmul.f32 %v4645_v7, %v4608_v52  ;;  %v556_v22 = vmul.f32 %v4660_v13, %v4610_v53 }
 0x1d0   :  { %547 = vst.msk [vmem:[#allocation2 + $0x1a0] sm:$0xff] %vm58_vm0, %v543_v2  ;;  %548 = vst.msk [vmem:[#allocation2 + $0x1a8] sm:$0xff] %vm58_vm0, %v544_v0  ;;  %v557_v23 = vmul.f32 %v4660_v13, %v4608_v52  ;;  %v429_v24 = vmul.f32 %v4597_v46, %v4672_v16  ;;  %v533_v25 = vmul.f32 %v3344_v49, %v4672_v16 }
 0x1d1   :  { %391 = vst.msk [vmem:[#allocation2 + $0x20] sm:$0xff] %vm58_vm0, %v387_v9  ;;  %392 = vst.msk [vmem:[#allocation2 + $0x28] sm:$0xff] %vm58_vm0, %v388_v15  ;;  %v377_v26 = vmul.f32 %v3332_v50, %v4672_v16  ;;  %v481_v27 = vmul.f32 %v3340_v51, %v4672_v16  ;;  %v428_v28 = vmul.f32 %v4597_v46, %v4683_v20 }
 0x1d2   :  { %495 = vst.msk [vmem:[#allocation2 + $0x120] sm:$0xff] %vm58_vm0, %v491_v17  ;;  %496 = vst.msk [vmem:[#allocation2 + $0x128] sm:$0xff] %vm58_vm0, %v492_v18  ;;  %v532_v29 = vmul.f32 %v3344_v49, %v4683_v20  ;;  %v376_v30 = vmul.f32 %v3332_v50, %v4683_v20  ;;  %v480_v31 = vmul.f32 %v3340_v51, %v4683_v20  ;;  %v627_v38 = vld [vmem:[#allocation2 + $0x88] sm:$0xff] }
 0x1d3   :  { %456 = vst.msk [vmem:[#allocation2 + $0xc0] sm:$0xff] %vm58_vm0, %v452_v19  ;;  %457 = vst.msk [vmem:[#allocation2 + $0xc8] sm:$0xff] %vm58_vm0, %v453_v21  ;;  %v441_v34 = vmul.f32 %v4615_v56, %v4683_v20  ;;  %v442_v35 = vmul.f32 %v4615_v56, %v4672_v16  ;;  %v545_v36 = vmul.f32 %v4620_v57, %v4683_v20  ;;  %v659_v39 = vld [vmem:[#allocation2 + $0x188] sm:$0xff] }
 0x1d4   :  { %560 = vst.msk [vmem:[#allocation2 + $0x1c0] sm:$0xff] %vm58_vm0, %v556_v22  ;;  %561 = vst.msk [vmem:[#allocation2 + $0x1c8] sm:$0xff] %vm58_vm0, %v557_v23  ;;  %v546_v37 = vmul.f32 %v4620_v57, %v4672_v16  ;;  %v611_v40 = vld [vmem:[#allocation2 + $0x8] sm:$0xff]  ;;  %v389_v41 = vmul.f32 %v4630_v62, %v4683_v20  ;;  %v390_v42 = vmul.f32 %v4630_v62, %v4672_v16  ;;  %v626_v45 = vld [vmem:[#allocation2 + $0x80] sm:$0xff] }
 0x1d5   :  { %433 = vst.msk [vmem:[#allocation2 + $0x98] sm:$0xff] %vm58_vm0, %v429_v24  ;;  %537 = vst.msk [vmem:[#allocation2 + $0x198] sm:$0xff] %vm58_vm0, %v533_v25  ;;  %v493_v43 = vmul.f32 %v4640_v6, %v4683_v20  ;;  %v494_v44 = vmul.f32 %v4640_v6, %v4672_v16  ;;  %v658_v46 = vld [vmem:[#allocation2 + $0x180] sm:$0xff]  ;;  %v400_v48 = vmul.f32 %v4713_v32, %v4610_v53  ;;  %v643_v58 = vld [vmem:[#allocation2 + $0x108] sm:$0xff] }
 0x1d6   :  { %381 = vst.msk [vmem:[#allocation2 + $0x18] sm:$0xff] %vm58_vm0, %v377_v26  ;;  %485 = vst.msk [vmem:[#allocation2 + $0x118] sm:$0xff] %vm58_vm0, %v481_v27  ;;  %v610_v47 = vld [vmem:[#allocation2] sm:$0xff]  ;;  %v401_v49 = vmul.f32 %v4713_v32, %v4608_v52  ;;  %v504_v50 = vmul.f32 %v4718_v33, %v4610_v53  ;;  %v505_v51 = vmul.f32 %v4718_v33, %v4608_v52  ;;  %v631_v8 = vld [vmem:[#allocation2 + $0xa8] sm:$0xff] }
 0x1d7   :  { %432 = vst.msk [vmem:[#allocation2 + $0x90] sm:$0xff] %vm58_vm0, %v428_v28  ;;  %536 = vst.msk [vmem:[#allocation2 + $0x190] sm:$0xff] %vm58_vm0, %v532_v29  ;;  %v4033_v54 = vpack.c.bf16 %v627_v38, %v626_v45  ;;  %v4065_v55 = vpack.c.bf16 %v659_v39, %v658_v46  ;;  %v4035_v56 = vpack.c.bf16 %v611_v40, %v610_v47  ;;  %v642_v57 = vld [vmem:[#allocation2 + $0x100] sm:$0xff]  ;;  %v663_v11 = vld [vmem:[#allocation2 + $0x1a8] sm:$0xff] }
 0x1d8   :  { %380 = vst.msk [vmem:[#allocation2 + $0x10] sm:$0xff] %vm58_vm0, %v376_v30  ;;  %484 = vst.msk [vmem:[#allocation2 + $0x110] sm:$0xff] %vm58_vm0, %v480_v31  ;;  %v454_v59 = vmul.f32 %v4645_v7, %v4683_v20  ;;  %v4067_v60 = vpack.c.bf16 %v643_v58, %v642_v57  ;;  %v455_v61 = vmul.f32 %v4645_v7, %v4672_v16  ;;  %v4791_v6 = vld [vmem:[%s5510_s2 + $0x23] ss:$0 sm:$0xff] }
 0x1d9   :  { %445 = vst.msk [vmem:[#allocation2 + $0xb0] sm:$0xff] %vm58_vm0, %v441_v34  ;;  %446 = vst.msk [vmem:[#allocation2 + $0xb8] sm:$0xff] %vm58_vm0, %v442_v35  ;;  %v558_v62 = vmul.f32 %v4660_v13, %v4683_v20  ;;  %v559_v63 = vmul.f32 %v4660_v13, %v4672_v16  ;;  %4034 = vmatprep.subr.bf16.mxu0 %v4033_v54  ;;  %4066 = vmatprep.subr.bf16.mxu1 %v4065_v55  ;;  %v630_v7 = vld [vmem:[#allocation2 + $0xa0] sm:$0xff] }
 0x1da   :  { %549 = vst.msk [vmem:[#allocation2 + $0x1b0] sm:$0xff] %vm58_vm0, %v545_v36  ;;  %550 = vst.msk [vmem:[#allocation2 + $0x1b8] sm:$0xff] %vm58_vm0, %v546_v37  ;;  %v402_v4 = vmul.f32 %v4713_v32, %v4683_v20  ;;  %4036 = vmatpush3.bf16.msra.mxu0 %v4035_v56  ;;  %4068 = vmatpush3.bf16.msra.mxu1 %v4067_v60  ;;  %v662_v10 = vld [vmem:[#allocation2 + $0x1a0] sm:$0xff]  ;;  %v403_v12 = vmul.f32 %v4713_v32, %v4672_v16  ;;  %v3348_v37 = vld [vmem:[%s5510_s2 + $0x28] ss:$0 sm:$0xff] }
 0x1db   :  { %393 = vst.msk [vmem:[#allocation2 + $0x30] sm:$0xff] %vm58_vm0, %v389_v41  ;;  %394 = vst.msk [vmem:[#allocation2 + $0x38] sm:$0xff] %vm58_vm0, %v390_v42  ;;  %v506_v2 = vmul.f32 %v4718_v33, %v4683_v20  ;;  %v507_v9 = vmul.f32 %v4718_v33, %v4672_v16  ;;  %v465_v15 = vmul.f32 %v3339_v3, %v4610_v53  ;;  %v614_v32 = vld [vmem:[#allocation2 + $0x20] sm:$0xff]  ;;  %v615_v33 = vld [vmem:[#allocation2 + $0x28] sm:$0xff] }
 0x1dc   :  { %497 = vst.msk [vmem:[#allocation2 + $0x130] sm:$0xff] %vm58_vm0, %v493_v43  ;;  %498 = vst.msk [vmem:[#allocation2 + $0x138] sm:$0xff] %vm58_vm0, %v494_v44  ;;  %v629_v13 = vld [vmem:[#allocation2 + $0x98] sm:$0xff]  ;;  %v466_v21 = vmul.f32 %v3339_v3, %v4608_v52  ;;  %v569_v22 = vmul.f32 %v4781_v5, %v4610_v53  ;;  %v570_v23 = vmul.f32 %v4781_v5, %v4608_v52  ;;  %v646_v40 = vld [vmem:[#allocation2 + $0x120] sm:$0xff] }
 0x1dd   :  { %404 = vst.msk [vmem:[#allocation2 + $0x40] sm:$0xff] %vm58_vm0, %v400_v48  ;;  %405 = vst.msk [vmem:[#allocation2 + $0x48] sm:$0xff] %vm58_vm0, %v401_v49  ;;  %v661_v14 = vld [vmem:[#allocation2 + $0x198] sm:$0xff]  ;;  %v413_v24 = vmul.f32 %v4786_v1, %v4610_v53  ;;  %v414_v30 = vmul.f32 %v4786_v1, %v4608_v52  ;;  %v517_v34 = vmul.f32 %v4791_v6, %v4610_v53  ;;  %v647_v41 = vld [vmem:[#allocation2 + $0x128] sm:$0xff] }
 0x1de   :  { %508 = vst.msk [vmem:[#allocation2 + $0x140] sm:$0xff] %vm58_vm0, %v504_v50  ;;  %509 = vst.msk [vmem:[#allocation2 + $0x148] sm:$0xff] %vm58_vm0, %v505_v51  ;;  %v613_v0 = vld [vmem:[#allocation2 + $0x18] sm:$0xff]  ;;  %v628_v17 = vld [vmem:[#allocation2 + $0x90] sm:$0xff]  ;;  %v518_v35 = vmul.f32 %v4791_v6, %v4608_v52  ;;  %v467_v36 = vmul.f32 %v3339_v3, %v4683_v20  ;;  %v4041_v38 = vpack.c.bf16 %v631_v8, %v630_v7 }
 0x1df   :  { %458 = vst.msk [vmem:[#allocation2 + $0xd0] sm:$0xff] %vm58_vm0, %v454_v59  ;;  %459 = vst.msk [vmem:[#allocation2 + $0xd8] sm:$0xff] %vm58_vm0, %v455_v61  ;;  %v660_v18 = vld [vmem:[#allocation2 + $0x190] sm:$0xff]  ;;  %v4037_v25 = vpack.c.bf16 %v629_v13, %v628_v17  ;;  %v645_v29 = vld [vmem:[#allocation2 + $0x118] sm:$0xff]  ;;  %v4073_v39 = vpack.c.bf16 %v663_v11, %v662_v10  ;;  %v468_v43 = vmul.f32 %v3339_v3, %v4672_v16 }
 0x1e0   :  { %562 = vst.msk [vmem:[#allocation2 + $0x1d0] sm:$0xff] %vm58_vm0, %v558_v62  ;;  %563 = vst.msk [vmem:[#allocation2 + $0x1d8] sm:$0xff] %vm58_vm0, %v559_v63  ;;  %v612_v19 = vld [vmem:[#allocation2 + $0x10] sm:$0xff]  ;;  %v4069_v26 = vpack.c.bf16 %v661_v14, %v660_v18  ;;  %v633_v44 = vld [vmem:[#allocation2 + $0xb8] sm:$0xff]  ;;  %v571_v47 = vmul.f32 %v4781_v5, %v4683_v20  ;;  %v572_v48 = vmul.f32 %v4781_v5, %v4672_v16 }
 0x1e1   :  { %406 = vst.msk [vmem:[#allocation2 + $0x50] sm:$0xff] %vm58_vm0, %v402_v4  ;;  %407 = vst.msk [vmem:[#allocation2 + $0x58] sm:$0xff] %vm58_vm0, %v403_v12  ;;  %v4039_v27 = vpack.c.bf16 %v613_v0, %v612_v19  ;;  %v644_v28 = vld [vmem:[#allocation2 + $0x110] sm:$0xff]  ;;  %4038 = vmatprep.subr.bf16.mxu0 %v4037_v25  ;;  %v665_v46 = vld [vmem:[#allocation2 + $0x1b8] sm:$0xff]  ;;  %v4043_v49 = vpack.c.bf16 %v615_v33, %v614_v32  ;;  %v415_v50 = vmul.f32 %v4786_v1, %v4683_v20 }
 0x1e2   :  { %510 = vst.msk [vmem:[#allocation2 + $0x150] sm:$0xff] %vm58_vm0, %v506_v2  ;;  %511 = vst.msk [vmem:[#allocation2 + $0x158] sm:$0xff] %vm58_vm0, %v507_v9  ;;  %v4071_v31 = vpack.c.bf16 %v645_v29, %v644_v28  ;;  %4070 = vmatprep.subr.bf16.mxu1 %v4069_v26  ;;  %v632_v42 = vld [vmem:[#allocation2 + $0xb0] sm:$0xff]  ;;  %v4075_v51 = vpack.c.bf16 %v647_v41, %v646_v40  ;;  %v634_v55 = vld [vmem:[#allocation2 + $0xc0] sm:$0xff]  ;;  %v416_v56 = vmul.f32 %v4786_v1, %v4672_v16 }
 0x1e3   :  { %469 = vst.msk [vmem:[#allocation2 + $0xe0] sm:$0xff] %vm58_vm0, %v465_v15  ;;  %470 = vst.msk [vmem:[#allocation2 + $0xe8] sm:$0xff] %vm58_vm0, %v466_v21  ;;  %4040 = vmatpush3.bf16.msra.mxu0 %v4039_v27  ;;  %v664_v45 = vld [vmem:[#allocation2 + $0x1b0] sm:$0xff]  ;;  %v519_v57 = vmul.f32 %v4791_v6, %v4683_v20  ;;  %v520_v58 = vmul.f32 %v4791_v6, %v4672_v16  ;;  %v4045_v59 = vpack.c.bf16 %v633_v44, %v632_v42  ;;  %v617_v61 = vld [vmem:[#allocation2 + $0x38] sm:$0xff] }
 0x1e4   :  { %573 = vst.msk [vmem:[#allocation2 + $0x1e0] sm:$0xff] %vm58_vm0, %v569_v22  ;;  %574 = vst.msk [vmem:[#allocation2 + $0x1e8] sm:$0xff] %vm58_vm0, %v570_v23  ;;  %4072 = vmatpush3.bf16.msra.mxu1 %v4071_v31  ;;  %4042 = vmatprep.subr.bf16.mxu0 %v4041_v38  ;;  %v616_v54 = vld [vmem:[#allocation2 + $0x30] sm:$0xff]  ;;  %v4077_v60 = vpack.c.bf16 %v665_v46, %v664_v45  ;;  %v649_v63 = vld [vmem:[#allocation2 + $0x138] sm:$0xff]  ;;  %v582_v3 = vmul.f32 %v3348_v37, %v4610_v53 }
 0x1e5   :  { %417 = vst.msk [vmem:[#allocation2 + $0x60] sm:$0xff] %vm58_vm0, %v413_v24  ;;  %418 = vst.msk [vmem:[#allocation2 + $0x68] sm:$0xff] %vm58_vm0, %v414_v30  ;;  %4074 = vmatprep.subr.bf16.mxu1 %v4073_v39  ;;  %v648_v62 = vld [vmem:[#allocation2 + $0x130] sm:$0xff]  ;;  %v583_v4 = vmul.f32 %v3348_v37, %v4608_v52  ;;  %v635_v5 = vld [vmem:[#allocation2 + $0xc8] sm:$0xff]  ;;  %v584_v6 = vmul.f32 %v3348_v37, %v4683_v20  ;;  %v585_v8 = vmul.f32 %v3348_v37, %v4672_v16 }
 0x1e6   :  { %521 = vst.msk [vmem:[#allocation2 + $0x160] sm:$0xff] %vm58_vm0, %v517_v34  ;;  %522 = vst.msk [vmem:[#allocation2 + $0x168] sm:$0xff] %vm58_vm0, %v518_v35  ;;  %v666_v1 = vld [vmem:[#allocation2 + $0x1c0] sm:$0xff]  ;;  %v667_v7 = vld [vmem:[#allocation2 + $0x1c8] sm:$0xff]  ;;  %v4047_v52 = vpack.c.bf16 %v617_v61, %v616_v54  ;;  %v4079_v53 = vpack.c.bf16 %v649_v63, %v648_v62  ;;  %v4049_v12 = vpack.c.bf16 %v635_v5, %v634_v55 }
 0x1e7   :  { %471 = vst.msk [vmem:[#allocation2 + $0xf0] sm:$0xff] %vm58_vm0, %v467_v36  ;;  %472 = vst.msk [vmem:[#allocation2 + $0xf8] sm:$0xff] %vm58_vm0, %v468_v43  ;;  %4044 = vmatpush3.bf16.msra.mxu0 %v4043_v49  ;;  %v618_v10 = vld [vmem:[#allocation2 + $0x40] sm:$0xff]  ;;  %v619_v11 = vld [vmem:[#allocation2 + $0x48] sm:$0xff]  ;;  %v4081_v2 = vpack.c.bf16 %v667_v7, %v666_v1 }
 0x1e8   :  { %575 = vst.msk [vmem:[#allocation2 + $0x1f0] sm:$0xff] %vm58_vm0, %v571_v47  ;;  %576 = vst.msk [vmem:[#allocation2 + $0x1f8] sm:$0xff] %vm58_vm0, %v572_v48  ;;  %4076 = vmatpush3.bf16.msra.mxu1 %v4075_v51  ;;  %4046 = vmatprep.subr.bf16.mxu0 %v4045_v59  ;;  %v650_v13 = vld [vmem:[#allocation2 + $0x140] sm:$0xff]  ;;  %v651_v20 = vld [vmem:[#allocation2 + $0x148] sm:$0xff]  ;;  %v4051_v15 = vpack.c.bf16 %v619_v11, %v618_v10 }
 0x1e9   :  { %419 = vst.msk [vmem:[#allocation2 + $0x70] sm:$0xff] %vm58_vm0, %v415_v50  ;;  %420 = vst.msk [vmem:[#allocation2 + $0x78] sm:$0xff] %vm58_vm0, %v416_v56  ;;  %4078 = vmatprep.subr.bf16.mxu1 %v4077_v60  ;;  %v636_v14 = vld [vmem:[#allocation2 + $0xd0] sm:$0xff]  ;;  %v637_v16 = vld [vmem:[#allocation2 + $0xd8] sm:$0xff]  ;;  %v4083_v17 = vpack.c.bf16 %v651_v20, %v650_v13 }
 0x1ea   :  { %523 = vst.msk [vmem:[#allocation2 + $0x170] sm:$0xff] %vm58_vm0, %v519_v57  ;;  %524 = vst.msk [vmem:[#allocation2 + $0x178] sm:$0xff] %vm58_vm0, %v520_v58  ;;  %v668_v0 = vld [vmem:[#allocation2 + $0x1d0] sm:$0xff]  ;;  %v669_v9 = vld [vmem:[#allocation2 + $0x1d8] sm:$0xff]  ;;  %v4053_v21 = vpack.c.bf16 %v637_v16, %v636_v14 }
 0x1eb   :  { %586 = vst.msk [vmem:[#allocation2 + $0x200] sm:$0xff] %vm58_vm0, %v582_v3  ;;  %587 = vst.msk [vmem:[#allocation2 + $0x208] sm:$0xff] %vm58_vm0, %v583_v4  ;;  %4048 = vmatpush3.bf16.msra.mxu0 %v4047_v52  ;;  %v620_v18 = vld [vmem:[#allocation2 + $0x50] sm:$0xff]  ;;  %v621_v19 = vld [vmem:[#allocation2 + $0x58] sm:$0xff]  ;;  %v4085_v22 = vpack.c.bf16 %v669_v9, %v668_v0 }
 0x1ec   :  { %588 = vst.msk [vmem:[#allocation2 + $0x210] sm:$0xff] %vm58_vm0, %v584_v6  ;;  %589 = vst.msk [vmem:[#allocation2 + $0x218] sm:$0xff] %vm58_vm0, %v585_v8  ;;  %4080 = vmatpush3.bf16.msra.mxu1 %v4079_v53  ;;  %4050 = vmatprep.subr.bf16.mxu0 %v4049_v12  ;;  %v652_v23 = vld [vmem:[#allocation2 + $0x150] sm:$0xff]  ;;  %v653_v24 = vld [vmem:[#allocation2 + $0x158] sm:$0xff]  ;;  %v4055_v29 = vpack.c.bf16 %v621_v19, %v620_v18 }
 0x1ed   :  { %4082 = vmatprep.subr.bf16.mxu1 %v4081_v2  ;;  %v638_v25 = vld [vmem:[#allocation2 + $0xe0] sm:$0xff]  ;;  %v639_v26 = vld [vmem:[#allocation2 + $0xe8] sm:$0xff]  ;;  %v4087_v30 = vpack.c.bf16 %v653_v24, %v652_v23  ;;  %v592_v57 = vld [vmem:[%s5511_s3 + $0x10] sm:$0xff] }
 0x1ee   :  { %v670_v27 = vld [vmem:[#allocation2 + $0x1e0] sm:$0xff]  ;;  %v671_v28 = vld [vmem:[#allocation2 + $0x1e8] sm:$0xff]  ;;  %v4057_v33 = vpack.c.bf16 %v639_v26, %v638_v25  ;;  %v640_v37 = vld [vmem:[#allocation2 + $0xf0] sm:$0xff] }
 0x1ef   :  { %4052 = vmatpush3.bf16.msra.mxu0 %v4051_v15  ;;  %v622_v31 = vld [vmem:[#allocation2 + $0x60] sm:$0xff]  ;;  %v623_v32 = vld [vmem:[#allocation2 + $0x68] sm:$0xff]  ;;  %v4089_v34 = vpack.c.bf16 %v671_v28, %v670_v27  ;;  %v641_v38 = vld [vmem:[#allocation2 + $0xf8] sm:$0xff] }
 0x1f0   :  { %4084 = vmatpush3.bf16.msra.mxu1 %v4083_v17  ;;  %4054 = vmatprep.subr.bf16.mxu0 %v4053_v21  ;;  %v654_v35 = vld [vmem:[#allocation2 + $0x160] sm:$0xff]  ;;  %v655_v36 = vld [vmem:[#allocation2 + $0x168] sm:$0xff]  ;;  %v672_v39 = vld [vmem:[#allocation2 + $0x1f0] sm:$0xff]  ;;  %v4059_v41 = vpack.c.bf16 %v623_v32, %v622_v31  ;;  %v4061_v44 = vpack.c.bf16 %v641_v38, %v640_v37 }
 0x1f1   :  { %4086 = vmatprep.subr.bf16.mxu1 %v4085_v22  ;;  %v673_v40 = vld [vmem:[#allocation2 + $0x1f8] sm:$0xff]  ;;  %v4091_v42 = vpack.c.bf16 %v655_v36, %v654_v35  ;;  %v624_v43 = vld [vmem:[#allocation2 + $0x70] sm:$0xff]  ;;  %v590_v56 = vld [vmem:[%s5511_s3] sm:$0xff] }
 0x1f2   :  { %v4093_v45 = vpack.c.bf16 %v673_v40, %v672_v39  ;;  %v625_v46 = vld [vmem:[#allocation2 + $0x78] sm:$0xff]  ;;  %v656_v47 = vld [vmem:[#allocation2 + $0x170] sm:$0xff]  ;;  %v674_v49 = vld [vmem:[#allocation2 + $0x200] sm:$0xff] }
 0x1f3   :  { %4056 = vmatpush3.bf16.msra.mxu0 %v4055_v29  ;;  %v657_v48 = vld [vmem:[#allocation2 + $0x178] sm:$0xff]  ;;  %v675_v50 = vld [vmem:[#allocation2 + $0x208] sm:$0xff]  ;;  %v4063_v51 = vpack.c.bf16 %v625_v46, %v624_v43  ;;  %v676_v58 = vld [vmem:[#allocation2 + $0x210] sm:$0xff] }
 0x1f4   :  { %4088 = vmatpush3.bf16.msra.mxu1 %v4087_v30  ;;  %4058 = vmatprep.subr.bf16.mxu0 %v4057_v33  ;;  %v4095_v54 = vpack.c.bf16 %v657_v48, %v656_v47  ;;  %v4097_v55 = vpack.c.bf16 %v675_v50, %v674_v49  ;;  %v677_v59 = vld [vmem:[#allocation2 + $0x218] sm:$0xff]  ;;  %v596_v60 = vld [vmem:[%s5511_s3 + $0x30] sm:$0xff]  ;;  %v598_v61 = vld [vmem:[%s5511_s3 + $0x40] sm:$0xff] }
 0x1f5   :  { %4090 = vmatprep.subr.bf16.mxu1 %v4089_v34  ;;  %v4101_v62 = vpack.c.bf16 %v677_v59, %v676_v58  ;;  %v595_v63 = vld [vmem:[%s5511_s3 + $0x28] sm:$0xff]  ;;  %v597_v3 = vld [vmem:[%s5511_s3 + $0x38] sm:$0xff]  ;;  %v600_v1 = vld [vmem:[%s5511_s3 + $0x50] sm:$0xff] }
 0x1f6   :  { %v601_v4 = vld [vmem:[%s5511_s3 + $0x58] sm:$0xff]  ;;  %v603_v5 = vld [vmem:[%s5511_s3 + $0x68] sm:$0xff]  ;;  %v602_v7 = vld [vmem:[%s5511_s3 + $0x60] sm:$0xff] }
 0x1f7   :  { %4060 = vmatpush3.bf16.msra.mxu0 %v4059_v41  ;;  %v606_v6 = vld [vmem:[%s5511_s3 + $0x80] sm:$0xff]  ;;  %v608_v8 = vld [vmem:[%s5511_s3 + $0x90] sm:$0xff]  ;;  %v605_v52 = vld [vmem:[%s5511_s3 + $0x78] sm:$0xff] }
 0x1f8   :  { %4092 = vmatpush3.bf16.msra.mxu1 %v4091_v42  ;;  %4062 = vmatprep.subr.bf16.mxu0 %v4061_v44  ;;  %v607_v53 = vld [vmem:[%s5511_s3 + $0x88] sm:$0xff]  ;;  %v594_v10 = vld [vmem:[%s5511_s3 + $0x20] sm:$0xff]  ;;  %v604_v12 = vld [vmem:[%s5511_s3 + $0x70] sm:$0xff] }
 0x1f9   :  { %4094 = vmatprep.subr.bf16.mxu1 %v4093_v45  ;;  %v599_v11 = vld [vmem:[%s5511_s3 + $0x48] sm:$0xff]  ;;  %v609_v2 = vld [vmem:[%s5511_s3 + $0x98] sm:$0xff]  ;;  %v997_v13 = vld [vmem:[#allocation6 + $0x40] sm:$0xff] }
 0x1fa   :  { %v998_v20 = vld [vmem:[#allocation6 + $0x48] sm:$0xff]  ;;  %v999_v14 = vld [vmem:[#allocation6 + $0x50] sm:$0xff]  ;;  %v1000_v0 = vld [vmem:[#allocation6 + $0x58] sm:$0xff] }
 0x1fb   :  { %4064 = vmatpush3.bf16.msra.mxu0 %v4063_v51  ;;  %v4105_v16 = vpack.c.bf16 %v998_v20, %v997_v13  ;;  %v4109_v9 = vpack.c.bf16 %v1000_v0, %v999_v14  ;;  %v3349_v18 = vld [vmem:[%s5510_s2 + $0x4] ss:$0 sm:$0xff]  ;;  %v3354_v50 = vld [vmem:[%s5510_s2 + $0x5] ss:$0 sm:$0xff] }
 0x1fc   :  { %4096 = vmatpush3.bf16.msra.mxu1 %v4095_v54  ;;  %4098 = vmatprep.subr.bf16.mxu0 %v4097_v55 }
 0x1fd   :  { %4106 = vmatprep.subr.bf16.mxu1 %v4105_v16 }
 0x1fe   :  { %760 = vmatmul.mubr.f32.vlgmr.msra.gmra.mrb[4].mxu0 %v590_v56 }
 0x1ff   :  { %845 = vmatmul.mubr.f32.vlgmr.msra.gmra.mrb[4].mxu1 %v592_v57  ;;  %4100 = vmatpush3.bf16.msra.mxu0 %v4097_v55  ;;  %v3355_v55 = vld [vmem:[%s5510_s2 + $0x6] ss:$0 sm:$0xff] }
 0x200   :  { %764 = vmatprep.mubr.f32.mxu0 %v596_v60  ;;  %4102 = vmatprep.subr.bf16.mxu0 %v4101_v62 }
 0x201   :  { %849 = vmatprep.mubr.f32.mxu1 %v598_v61  ;;  %4108 = vmatpush3.bf16.msra.mxu1 %v4105_v16 }
 0x202   :  { %765 = vmatmul.mubr.f32.gmra.mrb[6].mxu0 %v595_v63  ;;  %4110 = vmatprep.subr.bf16.mxu1 %v4109_v9 }
 0x203   :  { %850 = vmatmul.mubr.f32.gmra.mrb[6].mxu1 %v597_v3  ;;  %4104 = vmatpush3.bf16.msra.mxu0 %v4101_v62 }
 0x204   :  { %769 = vmatprep.mubr.f32.mxu0 %v601_v4  ;;  %854 = vmatprep.mubr.f32.mxu1 %v603_v5 }
 0x205   :  { %4112 = vmatpush3.bf16.msra.mxu1 %v4109_v9 }
 0x206   :  { %770 = vmatmul.mubr.f32.gmra.mrb[8].mxu0 %v600_v1 }
 0x207   :  { %855 = vmatmul.mubr.f32.gmra.mrb[8].mxu1 %v602_v7  ;;  %774 = vmatprep.mubr.f32.mxu0 %v606_v6 }
 0x208   :  { %859 = vmatprep.mubr.f32.mxu1 %v608_v8 }
 0x20a   :  { %775 = vmatmul.mubr.f32.gmra.mrb[10].mxu0 %v605_v52 }
 0x20b   :  { %860 = vmatmul.mubr.f32.gmra.mrb[10].mxu1 %v607_v53  ;;  %3765 = vmatprep.mubr.msk.f32.mxu0 %vm58_vm0, %v594_v10 }
 0x20e   :  { %3766 = vmatmul.mubr.msk.f32.vlgmr.msra.gmra.mrb[12].mxu0 %vm58_vm0, %v599_v11 }
 0x20f   :  { %3768 = vmatprep.mubr.msk.f32.mxu0 %vm58_vm0, %v604_v12 }
 0x212   :  { %3769 = vmatmul.mubr.msk.f32.gmra.mrb[14].mxu0 %vm58_vm0, %v609_v2 }
 0x2d1   :  { %v3521_v15 = vpop.f32.mrb[4].mxu0 }
 0x2d2   :  { %v3565_v17 = vpop.f32.mrb[4].mxu1  ;;  %v3522_v19 = vpop.f32.mrb[5].mxu0 }
 0x2d3   :  { %v3566_v21 = vpop.f32.mrb[5].mxu1  ;;  %v3523_v22 = vadd.f32 %v3522_v19, %v3521_v15 }
 0x2d4   :  { %v3567_v23 = vadd.f32 %v3566_v21, %v3565_v17 }
 0x2d5   :  { %v762_v24 = vadd.f32 %v3523_v22, %v3349_v18  ;;  %v3524_v25 = vpop.f32.mrb[6].mxu0 }
 0x2d6   :  { %v3568_v26 = vpop.f32.mrb[6].mxu1  ;;  %v3525_v27 = vpop.f32.mrb[7].mxu0 }
 0x2d7   :  { %v3569_v28 = vpop.f32.mrb[7].mxu1  ;;  %v3526_v29 = vadd.f32 %v3525_v27, %v3524_v25  ;;  %v847_v31 = vadd.f32 %v3567_v23, %v762_v24  ;;  %v3360_v24 = vld [vmem:[%s5510_s2 + $0x7] ss:$0 sm:$0xff] }
 0x2d8   :  { %v3570_v30 = vadd.f32 %v3569_v28, %v3568_v26 }
 0x2d9   :  { %v767_v32 = vadd.f32 %v3526_v29, %v3349_v18  ;;  %v3527_v33 = vpop.f32.mrb[8].mxu0  ;;  %v4390_v29 = vld [vmem:[#allocation3 + $0x8] sm:$0xff] }
 0x2da   :  { %v3571_v34 = vpop.f32.mrb[8].mxu1  ;;  %v3528_v35 = vpop.f32.mrb[9].mxu0 }
 0x2db   :  { %v3572_v36 = vpop.f32.mrb[9].mxu1  ;;  %v3529_v37 = vadd.f32 %v3528_v35, %v3527_v33  ;;  %v852_v39 = vadd.f32 %v3570_v30, %v767_v32 }
 0x2dc   :  { %v3573_v38 = vadd.f32 %v3572_v36, %v3571_v34 }
 0x2dd   :  { %v772_v40 = vadd.f32 %v3529_v37, %v3349_v18  ;;  %v3530_v41 = vpop.f32.mrb[10].mxu0 }
 0x2de   :  { %v3574_v42 = vpop.f32.mrb[10].mxu1  ;;  %v3531_v43 = vpop.f32.mrb[11].mxu0 }
 0x2df   :  { %v3575_v44 = vpop.f32.mrb[11].mxu1  ;;  %v3532_v45 = vadd.f32 %v3531_v43, %v3530_v41  ;;  %v857_v47 = vadd.f32 %v3573_v38, %v772_v40  ;;  %v4392_v41 = vld [vmem:[#allocation3 + $0x18] sm:$0xff] }
 0x2e0   :  { %v3576_v46 = vadd.f32 %v3575_v44, %v3574_v42  ;;  %v4393_v44 = vld [vmem:[#allocation3 + $0x10] sm:$0xff] }
 0x2e1   :  { %v777_v48 = vadd.f32 %v3532_v45, %v3349_v18  ;;  %v3767_v49 = vpop.f32.mrb[12].mxu0 }
 0x2e2   :  { %v937_v51 = vadd.f32 %v3767_v49, %v852_v39  ;;  %v931_v54 = vpop.f32.mrb[13].mxu0 }
 0x2e3   :  { %v932_v56 = vadd.f32 %v931_v54, %v847_v31  ;;  %v862_v57 = vadd.f32 %v3576_v46, %v777_v48  ;;  %v4391_v31 = vld [vmem:[#allocation3] sm:$0xff] }
 0x2e4   :  { %v956_v58 = vmul.f32 %v3354_v50, %v937_v51 }
 0x2e5   :  { %v955_v59 = vmul.f32 %v3354_v50, %v932_v56  ;;  %v3770_v60 = vpop.f32.mrb[14].mxu0  ;;  %v1187_v56 = vld [vmem:[#allocation6 + $0x68] sm:$0xff] }
 0x2e6   :  { %v965_v61 = vadd.f32 %v3355_v55, %v956_v58  ;;  %v947_v62 = vadd.f32 %v3770_v60, %v862_v57  ;;  %v941_v63 = vpop.f32.mrb[15].mxu0  ;;  %v1293_v57 = vld [vmem:[#allocation6 + $0x80] sm:$0xff]  ;;  %v1188_v60 = vld [vmem:[#allocation6 + $0x70] sm:$0xff] }
 0x2e7   :  { %v964_v3 = vadd.f32 %v3355_v55, %v955_v59  ;;  %v942_v4 = vadd.f32 %v941_v63, %v857_v47  ;;  %v1294_v59 = vld [vmem:[#allocation6 + $0x88] sm:$0xff] }
 0x2e8   :  { %v3357_v5 = vmul.f32 -1.442695, %v965_v61  ;;  %v958_v1 = vmul.f32 %v3354_v50, %v947_v62  ;;  %v4121_v62 = vpack.c.bf16 %v1294_v59, %v1293_v57  ;;  %v1420_v57 = vld [vmem:[#allocation6 + $0xa0] sm:$0xff]  ;;  %v1422_v59 = vld [vmem:[#allocation6 + $0xb0] sm:$0xff] }
 0x2e9   :  { %v3356_v7 = vmul.f32 -1.442695, %v964_v3  ;;  %v957_v6 = vmul.f32 %v3354_v50, %v942_v4  ;;  %v1296_v4 = vld [vmem:[#allocation6 + $0x98] sm:$0xff] }
 0x2ea   :  { %4262 = vpow2.f32 %v3357_v5  ;;  %v967_v8 = vadd.f32 %v3355_v55, %v958_v1  ;;  %4122 = vmatprep.subr.bf16.mxu1 %v4121_v62 }
 0x2eb   :  { %4264 = vpow2.f32 %v3356_v7  ;;  %v966_v52 = vadd.f32 %v3355_v55, %v957_v6  ;;  %v1186_v55 = vld [vmem:[#allocation6 + $0x60] sm:$0xff] }
 0x2ec   :  { %v3359_v53 = vmul.f32 -1.442695, %v967_v8  ;;  %v4113_v58 = vpack.c.bf16 %v1187_v56, %v1186_v55 }
 0x2ed   :  { %v3358_v10 = vmul.f32 -1.442695, %v966_v52 }
 0x2ee   :  { %4266 = vpow2.f32 %v3359_v53  ;;  %4114 = vmatprep.subr.bf16.mxu0 %v4113_v58 }
 0x2ef   :  { %4268 = vpow2.f32 %v3358_v10  ;;  %4116 = vmatpush3.bf16.msra.mxu0 %v4113_v58  ;;  %v1421_v58 = vld [vmem:[#allocation6 + $0xa8] sm:$0xff] }
 0x2f4   :  { %v4263_v11 = vpop.eup %4262 }
 0x2f5   :  { %v4265_v12 = vpop.eup %4264  ;;  %v981_v2 = vadd.f32 1.0, %v4263_v11 }
 0x2f6   :  { %v980_v13 = vadd.f32 1.0, %v4265_v12 }
 0x2f7   :  { %4270 = vrcp.f32 %v981_v2 }
 0x2f8   :  { %v4267_v20 = vpop.eup %4266  ;;  %4272 = vrcp.f32 %v980_v13 }
 0x2f9   :  { %v4269_v14 = vpop.eup %4268  ;;  %v983_v16 = vadd.f32 1.0, %v4267_v20 }
 0x2fa   :  { %v982_v0 = vadd.f32 1.0, %v4269_v14 }
 0x2fb   :  { %4274 = vrcp.f32 %v983_v16 }
 0x2fc   :  { %4276 = vrcp.f32 %v982_v0 }
 0x301   :  { %v4271_v9 = vpop.eup %4270 }
 0x302   :  { %v4273_v15 = vpop.eup %4272  ;;  %v993_v18 = vmul.f32 %v4271_v9, %v965_v61  ;;  %v1189_v61 = vld [vmem:[#allocation6 + $0x78] sm:$0xff] }
 0x303   :  { %v992_v17 = vmul.f32 %v4273_v15, %v964_v3  ;;  %v4117_v63 = vpack.c.bf16 %v1189_v61, %v1188_v60  ;;  %v1295_v3 = vld [vmem:[#allocation6 + $0x90] sm:$0xff]  ;;  %v4129_v60 = vpack.c.bf16 %v1421_v58, %v1420_v57  ;;  %v1423_v61 = vld [vmem:[#allocation6 + $0xb8] sm:$0xff] }
 0x304   :  { %v4125_v5 = vpack.c.bf16 %v1296_v4, %v1295_v3 }
 0x305   :  { %v4275_v19 = vpop.eup %4274  ;;  %3779 = vmatprep.mubr.msk.f32.mxu1 %vm58_vm0, %v992_v17  ;;  %4118 = vmatprep.subr.bf16.mxu0 %v4117_v63 }
 0x306   :  { %v4277_v21 = vpop.eup %4276  ;;  %3780 = vmatmul.mubr.msk.f32.vlgmr.msra.gmra.mrb[12].mxu1 %vm58_vm0, %v993_v18  ;;  %v995_v23 = vmul.f32 %v4275_v19, %v967_v8  ;;  %4120 = vmatpush3.bf16.msra.mxu0 %v4117_v63  ;;  %v3372_v63 = vld [vmem:[%s5510_s2 + $0xb] ss:$0 sm:$0xff] }
 0x307   :  { %v994_v22 = vmul.f32 %v4277_v21, %v966_v52  ;;  %4124 = vmatpush3.bf16.msra.mxu1 %v4121_v62  ;;  %v4133_v62 = vpack.c.bf16 %v1423_v61, %v1422_v59  ;;  %4130 = vmatprep.subr.bf16.mxu0 %v4129_v60 }
 0x308   :  { %4126 = vmatprep.subr.bf16.mxu1 %v4125_v5 }
 0x309   :  { %3782 = vmatprep.mubr.msk.f32.mxu1 %vm58_vm0, %v994_v22 }
 0x30a   :  { %3783 = vmatmul.mubr.msk.f32.gmra.mrb[14].mxu1 %vm58_vm0, %v995_v23 }
 0x30b   :  { %4128 = vmatpush3.bf16.msra.mxu1 %v4125_v5 }
 0x3d9   :  { %v3781_v25 = vpop.f32.mrb[12].mxu1 }
 0x3da   :  { %v1090_v26 = vadd.f32 %v3781_v25, %v3360_v24  ;;  %v1084_v27 = vpop.f32.mrb[13].mxu1 }
 0x3db   :  { %v1085_v28 = vadd.f32 %v3360_v24, %v1084_v27 }
 0x3dc   :  { %v4935_v30 = vadd.f32 %v4390_v29, %v1090_v26 }
 0x3dd   :  { %v4937_v32 = vadd.f32 %v4391_v31, %v1085_v28  ;;  %v3784_v33 = vpop.f32.mrb[14].mxu1 }
 0x3de   :  { %v1100_v34 = vadd.f32 %v3784_v33, %v3360_v24  ;;  %v1094_v35 = vpop.f32.mrb[15].mxu1  ;;  %v1112_v36 = vsel %vm58_vm0, %v4935_v30, 0.0  ;;  %v1126_v37 = vmul.f32 %v4935_v30, %v4935_v30 }
 0x3df   :  { %v1095_v38 = vadd.f32 %v3360_v24, %v1094_v35  ;;  %1113 = vadd.xlane.f32.xlu1 %v1112_v36  ;;  %v1109_v39 = vsel %vm58_vm0, %v4937_v32, 0.0  ;;  %v1125_v40 = vmul.f32 %v4937_v32, %v4937_v32 }
 0x3e0   :  { %1110 = vadd.xlane.f32.xlu0 %v1109_v39  ;;  %v4947_v42 = vadd.f32 %v4392_v41, %v1100_v34  ;;  %v1132_v43 = vsel %vm58_vm0, %v1126_v37, 0.0  ;;  %v3365_v34 = vld [vmem:[%s5510_s2 + $0x8] ss:$0 sm:$0xff] }
 0x3e1   :  { %v4950_v45 = vadd.f32 %v4393_v44, %v1095_v38  ;;  %v1129_v46 = vsel %vm58_vm0, %v1125_v40, 0.0  ;;  %v3366_v38 = vld [vmem:[%s5510_s2 + $0x9] ss:$0 sm:$0xff] }
 0x3e2   :  { %v1118_v47 = vsel %vm58_vm0, %v4947_v42, 0.0  ;;  %v1128_v48 = vmul.f32 %v4947_v42, %v4947_v42 }
 0x3e3   :  { %1133 = vadd.xlane.f32.xlu1 %v1132_v43  ;;  %v1115_v49 = vsel %vm58_vm0, %v4950_v45, 0.0  ;;  %v1127_v50 = vmul.f32 %v4950_v45, %v4950_v45 }
 0x3e4   :  { %1130 = vadd.xlane.f32.xlu0 %v1129_v46  ;;  %v1138_v51 = vsel %vm58_vm0, %v1128_v48, 0.0 }
 0x3e5   :  { %v1135_v54 = vsel %vm58_vm0, %v1127_v50, 0.0 }
 0x3e7   :  { %1119 = vadd.xlane.f32.xlu1 %v1118_v47 }
 0x3e8   :  { %1116 = vadd.xlane.f32.xlu0 %v1115_v49 }
 0x3eb   :  { %1139 = vadd.xlane.f32.xlu1 %v1138_v51 }
 0x3ec   :  { %1136 = vadd.xlane.f32.xlu0 %v1135_v54 }
 0x46c   :  { %v1114_v1 = vpop.xlane.xlu1 %1113 }
 0x46d   :  { %v1122_v7 = vmul.f32 0.03125, %v1114_v1  ;;  %v1111_v6 = vpop.xlane.xlu0 %1110 }
 0x46e   :  { %v1121_v8 = vmul.f32 0.03125, %v1111_v6 }
 0x46f   :  { %v1146_v53 = vmul.f32 %v1122_v7, %v1122_v7  ;;  %v1154_v29 = vsub.f32 %v4935_v30, %v1122_v7 }
 0x470   :  { %v1134_v52 = vpop.xlane.xlu1 %1133  ;;  %v1145_v12 = vmul.f32 %v1121_v8, %v1121_v8  ;;  %v1153_v33 = vsub.f32 %v4937_v32, %v1121_v8 }
 0x471   :  { %v1142_v10 = vmul.f32 0.03125, %v1134_v52  ;;  %v1131_v11 = vpop.xlane.xlu0 %1130 }
 0x472   :  { %v1141_v2 = vmul.f32 0.03125, %v1131_v11 }
 0x473   :  { %v1150_v13 = vsub.f32 %v1142_v10, %v1146_v53 }
 0x474   :  { %v1149_v20 = vsub.f32 %v1141_v2, %v1145_v12  ;;  %v1120_v14 = vpop.xlane.xlu1 %1119 }
 0x475   :  { %v1158_v16 = vadd.f32 1e-05, %v1150_v13  ;;  %v1124_v0 = vmul.f32 0.03125, %v1120_v14  ;;  %v1117_v9 = vpop.xlane.xlu0 %1116 }
 0x476   :  { %v1157_v15 = vadd.f32 1e-05, %v1149_v20  ;;  %v1123_v17 = vmul.f32 0.03125, %v1117_v9 }
 0x477   :  { %4278 = vrsqrt.f32 %v1158_v16  ;;  %v1148_v19 = vmul.f32 %v1124_v0, %v1124_v0  ;;  %v1156_v43 = vsub.f32 %v4947_v42, %v1124_v0 }
 0x478   :  { %4280 = vrsqrt.f32 %v1157_v15  ;;  %v1140_v18 = vpop.xlane.xlu1 %1139  ;;  %v1147_v23 = vmul.f32 %v1123_v17, %v1123_v17  ;;  %v1155_v47 = vsub.f32 %v4950_v45, %v1123_v17 }
 0x479   :  { %v1144_v21 = vmul.f32 0.03125, %v1140_v18  ;;  %v1137_v22 = vpop.xlane.xlu0 %1136 }
 0x47a   :  { %v1143_v24 = vmul.f32 0.03125, %v1137_v22  ;;  %v3367_v22 = vld [vmem:[%s5510_s2 + $0xa] ss:$0 sm:$0xff] }
 0x47b   :  { %v1152_v25 = vsub.f32 %v1144_v21, %v1148_v19 }
 0x47c   :  { %v1151_v26 = vsub.f32 %v1143_v24, %v1147_v23 }
 0x47d   :  { %v1160_v27 = vadd.f32 1e-05, %v1152_v25 }
 0x47e   :  { %v1159_v28 = vadd.f32 1e-05, %v1151_v26 }
 0x47f   :  { %4282 = vrsqrt.f32 %v1160_v27 }
 0x480   :  { %4284 = vrsqrt.f32 %v1159_v28 }
 0x481   :  { %v4279_v31 = vpop.eup %4278 }
 0x482   :  { %v4281_v35 = vpop.eup %4280  ;;  %v1166_v36 = vmul.f32 %v4279_v31, %v1154_v29 }
 0x483   :  { %v1165_v37 = vmul.f32 %v4281_v35, %v1153_v33 }
 0x484   :  { %v1174_v39 = vmul.f32 %v3365_v34, %v1166_v36 }
 0x485   :  { %v1173_v40 = vmul.f32 %v3365_v34, %v1165_v37 }
 0x486   :  { %v1182_v44 = vadd.f32 %v3366_v38, %v1174_v39 }
 0x487   :  { %v1181_v41 = vadd.f32 %v3366_v38, %v1173_v40 }
 0x489   :  { %v4283_v46 = vpop.eup %4282  ;;  %3793 = vmatprep.mubr.msk.f32.mxu0 %vm58_vm0, %v1181_v41  ;;  %3807 = vmatprep.mubr.msk.f32.mxu1 %vm58_vm0, %v1181_v41  ;;  %v3381_v41 = vld [vmem:[%s5510_s2 + $0xc] ss:$0 sm:$0xff] }
 0x48a   :  { %v4285_v48 = vpop.eup %4284  ;;  %3794 = vmatmul.mubr.msk.f32.vlgmr.msra.gmra.mrb[16].mxu0 %vm58_vm0, %v1182_v44  ;;  %3808 = vmatmul.mubr.msk.f32.vlgmr.msra.gmra.mrb[16].mxu1 %vm58_vm0, %v1182_v44  ;;  %v1168_v49 = vmul.f32 %v4283_v46, %v1156_v43 }
 0x48b   :  { %v1167_v50 = vmul.f32 %v4285_v48, %v1155_v47  ;;  %4132 = vmatpush3.bf16.msra.mxu0 %v4129_v60 }
 0x48c   :  { %v1176_v51 = vmul.f32 %v3365_v34, %v1168_v49  ;;  %4134 = vmatprep.subr.bf16.mxu0 %v4133_v62 }
 0x48d   :  { %v1175_v54 = vmul.f32 %v3365_v34, %v1167_v50 }
 0x48e   :  { %v1184_v56 = vadd.f32 %v3366_v38, %v1176_v51 }
 0x48f   :  { %v1183_v55 = vadd.f32 %v3366_v38, %v1175_v54  ;;  %4136 = vmatpush3.bf16.msra.mxu0 %v4133_v62 }
 0x491   :  { %3796 = vmatprep.mubr.msk.f32.mxu0 %vm58_vm0, %v1183_v55  ;;  %3810 = vmatprep.mubr.msk.f32.mxu1 %vm58_vm0, %v1183_v55 }
 0x492   :  { %3797 = vmatmul.mubr.msk.f32.gmra.mrb[18].mxu0 %vm58_vm0, %v1184_v56  ;;  %3811 = vmatmul.mubr.msk.f32.gmra.mrb[18].mxu1 %vm58_vm0, %v1184_v56 }
 0x55d   :  { %v3795_v3 = vpop.f32.mrb[16].mxu0  ;;  %v3809_v4 = vpop.f32.mrb[16].mxu1 }
 0x55e   :  { %v1374_v5 = vadd.f32 %v3809_v4, %v3372_v63  ;;  %v1273_v1 = vpop.f32.mrb[17].mxu0  ;;  %v1368_v7 = vpop.f32.mrb[17].mxu1  ;;  %v1279_v25 = vadd.f32 %v3795_v3, %v3367_v22 }
 0x55f   :  { %v1369_v6 = vadd.f32 %v3372_v63, %v1368_v7  ;;  %v1274_v27 = vadd.f32 %v3367_v22, %v1273_v1  ;;  %v1619_v1 = vld [vmem:[#allocation6 + $0xc8] sm:$0xff]  ;;  %v1724_v7 = vld [vmem:[#allocation6 + $0xe0] sm:$0xff] }
 0x560   :  { %v3378_v8 = vmul.f32 -1.442695, %v1374_v5 }
 0x561   :  { %v3377_v52 = vmul.f32 -1.442695, %v1369_v6 }
 0x562   :  { %4286 = vpow2.f32 %v3378_v8  ;;  %v1725_v8 = vld [vmem:[#allocation6 + $0xe8] sm:$0xff] }
 0x563   :  { %4288 = vpow2.f32 %v3377_v52  ;;  %v1620_v52 = vld [vmem:[#allocation6 + $0xd0] sm:$0xff] }
 0x565   :  { %v3798_v53 = vpop.f32.mrb[18].mxu0  ;;  %v3812_v10 = vpop.f32.mrb[18].mxu1 }
 0x566   :  { %v1384_v11 = vadd.f32 %v3812_v10, %v3372_v63  ;;  %v1283_v12 = vpop.f32.mrb[19].mxu0  ;;  %v1378_v2 = vpop.f32.mrb[19].mxu1  ;;  %v1289_v35 = vadd.f32 %v3798_v53, %v3367_v22  ;;  %v1621_v53 = vld [vmem:[#allocation6 + $0xd8] sm:$0xff]  ;;  %v4145_v10 = vpack.c.bf16 %v1725_v8, %v1724_v7 }
 0x567   :  { %v1379_v13 = vadd.f32 %v3372_v63, %v1378_v2  ;;  %v1284_v37 = vadd.f32 %v3367_v22, %v1283_v12  ;;  %v1726_v12 = vld [vmem:[#allocation6 + $0xf0] sm:$0xff]  ;;  %v1727_v2 = vld [vmem:[#allocation6 + $0xf8] sm:$0xff] }
 0x568   :  { %v3380_v20 = vmul.f32 -1.442695, %v1384_v11  ;;  %4146 = vmatprep.subr.bf16.mxu0 %v4145_v10 }
 0x569   :  { %v3379_v14 = vmul.f32 -1.442695, %v1379_v13 }
 0x56a   :  { %4290 = vpow2.f32 %v3380_v20  ;;  %v1822_v20 = vld [vmem:[#allocation6 + $0x100] sm:$0xff] }
 0x56b   :  { %4292 = vpow2.f32 %v3379_v14  ;;  %v1823_v14 = vld [vmem:[#allocation6 + $0x108] sm:$0xff] }
 0x56c   :  { %v4287_v16 = vpop.eup %4286 }
 0x56d   :  { %v4289_v0 = vpop.eup %4288  ;;  %v1400_v9 = vadd.f32 1.0, %v4287_v16  ;;  %v1916_v16 = vld [vmem:[#allocation6 + $0x120] sm:$0xff] }
 0x56e   :  { %v1399_v15 = vadd.f32 1.0, %v4289_v0  ;;  %v1917_v0 = vld [vmem:[#allocation6 + $0x128] sm:$0xff] }
 0x56f   :  { %4294 = vrcp.f32 %v1400_v9  ;;  %v5026_v9 = vpack.c.bf16 %v1823_v14, %v1822_v20 }
 0x570   :  { %4296 = vrcp.f32 %v1399_v15  ;;  %v5028_v15 = vpack.c.bf16 %v1917_v0, %v1916_v16 }
 0x574   :  { %v4291_v17 = vpop.eup %4290 }
 0x575   :  { %v4293_v18 = vpop.eup %4292  ;;  %v1402_v19 = vadd.f32 1.0, %v4291_v17 }
 0x576   :  { %v1401_v21 = vadd.f32 1.0, %v4293_v18 }
 0x577   :  { %4298 = vrcp.f32 %v1402_v19 }
 0x578   :  { %4300 = vrcp.f32 %v1401_v21 }
 0x579   :  { %v4295_v23 = vpop.eup %4294 }
 0x57a   :  { %v4297_v24 = vpop.eup %4296  ;;  %v1412_v26 = vmul.f32 %v4295_v23, %v1374_v5  ;;  %v1618_v5 = vld [vmem:[#allocation6 + $0xc0] sm:$0xff] }
 0x57b   :  { %v1411_v28 = vmul.f32 %v4297_v24, %v1369_v6  ;;  %v4137_v6 = vpack.c.bf16 %v1619_v1, %v1618_v5 }
 0x57c   :  { %v1416_v29 = vmul.f32 %v1412_v26, %v1279_v25 }
 0x57d   :  { %v1415_v31 = vmul.f32 %v1411_v28, %v1274_v27  ;;  %4138 = vmatprep.subr.bf16.mxu1 %v4137_v6 }
 0x57e   :  { %4140 = vmatpush3.bf16.msra.mxu1 %v4137_v6 }
 0x57f   :  { %3821 = vmatprep.mubr.msk.f32.mxu0 %vm58_vm0, %v1415_v31 }
 0x580   :  { %3822 = vmatmul.mubr.msk.f32.vlgmr.msra.gmra.mrb[20].mxu0 %vm58_vm0, %v1416_v29 }
 0x581   :  { %v4299_v33 = vpop.eup %4298  ;;  %4148 = vmatpush3.bf16.msra.mxu0 %v4145_v10  ;;  %v2014_v10 = vld [vmem:[#allocation6 + $0x140] sm:$0xff] }
 0x582   :  { %v4301_v34 = vpop.eup %4300  ;;  %v1414_v36 = vmul.f32 %v4299_v33, %v1384_v11  ;;  %v4141_v11 = vpack.c.bf16 %v1621_v53, %v1620_v52 }
 0x583   :  { %v1413_v38 = vmul.f32 %v4301_v34, %v1379_v13  ;;  %v4149_v13 = vpack.c.bf16 %v1727_v2, %v1726_v12 }
 0x584   :  { %v1418_v39 = vmul.f32 %v1414_v36, %v1289_v35  ;;  %4142 = vmatprep.subr.bf16.mxu1 %v4141_v11 }
 0x585   :  { %v1417_v40 = vmul.f32 %v1413_v38, %v1284_v37  ;;  %4150 = vmatprep.subr.bf16.mxu0 %v4149_v13  ;;  %4144 = vmatpush3.bf16.msra.mxu1 %v4141_v11  ;;  %v2015_v11 = vld [vmem:[#allocation6 + $0x148] sm:$0xff] }
 0x586   :  { %4152 = vmatpush3.bf16.msra.mxu0 %v4149_v13  ;;  %4154 = vmatprep.subr.bf16.mxu1 %v5026_v9  ;;  %v4169_v14 = vpack.c.bf16 %v2015_v11, %v2014_v10 }
 0x587   :  { %3824 = vmatprep.mubr.msk.f32.mxu0 %vm58_vm0, %v1417_v40  ;;  %4162 = vmatprep.subr.bf16.mxu0 %v5028_v15 }
 0x588   :  { %3825 = vmatmul.mubr.msk.f32.gmra.mrb[22].mxu0 %vm58_vm0, %v1418_v39 }
 0x653   :  { %v3823_v43 = vpop.f32.mrb[20].mxu0 }
 0x654   :  { %v1513_v44 = vadd.f32 %v3823_v43, %v3381_v41  ;;  %v1507_v46 = vpop.f32.mrb[21].mxu0 }
 0x655   :  { %v1508_v47 = vadd.f32 %v3381_v41, %v1507_v46 }
 0x656   :  { %v4995_v48 = vadd.f32 %v1513_v44, %v4935_v30 }
 0x657   :  { %v4998_v49 = vadd.f32 %v1508_v47, %v4937_v32 }
 0x658   :  { %v1535_v50 = vsel %vm58_vm0, %v4995_v48, 0.0  ;;  %v1549_v51 = vmul.f32 %v4995_v48, %v4995_v48 }
 0x659   :  { %1536 = vadd.xlane.f32.xlu1 %v1535_v50  ;;  %v1532_v54 = vsel %vm58_vm0, %v4998_v49, 0.0  ;;  %v1548_v55 = vmul.f32 %v4998_v49, %v4998_v49 }
 0x65a   :  { %1533 = vadd.xlane.f32.xlu0 %v1532_v54  ;;  %v1555_v32 = vsel %vm58_vm0, %v1549_v51, 0.0 }
 0x65b   :  { %v3826_v56 = vpop.f32.mrb[22].mxu0  ;;  %v1552_v59 = vsel %vm58_vm0, %v1548_v55, 0.0 }
 0x65c   :  { %v1523_v30 = vadd.f32 %v3826_v56, %v3381_v41  ;;  %v1517_v57 = vpop.f32.mrb[23].mxu0 }
 0x65d   :  { %v1518_v58 = vadd.f32 %v3381_v41, %v1517_v57  ;;  %1556 = vadd.xlane.f32.xlu1 %v1555_v32 }
 0x65e   :  { %v5011_v60 = vadd.f32 %v1523_v30, %v4947_v42  ;;  %1553 = vadd.xlane.f32.xlu0 %v1552_v59  ;;  %v3386_v30 = vld [vmem:[%s5510_s2 + $0xd] ss:$0 sm:$0xff] }
 0x65f   :  { %v5014_v61 = vadd.f32 %v1518_v58, %v4950_v45 }
 0x660   :  { %v1541_v62 = vsel %vm58_vm0, %v5011_v60, 0.0  ;;  %v1551_v63 = vmul.f32 %v5011_v60, %v5011_v60 }
 0x661   :  { %1542 = vadd.xlane.f32.xlu1 %v1541_v62  ;;  %v1538_v3 = vsel %vm58_vm0, %v5014_v61, 0.0  ;;  %v1550_v4 = vmul.f32 %v5014_v61, %v5014_v61  ;;  %v3387_v62 = vld [vmem:[%s5510_s2 + $0xe] ss:$0 sm:$0xff] }
 0x662   :  { %1539 = vadd.xlane.f32.xlu0 %v1538_v3  ;;  %v1561_v42 = vsel %vm58_vm0, %v1551_v63, 0.0  ;;  %v1824_v63 = vld [vmem:[#allocation6 + $0x110] sm:$0xff] }
 0x663   :  { %v1558_v45 = vsel %vm58_vm0, %v1550_v4, 0.0  ;;  %v1825_v4 = vld [vmem:[#allocation6 + $0x118] sm:$0xff] }
 0x664   :  { %v4157_v6 = vpack.c.bf16 %v1825_v4, %v1824_v63 }
 0x665   :  { %1562 = vadd.xlane.f32.xlu1 %v1561_v42  ;;  %v1918_v42 = vld [vmem:[#allocation6 + $0x130] sm:$0xff] }
 0x666   :  { %1559 = vadd.xlane.f32.xlu0 %v1558_v45  ;;  %v1919_v45 = vld [vmem:[#allocation6 + $0x138] sm:$0xff] }
 0x667   :  { %v4165_v8 = vpack.c.bf16 %v1919_v45, %v1918_v42 }
 0x6e6   :  { %v1537_v17 = vpop.xlane.xlu1 %1536 }
 0x6e7   :  { %v1545_v18 = vmul.f32 0.03125, %v1537_v17  ;;  %v1534_v19 = vpop.xlane.xlu0 %1533 }
 0x6e8   :  { %v1544_v21 = vmul.f32 0.03125, %v1534_v19  ;;  %v1609_v19 = vld [vmem:[%s5512_s4 + $0x8] sm:$0xff] }
 0x6e9   :  { %v1569_v23 = vmul.f32 %v1545_v18, %v1545_v18  ;;  %v1577_v54 = vsub.f32 %v4995_v48, %v1545_v18 }
 0x6ea   :  { %v1557_v22 = vpop.xlane.xlu1 %1556  ;;  %v1568_v26 = vmul.f32 %v1544_v21, %v1544_v21  ;;  %v1576_v56 = vsub.f32 %v4998_v49, %v1544_v21  ;;  %v3389_v21 = vld [vmem:[%s5512_s4 + $0x28] sm:$0xff] }
 0x6eb   :  { %v1565_v24 = vmul.f32 0.03125, %v1557_v22  ;;  %v1554_v25 = vpop.xlane.xlu0 %1553  ;;  %v1608_v22 = vld [vmem:[%s5512_s4] sm:$0xff] }
 0x6ec   :  { %v1564_v27 = vmul.f32 0.03125, %v1554_v25 }
 0x6ed   :  { %v1573_v28 = vsub.f32 %v1565_v24, %v1569_v23  ;;  %v3388_v23 = vld [vmem:[%s5512_s4 + $0x20] sm:$0xff] }
 0x6ee   :  { %v1572_v29 = vsub.f32 %v1564_v27, %v1568_v26  ;;  %v1543_v31 = vpop.xlane.xlu1 %1542 }
 0x6ef   :  { %v1581_v33 = vadd.f32 1e-05, %v1573_v28  ;;  %v1547_v34 = vmul.f32 0.03125, %v1543_v31  ;;  %v1540_v35 = vpop.xlane.xlu0 %1539 }
 0x6f0   :  { %v1580_v36 = vadd.f32 1e-05, %v1572_v29  ;;  %v1546_v37 = vmul.f32 0.03125, %v1540_v35  ;;  %v5081_v35 = vld [vmem:[%s5510_s2 + $0x14] ss:$0 sm:$0xff] }
 0x6f1   :  { %4302 = vrsqrt.f32 %v1581_v33  ;;  %v1571_v39 = vmul.f32 %v1547_v34, %v1547_v34  ;;  %v1579_v1 = vsub.f32 %v5011_v60, %v1547_v34 }
 0x6f2   :  { %4304 = vrsqrt.f32 %v1580_v36  ;;  %v1563_v38 = vpop.xlane.xlu1 %1562  ;;  %v1570_v43 = vmul.f32 %v1546_v37, %v1546_v37  ;;  %v1578_v53 = vsub.f32 %v5014_v61, %v1546_v37  ;;  %v1611_v37 = vld [vmem:[%s5512_s4 + $0x18] sm:$0xff] }
 0x6f3   :  { %v1567_v40 = vmul.f32 0.03125, %v1563_v38  ;;  %v1560_v41 = vpop.xlane.xlu0 %1559  ;;  %v3391_v38 = vld [vmem:[%s5512_s4 + $0x38] sm:$0xff] }
 0x6f4   :  { %v1566_v44 = vmul.f32 0.03125, %v1560_v41  ;;  %v3390_v41 = vld [vmem:[%s5512_s4 + $0x30] sm:$0xff] }
 0x6f5   :  { %v1575_v46 = vsub.f32 %v1567_v40, %v1571_v39  ;;  %v1610_v40 = vld [vmem:[%s5512_s4 + $0x10] sm:$0xff] }
 0x6f6   :  { %v1574_v47 = vsub.f32 %v1566_v44, %v1570_v43 }
 0x6f7   :  { %v1583_v50 = vadd.f32 1e-05, %v1575_v46 }
 0x6f8   :  { %v1582_v51 = vadd.f32 1e-05, %v1574_v47 }
 0x6f9   :  { %4306 = vrsqrt.f32 %v1583_v50 }
 0x6fa   :  { %4308 = vrsqrt.f32 %v1582_v51 }
 0x6fb   :  { %v4303_v55 = vpop.eup %4302 }
 0x6fc   :  { %v4305_v57 = vpop.eup %4304  ;;  %v1589_v32 = vmul.f32 %v4303_v55, %v1577_v54 }
 0x6fd   :  { %v1588_v58 = vmul.f32 %v4305_v57, %v1576_v56 }
 0x6fe   :  { %v1597_v59 = vmul.f32 %v3386_v30, %v1589_v32 }
 0x6ff   :  { %v1596_v3 = vmul.f32 %v3386_v30, %v1588_v58 }
 0x700   :  { %v1605_v7 = vadd.f32 %v3387_v62, %v1597_v59 }
 0x701   :  { %v1604_v5 = vadd.f32 %v3387_v62, %v1596_v3 }
 0x703   :  { %v4307_v52 = vpop.eup %4306  ;;  %3835 = vmatprep.mubr.msk.f32.mxu1 %vm58_vm0, %v1604_v5  ;;  %3849 = vmatprep.mubr.msk.f32.mxu0 %vm58_vm0, %v1604_v5 }
 0x704   :  { %v4309_v12 = vpop.eup %4308  ;;  %v1591_v2 = vmul.f32 %v4307_v52, %v1579_v1  ;;  %3836 = vmatmul.mubr.msk.f32.vlgmr.msra.gmra.mrb[20].mxu1 %vm58_vm0, %v1605_v7  ;;  %3850 = vmatmul.mubr.msk.f32.vlgmr.msra.gmra.mrb[24].mxu0 %vm58_vm0, %v1605_v7 }
 0x705   :  { %v1590_v13 = vmul.f32 %v4309_v12, %v1578_v53  ;;  %4156 = vmatpush3.bf16.msra.mxu1 %v5026_v9  ;;  %4164 = vmatpush3.bf16.msra.mxu0 %v5028_v15  ;;  %v2016_v9 = vld [vmem:[#allocation6 + $0x150] sm:$0xff]  ;;  %v2017_v15 = vld [vmem:[#allocation6 + $0x158] sm:$0xff] }
 0x706   :  { %v1599_v20 = vmul.f32 %v3386_v30, %v1591_v2  ;;  %4158 = vmatprep.subr.bf16.mxu1 %v4157_v6  ;;  %4166 = vmatprep.subr.bf16.mxu0 %v4165_v8  ;;  %v4173_v18 = vpack.c.bf16 %v2017_v15, %v2016_v9 }
 0x707   :  { %v1598_v16 = vmul.f32 %v3386_v30, %v1590_v13 }
 0x708   :  { %v1607_v17 = vadd.f32 %v3387_v62, %v1599_v20 }
 0x709   :  { %v1606_v0 = vadd.f32 %v3387_v62, %v1598_v16  ;;  %4160 = vmatpush3.bf16.msra.mxu1 %v4157_v6  ;;  %4168 = vmatpush3.bf16.msra.mxu0 %v4165_v8 }
 0x70a   :  { %4170 = vmatprep.subr.bf16.mxu1 %v4169_v14 }
 0x70b   :  { %3838 = vmatprep.mubr.msk.f32.mxu1 %vm58_vm0, %v1606_v0  ;;  %3852 = vmatprep.mubr.msk.f32.mxu0 %vm58_vm0, %v1606_v0 }
 0x70c   :  { %3839 = vmatmul.mubr.msk.f32.gmra.mrb[22].mxu1 %vm58_vm0, %v1607_v17  ;;  %3853 = vmatmul.mubr.msk.f32.gmra.mrb[26].mxu0 %vm58_vm0, %v1607_v17 }
 0x70d   :  { %3863 = vmatprep.mubr.msk.f32.mxu1 %vm58_vm0, %v1604_v5  ;;  %3877 = vmatprep.mubr.msk.f32.mxu0 %vm58_vm0, %v1604_v5 }
 0x710   :  { %3864 = vmatmul.mubr.msk.f32.vlgmr.msra.gmra.mrb[24].mxu1 %vm58_vm0, %v1605_v7  ;;  %3878 = vmatmul.mubr.msk.f32.vlgmr.msra.gmra.mrb[28].mxu0 %vm58_vm0, %v1605_v7 }
 0x711   :  { %3866 = vmatprep.mubr.msk.f32.mxu1 %vm58_vm0, %v1606_v0  ;;  %3880 = vmatprep.mubr.msk.f32.mxu0 %vm58_vm0, %v1606_v0 }
 0x712   :  { %4172 = vmatpush3.bf16.msra.mxu1 %v4169_v14 }
 0x713   :  { %4174 = vmatprep.subr.bf16.mxu1 %v4173_v18 }
 0x714   :  { %3867 = vmatmul.mubr.msk.f32.gmra.mrb[26].mxu1 %vm58_vm0, %v1607_v17  ;;  %3881 = vmatmul.mubr.msk.f32.gmra.mrb[30].mxu0 %vm58_vm0, %v1607_v17 }
 0x715   :  { %3891 = vmatprep.mubr.msk.f32.mxu1 %vm58_vm0, %v1604_v5 }
 0x716   :  { %4176 = vmatpush3.bf16.msra.mxu1 %v4173_v18 }
 0x719   :  { %3892 = vmatmul.mubr.msk.f32.vlgmr.msra.gmra.mrb[28].mxu1 %vm58_vm0, %v1605_v7 }
 0x71a   :  { %3894 = vmatprep.mubr.msk.f32.mxu1 %vm58_vm0, %v1606_v0 }
 0x71d   :  { %3895 = vmatmul.mubr.msk.f32.gmra.mrb[30].mxu1 %vm58_vm0, %v1607_v17 }
 0x7d7   :  { %v3837_v24 = vpop.f32.mrb[20].mxu1  ;;  %v3851_v25 = vpop.f32.mrb[24].mxu0 }
 0x7d8   :  { %v1720_v26 = vmul.f32 %v3837_v24, %v1609_v19  ;;  %v1814_v27 = vmul.f32 %v3851_v25, %v3389_v21  ;;  %v1700_v28 = vpop.f32.mrb[21].mxu1  ;;  %v1794_v29 = vpop.f32.mrb[25].mxu0 }
 0x7d9   :  { %v1719_v31 = vmul.f32 %v1700_v28, %v1608_v22  ;;  %v1813_v33 = vmul.f32 %v3388_v23, %v1794_v29 }
 0x7da   :  { %v5076_v34 = vadd.f32 %v1814_v27, %v1720_v26  ;;  %v5143_v26 = vld [vmem:[%s5510_s2 + $0x16] ss:$0 sm:$0xff] }
 0x7db   :  { %v5083_v36 = vadd.f32 %v1813_v33, %v1719_v31  ;;  %v5160_v33 = vld [vmem:[%s5510_s2 + $0x17] ss:$0 sm:$0xff] }
 0x7dc   :  { %v2109_v18 = vmul.f32 %v5081_v35, %v5076_v34  ;;  %v2127_v29 = vmul.f32 %v5143_v26, %v5076_v34 }
 0x7dd   :  { %v2108_v39 = vmul.f32 %v5081_v35, %v5083_v36  ;;  %v2126_v28 = vmul.f32 %v5143_v26, %v5083_v36 }
 0x7df   :  { %v3840_v43 = vpop.f32.mrb[22].mxu1  ;;  %v3854_v44 = vpop.f32.mrb[26].mxu0  ;;  %3905 = vmatprep.mubr.msk.f32.mxu0 %vm58_vm0, %v2108_v39  ;;  %v2136_v39 = vmul.f32 %v5160_v33, %v5076_v34 }
 0x7e0   :  { %v1722_v46 = vmul.f32 %v3840_v43, %v1611_v37  ;;  %v1816_v47 = vmul.f32 %v3854_v44, %v3391_v38  ;;  %v1710_v50 = vpop.f32.mrb[23].mxu1  ;;  %v1804_v51 = vpop.f32.mrb[27].mxu0 }
 0x7e1   :  { %v1721_v54 = vmul.f32 %v1710_v50, %v1610_v40  ;;  %v1815_v55 = vmul.f32 %v3390_v41, %v1804_v51  ;;  %v2142_v50 = vld [vmem:[%s5513_s5 + $0x18] sm:$0xff] }
 0x7e2   :  { %v5100_v56 = vadd.f32 %v1816_v47, %v1722_v46 }
 0x7e3   :  { %v5102_v30 = vadd.f32 %v1815_v55, %v1721_v54  ;;  %v3865_v57 = vpop.f32.mrb[24].mxu1  ;;  %v3879_v32 = vpop.f32.mrb[28].mxu0  ;;  %v2141_v54 = vld [vmem:[%s5513_s5 + $0x10] sm:$0xff] }
 0x7e4   :  { %v1912_v58 = vmul.f32 %v3865_v57, %v1609_v19  ;;  %v2006_v59 = vmul.f32 %v3879_v32, %v3389_v21  ;;  %v1892_v62 = vpop.f32.mrb[25].mxu1  ;;  %v1986_v63 = vpop.f32.mrb[29].mxu0  ;;  %v5126_v21 = vld [vmem:[%s5510_s2 + $0x15] ss:$0 sm:$0xff] }
 0x7e5   :  { %v1911_v3 = vmul.f32 %v1892_v62, %v1608_v22  ;;  %v2005_v4 = vmul.f32 %v3388_v23, %v1986_v63  ;;  %v2110_v19 = vmul.f32 %v5081_v35, %v5102_v30  ;;  %v2111_v22 = vmul.f32 %v5081_v35, %v5100_v56  ;;  %v2143_v62 = vld [vmem:[%s5513_s5 + $0x20] sm:$0xff] }
 0x7e6   :  { %v2010_v42 = vadd.f32 %v2006_v59, %v1912_v58  ;;  %v2117_v23 = vmul.f32 %v5126_v21, %v5083_v36  ;;  %v2118_v24 = vmul.f32 %v5126_v21, %v5076_v34  ;;  %v2119_v25 = vmul.f32 %v5126_v21, %v5102_v30  ;;  %v2139_v34 = vld [vmem:[%s5513_s5] sm:$0xff]  ;;  %v2144_v58 = vld [vmem:[%s5513_s5 + $0x28] sm:$0xff] }
 0x7e7   :  { %v2009_v45 = vadd.f32 %v2005_v4, %v1911_v3  ;;  %v3868_v5 = vpop.f32.mrb[26].mxu1  ;;  %v3882_v1 = vpop.f32.mrb[30].mxu0  ;;  %v2120_v27 = vmul.f32 %v5126_v21, %v5100_v56  ;;  %v2128_v31 = vmul.f32 %v5143_v26, %v5102_v30 }
 0x7e8   :  { %v1914_v7 = vmul.f32 %v3868_v5, %v1611_v37  ;;  %v2008_v6 = vmul.f32 %v3882_v1, %v3391_v38  ;;  %v1902_v8 = vpop.f32.mrb[27].mxu1  ;;  %v1996_v52 = vpop.f32.mrb[31].mxu0  ;;  %v2129_v37 = vmul.f32 %v5143_v26, %v5100_v56  ;;  %v2135_v38 = vmul.f32 %v5160_v33, %v5083_v36  ;;  %v2140_v36 = vld [vmem:[%s5513_s5 + $0x8] sm:$0xff]  ;;  %v2146_v5 = vld [vmem:[%s5513_s5 + $0x38] sm:$0xff] }
 0x7e9   :  { %v4177_v10 = vpack.c.bf16 %v2010_v42, %v2009_v45  ;;  %v1913_v11 = vmul.f32 %v1902_v8, %v1610_v40  ;;  %v2007_v12 = vmul.f32 %v3390_v41, %v1996_v52  ;;  %v2137_v40 = vmul.f32 %v5160_v33, %v5102_v30 }
 0x7ea   :  { %v2012_v2 = vadd.f32 %v2008_v6, %v1914_v7  ;;  %v2138_v41 = vmul.f32 %v5160_v33, %v5100_v56  ;;  %v2145_v7 = vld [vmem:[%s5513_s5 + $0x30] sm:$0xff] }
 0x7eb   :  { %v2011_v13 = vadd.f32 %v2007_v12, %v1913_v11  ;;  %4179 = vmatprep.subr.msk.bf16.mxu0 %vm5106_vm1, %v4177_v10  ;;  %v2148_v11 = vld [vmem:[%s5513_s5 + $0x48] sm:$0xff] }
 0x7ec   :  { %v3893_v20 = vpop.f32.mrb[28].mxu1  ;;  %4182 = vmatpush3.bf16.xpose.msk.msra.mxu0 %vm5106_vm1, %v4177_v10 }
 0x7ed   :  { %v4183_v14 = vpack.c.bf16 %v2012_v2, %v2011_v13  ;;  %v2084_v16 = vpop.f32.mrb[29].mxu1  ;;  %v2147_v2 = vld [vmem:[%s5513_s5 + $0x40] sm:$0xff] }
 0x7ee   :  { %v4189_v0 = vpack.c.bf16 %v3893_v20, %v2084_v16 }
 0x7ef   :  { %4185 = vmatprep.subr.msk.bf16.mxu0 %vm5106_vm1, %v4183_v14 }
 0x7f0   :  { %v3896_v17 = vpop.f32.mrb[30].mxu1  ;;  %4190 = vmatprep.subr.bf16.mxu1 %v4189_v0 }
 0x7f1   :  { %v2094_v9 = vpop.f32.mrb[31].mxu1  ;;  %4192 = vmatpush3.bf16.msra.mxu1 %v4189_v0 }
 0x7f2   :  { %v4193_v15 = vpack.c.bf16 %v3896_v17, %v2094_v9  ;;  %v2150_v17 = vld [vmem:[%s5513_s5 + $0x58] sm:$0xff] }
 0x7f4   :  { %4194 = vmatprep.subr.bf16.mxu1 %v4193_v15  ;;  %4188 = vmatpush3.bf16.xpose.msk.msra.mxu0 %vm5106_vm1, %v4183_v14 }
 0x7f5   :  { %4196 = vmatpush3.bf16.msra.mxu1 %v4193_v15  ;;  %v2149_v15 = vld [vmem:[%s5513_s5 + $0x50] sm:$0xff] }
 0x7fb   :  { %3906 = vmatmul.mubr.msk.f32.vlgmr.msra.gmra.mrb[32].mxu0 %vm58_vm0, %v2109_v18 }
 0x7fc   :  { %3908 = vmatprep.mubr.msk.f32.mxu0 %vm58_vm0, %v2110_v19 }
 0x7ff   :  { %3909 = vmatmul.mubr.msk.f32.gmra.mrb[34].mxu0 %vm58_vm0, %v2111_v22 }
 0x800   :  { %3911 = vmatprep.mubr.msk.f32.mxu0 %vm58_vm0, %v2117_v23 }
 0x803   :  { %3912 = vmatmul.mubr.msk.f32.gmra.mrb[36].mxu0 %vm58_vm0, %v2118_v24 }
 0x804   :  { %3914 = vmatprep.mubr.msk.f32.mxu0 %vm58_vm0, %v2119_v25  ;;  %v2152_v25 = vld [vmem:[%s5513_s5 + $0x68] sm:$0xff] }
 0x807   :  { %3915 = vmatmul.mubr.msk.f32.gmra.mrb[38].mxu0 %vm58_vm0, %v2120_v27 }
 0x808   :  { %3917 = vmatprep.mubr.msk.f32.mxu0 %vm58_vm0, %v2126_v28  ;;  %v2151_v28 = vld [vmem:[%s5513_s5 + $0x60] sm:$0xff] }
 0x80b   :  { %3918 = vmatmul.mubr.msk.f32.gmra.mrb[40].mxu0 %vm58_vm0, %v2127_v29 }
 0x80c   :  { %3920 = vmatprep.mubr.msk.f32.mxu0 %vm58_vm0, %v2128_v31 }
 0x80f   :  { %3921 = vmatmul.mubr.msk.f32.gmra.mrb[42].mxu0 %vm58_vm0, %v2129_v37 }
 0x810   :  { %3923 = vmatprep.mubr.msk.f32.mxu0 %vm58_vm0, %v2135_v38 }
 0x813   :  { %3924 = vmatmul.mubr.msk.f32.gmra.mrb[44].mxu0 %vm58_vm0, %v2136_v39 }
 0x814   :  { %3926 = vmatprep.mubr.msk.f32.mxu0 %vm58_vm0, %v2137_v40  ;;  %v2154_v40 = vld [vmem:[%s5513_s5 + $0x78] sm:$0xff] }
 0x817   :  { %3927 = vmatmul.mubr.msk.f32.gmra.mrb[46].mxu0 %vm58_vm0, %v2138_v41 }
 0x8ce   :  { %v3907_v43 = vpop.f32.mrb[32].mxu0 }
 0x8cf   :  { %v5184_v44 = vadd.f32 %v3907_v43, %v2140_v36  ;;  %v2281_v46 = vpop.f32.mrb[33].mxu0  ;;  %v2153_v36 = vld [vmem:[%s5513_s5 + $0x70] sm:$0xff] }
 0x8d0   :  { %v5186_v47 = vadd.f32 %v2281_v46, %v2139_v34 }
 0x8d1   :  { %v2363_v51 = vsel %vm58_vm0, %v5184_v44, -inf }
 0x8d2   :  { %2364 = vmax.xlane.f32.xlu1 %v2363_v51  ;;  %v3910_v55 = vpop.f32.mrb[34].mxu0  ;;  %v2360_v56 = vsel %vm58_vm0, %v5186_v47, -inf }
 0x8d3   :  { %v5198_v30 = vadd.f32 %v3910_v55, %v2142_v50  ;;  %2361 = vmax.xlane.f32.xlu0 %v2360_v56  ;;  %v2291_v57 = vpop.f32.mrb[35].mxu0 }
 0x8d4   :  { %v5200_v32 = vadd.f32 %v2291_v57, %v2141_v54 }
 0x8d5   :  { %v2369_v59 = vsel %vm58_vm0, %v5198_v30, -inf }
 0x8d6   :  { %2370 = vmax.xlane.f32.xlu1 %v2369_v59  ;;  %v3913_v63 = vpop.f32.mrb[36].mxu0  ;;  %v2366_v3 = vsel %vm58_vm0, %v5200_v32, -inf }
 0x8d7   :  { %v5212_v4 = vadd.f32 %v3913_v63, %v2144_v58  ;;  %v2301_v42 = vpop.f32.mrb[37].mxu0  ;;  %2367 = vmax.xlane.f32.xlu0 %v2366_v3 }
 0x8d8   :  { %v5214_v45 = vadd.f32 %v2301_v42, %v2143_v62 }
 0x8d9   :  { %v2375_v1 = vsel %vm58_vm0, %v5212_v4, -inf }
 0x8da   :  { %2376 = vmax.xlane.f32.xlu1 %v2375_v1  ;;  %v3916_v6 = vpop.f32.mrb[38].mxu0  ;;  %v2372_v8 = vsel %vm58_vm0, %v5214_v45, -inf }
 0x8db   :  { %v5226_v52 = vadd.f32 %v3916_v6, %v2146_v5  ;;  %v2311_v53 = vpop.f32.mrb[39].mxu0  ;;  %2373 = vmax.xlane.f32.xlu0 %v2372_v8 }
 0x8dc   :  { %v5228_v10 = vadd.f32 %v2311_v53, %v2145_v7 }
 0x8dd   :  { %v2381_v12 = vsel %vm58_vm0, %v5226_v52, -inf }
 0x8de   :  { %2382 = vmax.xlane.f32.xlu1 %v2381_v12  ;;  %v3919_v13 = vpop.f32.mrb[40].mxu0  ;;  %v2378_v20 = vsel %vm58_vm0, %v5228_v10, -inf }
 0x8df   :  { %v5240_v14 = vadd.f32 %v3919_v13, %v2148_v11  ;;  %v2321_v16 = vpop.f32.mrb[41].mxu0  ;;  %2379 = vmax.xlane.f32.xlu0 %v2378_v20 }
 0x8e0   :  { %v5242_v0 = vadd.f32 %v2321_v16, %v2147_v2 }
 0x8e1   :  { %v2387_v9 = vsel %vm58_vm0, %v5240_v14, -inf }
 0x8e2   :  { %2388 = vmax.xlane.f32.xlu1 %v2387_v9  ;;  %v3922_v18 = vpop.f32.mrb[42].mxu0  ;;  %v2384_v19 = vsel %vm58_vm0, %v5242_v0, -inf }
 0x8e3   :  { %v5254_v22 = vadd.f32 %v3922_v18, %v2150_v17  ;;  %v2331_v23 = vpop.f32.mrb[43].mxu0  ;;  %2385 = vmax.xlane.f32.xlu0 %v2384_v19 }
 0x8e4   :  { %v5256_v24 = vadd.f32 %v2331_v23, %v2149_v15 }
 0x8e5   :  { %v2393_v27 = vsel %vm58_vm0, %v5254_v22, -inf }
 0x8e6   :  { %2394 = vmax.xlane.f32.xlu1 %v2393_v27  ;;  %v3925_v29 = vpop.f32.mrb[44].mxu0  ;;  %v2390_v31 = vsel %vm58_vm0, %v5256_v24, -inf }
 0x8e7   :  { %v5268_v37 = vadd.f32 %v3925_v29, %v2152_v25  ;;  %v2341_v38 = vpop.f32.mrb[45].mxu0  ;;  %2391 = vmax.xlane.f32.xlu0 %v2390_v31 }
 0x8e8   :  { %v5270_v39 = vadd.f32 %v2341_v38, %v2151_v28 }
 0x8e9   :  { %v2399_v41 = vsel %vm58_vm0, %v5268_v37, -inf }
 0x8ea   :  { %2400 = vmax.xlane.f32.xlu1 %v2399_v41  ;;  %v3928_v34 = vpop.f32.mrb[46].mxu0  ;;  %v2396_v43 = vsel %vm58_vm0, %v5270_v39, -inf }
 0x8eb   :  { %v5282_v46 = vadd.f32 %v3928_v34, %v2154_v40  ;;  %v2351_v50 = vpop.f32.mrb[47].mxu0  ;;  %2397 = vmax.xlane.f32.xlu0 %v2396_v43 }
 0x8ec   :  { %v5284_v51 = vadd.f32 %v2351_v50, %v2153_v36 }
 0x8ed   :  { %v2405_v54 = vsel %vm58_vm0, %v5282_v46, -inf }
 0x8ee   :  { %2406 = vmax.xlane.f32.xlu1 %v2405_v54  ;;  %v2402_v55 = vsel %vm58_vm0, %v5284_v51, -inf }
 0x8ef   :  { %2403 = vmax.xlane.f32.xlu0 %v2402_v55 }
 0x95f   :  { %v2365_v56 = vpop.xlane.xlu1 %2364 }
 0x960   :  { %v2409_v57 = vsub.f32 %v5184_v44, %v2365_v56  ;;  %v2362_v58 = vpop.xlane.xlu0 %2361 }
 0x961   :  { %v2408_v59 = vsub.f32 %v5186_v47, %v2362_v58 }
 0x962   :  { %v2426_v62 = vmul.f32 1.442695, %v2409_v57 }
 0x963   :  { %v2424_v63 = vmul.f32 1.442695, %v2408_v59  ;;  %v2371_v3 = vpop.xlane.xlu1 %2370 }
 0x964   :  { %4310 = vpow2.f32 %v2426_v62  ;;  %v2411_v42 = vsub.f32 %v5198_v30, %v2371_v3  ;;  %v2368_v5 = vpop.xlane.xlu0 %2367 }
 0x965   :  { %4312 = vpow2.f32 %v2424_v63  ;;  %v2410_v1 = vsub.f32 %v5200_v32, %v2368_v5 }
 0x966   :  { %v2430_v7 = vmul.f32 1.442695, %v2411_v42 }
 0x967   :  { %v2428_v6 = vmul.f32 1.442695, %v2410_v1  ;;  %v2377_v8 = vpop.xlane.xlu1 %2376 }
 0x968   :  { %4314 = vpow2.f32 %v2430_v7  ;;  %v2413_v53 = vsub.f32 %v5212_v4, %v2377_v8  ;;  %v2374_v44 = vpop.xlane.xlu0 %2373 }
 0x969   :  { %4316 = vpow2.f32 %v2428_v6  ;;  %v2412_v47 = vsub.f32 %v5214_v45, %v2374_v44 }
 0x96a   :  { %v2434_v11 = vmul.f32 1.442695, %v2413_v53 }
 0x96b   :  { %v2432_v12 = vmul.f32 1.442695, %v2412_v47  ;;  %v2383_v2 = vpop.xlane.xlu1 %2382 }
 0x96c   :  { %4318 = vpow2.f32 %v2434_v11  ;;  %v2415_v30 = vsub.f32 %v5226_v52, %v2383_v2  ;;  %v2380_v13 = vpop.xlane.xlu0 %2379 }
 0x96d   :  { %4320 = vpow2.f32 %v2432_v12  ;;  %v2414_v32 = vsub.f32 %v5228_v10, %v2380_v13 }
 0x96e   :  { %v5298_v20 = vpop.eup %4310  ;;  %v2438_v16 = vmul.f32 1.442695, %v2415_v30 }
 0x96f   :  { %v5300_v17 = vpop.eup %4312  ;;  %v2436_v4 = vmul.f32 1.442695, %v2414_v32  ;;  %v2389_v9 = vpop.xlane.xlu1 %2388  ;;  %v2459_v45 = vsel %vm58_vm0, %v5298_v20, 0.0 }
 0x970   :  { %4322 = vpow2.f32 %v2438_v16  ;;  %v2417_v15 = vsub.f32 %v5240_v14, %v2389_v9  ;;  %2460 = vadd.xlane.f32.xlu1 %v2459_v45  ;;  %v2386_v18 = vpop.xlane.xlu0 %2385  ;;  %v2456_v52 = vsel %vm58_vm0, %v5300_v17, 0.0  ;;  %v2758_v9 = vld [vmem:[#allocation6 + $0x160] sm:$0xff]  ;;  %v2759_v45 = vld [vmem:[#allocation6 + $0x168] sm:$0xff] }
 0x971   :  { %4324 = vpow2.f32 %v2436_v4  ;;  %v2416_v10 = vsub.f32 %v5242_v0, %v2386_v18  ;;  %2457 = vadd.xlane.f32.xlu0 %v2456_v52 }
 0x972   :  { %v5308_v19 = vpop.eup %4314  ;;  %v2442_v23 = vmul.f32 1.442695, %v2417_v15  ;;  %v4197_v15 = vpack.c.bf16 %v2759_v45, %v2758_v9  ;;  %v2761_v9 = vld [vmem:[#allocation6 + $0x178] sm:$0xff] }
 0x973   :  { %v5310_v25 = vpop.eup %4316  ;;  %v2440_v27 = vmul.f32 1.442695, %v2416_v10  ;;  %v2395_v28 = vpop.xlane.xlu1 %2394  ;;  %v2465_v29 = vsel %vm58_vm0, %v5308_v19, 0.0 }
 0x974   :  { %4326 = vpow2.f32 %v2442_v23  ;;  %v2419_v14 = vsub.f32 %v5254_v22, %v2395_v28  ;;  %2466 = vadd.xlane.f32.xlu1 %v2465_v29  ;;  %v2392_v31 = vpop.xlane.xlu0 %2391  ;;  %v2462_v38 = vsel %vm58_vm0, %v5310_v25, 0.0  ;;  %4198 = vmatprep.subr.bf16.mxu1 %v4197_v15 }
 0x975   :  { %4328 = vpow2.f32 %v2440_v27  ;;  %v2418_v0 = vsub.f32 %v5256_v24, %v2392_v31  ;;  %2463 = vadd.xlane.f32.xlu0 %v2462_v38 }
 0x976   :  { %v5318_v40 = vpop.eup %4318  ;;  %v2446_v41 = vmul.f32 1.442695, %v2419_v14 }
 0x977   :  { %v5320_v36 = vpop.eup %4320  ;;  %v2444_v34 = vmul.f32 1.442695, %v2418_v0  ;;  %v2401_v43 = vpop.xlane.xlu1 %2400  ;;  %v2471_v50 = vsel %vm58_vm0, %v5318_v40, 0.0 }
 0x978   :  { %4330 = vpow2.f32 %v2446_v41  ;;  %v2421_v22 = vsub.f32 %v5268_v37, %v2401_v43  ;;  %2472 = vadd.xlane.f32.xlu1 %v2471_v50  ;;  %v2398_v54 = vpop.xlane.xlu0 %2397  ;;  %v2468_v55 = vsel %vm58_vm0, %v5320_v36, 0.0 }
 0x979   :  { %4332 = vpow2.f32 %v2444_v34  ;;  %v2420_v24 = vsub.f32 %v5270_v39, %v2398_v54  ;;  %2469 = vadd.xlane.f32.xlu0 %v2468_v55 }
 0x97a   :  { %v5328_v56 = vpop.eup %4322  ;;  %v2450_v57 = vmul.f32 1.442695, %v2421_v22 }
 0x97b   :  { %v5330_v58 = vpop.eup %4324  ;;  %v2448_v59 = vmul.f32 1.442695, %v2420_v24  ;;  %v2407_v62 = vpop.xlane.xlu1 %2406  ;;  %v2477_v63 = vsel %vm58_vm0, %v5328_v56, 0.0 }
 0x97c   :  { %4334 = vpow2.f32 %v2450_v57  ;;  %v2423_v37 = vsub.f32 %v5282_v46, %v2407_v62  ;;  %2478 = vadd.xlane.f32.xlu1 %v2477_v63  ;;  %v2404_v3 = vpop.xlane.xlu0 %2403  ;;  %v2474_v42 = vsel %vm58_vm0, %v5330_v58, 0.0 }
 0x97d   :  { %4336 = vpow2.f32 %v2448_v59  ;;  %v2422_v39 = vsub.f32 %v5284_v51, %v2404_v3  ;;  %2475 = vadd.xlane.f32.xlu0 %v2474_v42 }
 0x97e   :  { %v5338_v5 = vpop.eup %4326  ;;  %v2454_v1 = vmul.f32 1.442695, %v2423_v37 }
 0x97f   :  { %v5340_v7 = vpop.eup %4328  ;;  %v2452_v6 = vmul.f32 1.442695, %v2422_v39  ;;  %v2483_v8 = vsel %vm58_vm0, %v5338_v5, 0.0 }
 0x980   :  { %4338 = vpow2.f32 %v2454_v1  ;;  %2484 = vadd.xlane.f32.xlu1 %v2483_v8  ;;  %v2480_v46 = vsel %vm58_vm0, %v5340_v7, 0.0 }
 0x981   :  { %4340 = vpow2.f32 %v2452_v6  ;;  %2481 = vadd.xlane.f32.xlu0 %v2480_v46 }
 0x982   :  { %v5346_v53 = vpop.eup %4330 }
 0x983   :  { %v5348_v51 = vpop.eup %4332  ;;  %v2489_v44 = vsel %vm58_vm0, %v5346_v53, 0.0 }
 0x984   :  { %2490 = vadd.xlane.f32.xlu1 %v2489_v44  ;;  %v2486_v47 = vsel %vm58_vm0, %v5348_v51, 0.0 }
 0x985   :  { %2487 = vadd.xlane.f32.xlu0 %v2486_v47 }
 0x986   :  { %v5354_v11 = vpop.eup %4334 }
 0x987   :  { %v5356_v12 = vpop.eup %4336  ;;  %v2495_v2 = vsel %vm58_vm0, %v5354_v11, 0.0 }
 0x988   :  { %2496 = vadd.xlane.f32.xlu1 %v2495_v2  ;;  %v2492_v30 = vsel %vm58_vm0, %v5356_v12, 0.0 }
 0x989   :  { %2493 = vadd.xlane.f32.xlu0 %v2492_v30 }
 0x98a   :  { %v5362_v13 = vpop.eup %4338 }
 0x98b   :  { %v5364_v32 = vpop.eup %4340  ;;  %v2501_v16 = vsel %vm58_vm0, %v5362_v13, 0.0 }
 0x98c   :  { %2502 = vadd.xlane.f32.xlu1 %v2501_v16  ;;  %v2498_v4 = vsel %vm58_vm0, %v5364_v32, 0.0 }
 0x98d   :  { %2499 = vadd.xlane.f32.xlu0 %v2498_v4  ;;  %v2760_v4 = vld [vmem:[#allocation6 + $0x170] sm:$0xff] }
 0x98e   :  { %v4201_v45 = vpack.c.bf16 %v2761_v9, %v2760_v4 }
 0x9fd   :  { %v2461_v18 = vpop.xlane.xlu1 %2460 }
 0x9fe   :  { %4342 = vrcp.f32 %v2461_v18  ;;  %v2458_v52 = vpop.xlane.xlu0 %2457 }
 0x9ff   :  { %4344 = vrcp.f32 %v2458_v52 }
 0xa01   :  { %v2467_v10 = vpop.xlane.xlu1 %2466 }
 0xa02   :  { %4346 = vrcp.f32 %v2467_v10  ;;  %v2464_v23 = vpop.xlane.xlu0 %2463 }
 0xa03   :  { %4348 = vrcp.f32 %v2464_v23 }
 0xa05   :  { %v2473_v27 = vpop.xlane.xlu1 %2472 }
 0xa06   :  { %4350 = vrcp.f32 %v2473_v27  ;;  %v2470_v28 = vpop.xlane.xlu0 %2469 }
 0xa07   :  { %4352 = vrcp.f32 %v2470_v28 }
 0xa08   :  { %v4343_v29 = vpop.eup %4342 }
 0xa09   :  { %v4345_v14 = vpop.eup %4344  ;;  %v2479_v31 = vpop.xlane.xlu1 %2478  ;;  %v2521_v41 = vmul.f32 %v4343_v29, %v5298_v20 }
 0xa0a   :  { %4354 = vrcp.f32 %v2479_v31  ;;  %v2476_v38 = vpop.xlane.xlu0 %2475  ;;  %v2520_v0 = vmul.f32 %v4345_v14, %v5300_v17 }
 0xa0b   :  { %4356 = vrcp.f32 %v2476_v38 }
 0xa0c   :  { %v4347_v34 = vpop.eup %4346  ;;  %3937 = vmatprep.mubr.msk.f32.mxu1 %vm58_vm0, %v2520_v0 }
 0xa0d   :  { %v4349_v43 = vpop.eup %4348  ;;  %v2485_v50 = vpop.xlane.xlu1 %2484  ;;  %3938 = vmatmul.mubr.msk.f32.vlgmr.msra.gmra.mrb[32].mxu1 %vm58_vm0, %v2521_v41  ;;  %v2523_v55 = vmul.f32 %v4347_v34, %v5308_v19 }
 0xa0e   :  { %4358 = vrcp.f32 %v2485_v50  ;;  %v2482_v22 = vpop.xlane.xlu0 %2481  ;;  %v2522_v54 = vmul.f32 %v4349_v43, %v5310_v25  ;;  %4200 = vmatpush3.bf16.msra.mxu1 %v4197_v15 }
 0xa0f   :  { %4360 = vrcp.f32 %v2482_v22  ;;  %4202 = vmatprep.subr.bf16.mxu1 %v4201_v45 }
 0xa10   :  { %v4351_v24 = vpop.eup %4350  ;;  %3940 = vmatprep.mubr.msk.f32.mxu1 %vm58_vm0, %v2522_v54 }
 0xa11   :  { %v4353_v20 = vpop.eup %4352  ;;  %v2491_v17 = vpop.xlane.xlu1 %2490  ;;  %3941 = vmatmul.mubr.msk.f32.gmra.mrb[34].mxu1 %vm58_vm0, %v2523_v55  ;;  %v2525_v62 = vmul.f32 %v4351_v24, %v5318_v40 }
 0xa12   :  { %4362 = vrcp.f32 %v2491_v17  ;;  %v2488_v57 = vpop.xlane.xlu0 %2487  ;;  %v2524_v59 = vmul.f32 %v4353_v20, %v5320_v36  ;;  %4204 = vmatpush3.bf16.msra.mxu1 %v4201_v45 }
 0xa13   :  { %4364 = vrcp.f32 %v2488_v57 }
 0xa14   :  { %v4355_v63 = vpop.eup %4354  ;;  %3943 = vmatprep.mubr.msk.f32.mxu1 %vm58_vm0, %v2524_v59 }
 0xa15   :  { %v4357_v25 = vpop.eup %4356  ;;  %v2497_v37 = vpop.xlane.xlu1 %2496  ;;  %3944 = vmatmul.mubr.msk.f32.gmra.mrb[36].mxu1 %vm58_vm0, %v2525_v62  ;;  %v2527_v42 = vmul.f32 %v4355_v63, %v5328_v56 }
 0xa16   :  { %4366 = vrcp.f32 %v2497_v37  ;;  %v2494_v19 = vpop.xlane.xlu0 %2493  ;;  %v2526_v3 = vmul.f32 %v4357_v25, %v5330_v58 }
 0xa17   :  { %4368 = vrcp.f32 %v2494_v19 }
 0xa18   :  { %v4359_v39 = vpop.eup %4358  ;;  %3946 = vmatprep.mubr.msk.f32.mxu1 %vm58_vm0, %v2526_v3 }
 0xa19   :  { %v4361_v36 = vpop.eup %4360  ;;  %v2503_v1 = vpop.xlane.xlu1 %2502  ;;  %3947 = vmatmul.mubr.msk.f32.gmra.mrb[38].mxu1 %vm58_vm0, %v2527_v42  ;;  %v2529_v8 = vmul.f32 %v4359_v39, %v5338_v5 }
 0xa1a   :  { %4370 = vrcp.f32 %v2503_v1  ;;  %v2500_v40 = vpop.xlane.xlu0 %2499  ;;  %v2528_v6 = vmul.f32 %v4361_v36, %v5340_v7 }
 0xa1b   :  { %4372 = vrcp.f32 %v2500_v40 }
 0xa1c   :  { %v4363_v46 = vpop.eup %4362  ;;  %3949 = vmatprep.mubr.msk.f32.mxu1 %vm58_vm0, %v2528_v6 }
 0xa1d   :  { %v4365_v58 = vpop.eup %4364  ;;  %3950 = vmatmul.mubr.msk.f32.gmra.mrb[40].mxu1 %vm58_vm0, %v2529_v8  ;;  %v2531_v44 = vmul.f32 %v4363_v46, %v5346_v53 }
 0xa1e   :  { %v2530_v56 = vmul.f32 %v4365_v58, %v5348_v51 }
 0xa20   :  { %v4367_v47 = vpop.eup %4366  ;;  %3952 = vmatprep.mubr.msk.f32.mxu1 %vm58_vm0, %v2530_v56 }
 0xa21   :  { %v4369_v2 = vpop.eup %4368  ;;  %3953 = vmatmul.mubr.msk.f32.gmra.mrb[42].mxu1 %vm58_vm0, %v2531_v44  ;;  %v2533_v5 = vmul.f32 %v4367_v47, %v5354_v11 }
 0xa22   :  { %v2532_v7 = vmul.f32 %v4369_v2, %v5356_v12 }
 0xa24   :  { %v4371_v30 = vpop.eup %4370  ;;  %3955 = vmatprep.mubr.msk.f32.mxu1 %vm58_vm0, %v2532_v7 }
 0xa25   :  { %v4373_v16 = vpop.eup %4372  ;;  %3956 = vmatmul.mubr.msk.f32.gmra.mrb[44].mxu1 %vm58_vm0, %v2533_v5  ;;  %v2535_v53 = vmul.f32 %v4371_v30, %v5362_v13 }
 0xa26   :  { %v2534_v51 = vmul.f32 %v4373_v16, %v5364_v32 }
 0xa28   :  { %3958 = vmatprep.mubr.msk.f32.mxu1 %vm58_vm0, %v2534_v51 }
 0xa29   :  { %3959 = vmatmul.mubr.msk.f32.gmra.mrb[46].mxu1 %vm58_vm0, %v2535_v53 }
 0xae0   :  { %v3939_v11 = vpop.f32.mrb[32].mxu1 }
 0xae1   :  { %v2650_v12 = vpop.f32.mrb[33].mxu1  ;;  %v2730_v10 = vmul.f32 %v3939_v11, %v5081_v35  ;;  %v2942_v11 = vld [vmem:[#allocation6 + $0x180] sm:$0xff] }
 0xae2   :  { %v2729_v13 = vmul.f32 %v5081_v35, %v2650_v12  ;;  %v2943_v12 = vld [vmem:[#allocation6 + $0x188] sm:$0xff] }
 0xae4   :  { %v3942_v15 = vpop.f32.mrb[34].mxu1 }
 0xae5   :  { %v2660_v18 = vpop.f32.mrb[35].mxu1  ;;  %v2732_v31 = vmul.f32 %v3942_v15, %v5081_v35  ;;  %v3049_v15 = vld [vmem:[#allocation6 + $0x1a0] sm:$0xff] }
 0xae6   :  { %v2731_v41 = vmul.f32 %v5081_v35, %v2660_v18  ;;  %v4205_v18 = vpack.c.bf16 %v2943_v12, %v2942_v11 }
 0xae8   :  { %v3945_v52 = vpop.f32.mrb[36].mxu1  ;;  %4206 = vmatprep.subr.bf16.mxu0 %v4205_v18 }
 0xae9   :  { %v2734_v32 = vmul.f32 %v3945_v52, %v5126_v21  ;;  %v2670_v23 = vpop.f32.mrb[37].mxu1  ;;  %v3050_v52 = vld [vmem:[#allocation6 + $0x1a8] sm:$0xff]  ;;  %4208 = vmatpush3.bf16.msra.mxu0 %v4205_v18 }
 0xaea   :  { %v2733_v27 = vmul.f32 %v5126_v21, %v2670_v23  ;;  %v4213_v23 = vpack.c.bf16 %v3050_v52, %v3049_v15  ;;  %v3184_v15 = vld [vmem:[#allocation6 + $0x1c0] sm:$0xff]  ;;  %v3185_v18 = vld [vmem:[#allocation6 + $0x1c8] sm:$0xff]  ;;  %v3186_v52 = vld [vmem:[#allocation6 + $0x1d0] sm:$0xff] }
 0xaeb   :  { %v2738_v28 = vadd.f32 %v2734_v32, %v2730_v10  ;;  %v2944_v10 = vld [vmem:[#allocation6 + $0x190] sm:$0xff]  ;;  %v2945_v32 = vld [vmem:[#allocation6 + $0x198] sm:$0xff] }
 0xaec   :  { %v2737_v29 = vadd.f32 %v2733_v27, %v2729_v13  ;;  %v3948_v14 = vpop.f32.mrb[38].mxu1  ;;  %v4209_v13 = vpack.c.bf16 %v2945_v32, %v2944_v10  ;;  %v3051_v27 = vld [vmem:[#allocation6 + $0x1b0] sm:$0xff]  ;;  %4214 = vmatprep.subr.bf16.mxu1 %v4213_v23  ;;  %v4221_v10 = vpack.c.bf16 %v3185_v18, %v3184_v15  ;;  %v3187_v32 = vld [vmem:[#allocation6 + $0x1d8] sm:$0xff] }
 0xaed   :  { %v2736_v38 = vmul.f32 %v3948_v14, %v5126_v21  ;;  %v2680_v0 = vpop.f32.mrb[39].mxu1 }
 0xaee   :  { %v2735_v34 = vmul.f32 %v5126_v21, %v2680_v0  ;;  %4210 = vmatprep.subr.bf16.mxu0 %v4209_v13 }
 0xaef   :  { %v2740_v43 = vadd.f32 %v2736_v38, %v2732_v31  ;;  %4212 = vmatpush3.bf16.msra.mxu0 %v4209_v13  ;;  %v3463_v13 = vld [vmem:[%s5510_s2 + $0x12] ss:$0 sm:$0xff] }
 0xaf0   :  { %v2739_v50 = vadd.f32 %v2735_v34, %v2731_v41  ;;  %v3951_v22 = vpop.f32.mrb[40].mxu1  ;;  %4222 = vmatprep.subr.bf16.mxu0 %v4221_v10 }
 0xaf1   :  { %v2742_v54 = vmul.f32 %v3951_v22, %v5143_v26  ;;  %v2690_v55 = vpop.f32.mrb[41].mxu1 }
 0xaf2   :  { %v2741_v24 = vmul.f32 %v5143_v26, %v2690_v55 }
 0xaf3   :  { %v2746_v20 = vadd.f32 %v2742_v54, %v2738_v28  ;;  %v3052_v28 = vld [vmem:[#allocation6 + $0x1b8] sm:$0xff] }
 0xaf4   :  { %v2745_v17 = vadd.f32 %v2741_v24, %v2737_v29  ;;  %v3954_v57 = vpop.f32.mrb[42].mxu1  ;;  %v4217_v29 = vpack.c.bf16 %v3052_v28, %v3051_v27 }
 0xaf5   :  { %v2744_v59 = vmul.f32 %v3954_v57, %v5143_v26  ;;  %v2700_v62 = vpop.f32.mrb[43].mxu1 }
 0xaf6   :  { %v2743_v63 = vmul.f32 %v5143_v26, %v2700_v62 }
 0xaf7   :  { %v2748_v25 = vadd.f32 %v2744_v59, %v2740_v43 }
 0xaf8   :  { %v2747_v35 = vadd.f32 %v2743_v63, %v2739_v50  ;;  %v3957_v37 = vpop.f32.mrb[44].mxu1 }
 0xaf9   :  { %v2750_v21 = vmul.f32 %v3957_v37, %v5160_v33  ;;  %v2710_v19 = vpop.f32.mrb[45].mxu1 }
 0xafa   :  { %v2749_v3 = vmul.f32 %v5160_v33, %v2710_v19 }
 0xafb   :  { %v2754_v42 = vadd.f32 %v2750_v21, %v2746_v20 }
 0xafc   :  { %v2753_v39 = vadd.f32 %v2749_v3, %v2745_v17  ;;  %v3960_v36 = vpop.f32.mrb[46].mxu1 }
 0xafd   :  { %v2752_v1 = vmul.f32 %v3960_v36, %v5160_v33  ;;  %v2720_v40 = vpop.f32.mrb[47].mxu1 }
 0xafe   :  { %v2751_v6 = vmul.f32 %v5160_v33, %v2720_v40  ;;  %3969 = vmatprep.mubr.msk.f32.mxu1 %vm58_vm0, %v2753_v39 }
 0xaff   :  { %v2756_v8 = vadd.f32 %v2752_v1, %v2748_v25  ;;  %3970 = vmatmul.mubr.msk.f32.vlgmr.msra.gmra.mrb[48].mxu1 %vm58_vm0, %v2754_v42 }
 0xb00   :  { %v2755_v26 = vadd.f32 %v2751_v6, %v2747_v35  ;;  %4216 = vmatpush3.bf16.msra.mxu1 %v4213_v23  ;;  %v4225_v23 = vpack.c.bf16 %v3187_v32, %v3186_v52  ;;  %v3468_v32 = vld [vmem:[%s5510_s2 + $0x13] ss:$0 sm:$0xff] }
 0xb01   :  { %4218 = vmatprep.subr.bf16.mxu1 %v4217_v29 }
 0xb02   :  { %3972 = vmatprep.mubr.msk.f32.mxu1 %vm58_vm0, %v2755_v26  ;;  %v3456_v26 = vld [vmem:[%s5510_s2 + $0xf] ss:$0 sm:$0xff] }
 0xb03   :  { %3973 = vmatmul.mubr.msk.f32.gmra.mrb[50].mxu1 %vm58_vm0, %v2756_v8 }
 0xb04   :  { %4220 = vmatpush3.bf16.msra.mxu1 %v4217_v29 }
 0xb05   :  { %4229 = vmatprep.subr.bf16.mxu1 %v4221_v10 }
 0xbd2   :  { %v3971_v46 = vpop.f32.mrb[48].mxu1 }
 0xbd3   :  { %v5423_v58 = vadd.f32 %v3971_v46, %v4995_v48  ;;  %v2840_v56 = vpop.f32.mrb[49].mxu1 }
 0xbd4   :  { %v5426_v44 = vadd.f32 %v2840_v56, %v4998_v49 }
 0xbd5   :  { %v2868_v33 = vsel %vm58_vm0, %v5423_v58, 0.0  ;;  %v2882_v47 = vmul.f32 %v5423_v58, %v5423_v58 }
 0xbd6   :  { %2869 = vadd.xlane.f32.xlu1 %v2868_v33  ;;  %v3974_v2 = vpop.f32.mrb[50].mxu1  ;;  %v2865_v7 = vsel %vm58_vm0, %v5426_v44, 0.0  ;;  %v2881_v5 = vmul.f32 %v5426_v44, %v5426_v44 }
 0xbd7   :  { %2866 = vadd.xlane.f32.xlu0 %v2865_v7  ;;  %v2850_v48 = vpop.f32.mrb[51].mxu1  ;;  %v5437_v30 = vadd.f32 %v3974_v2, %v5011_v60  ;;  %v2888_v49 = vsel %vm58_vm0, %v2882_v47, 0.0  ;;  %v3457_v47 = vld [vmem:[%s5510_s2 + $0x10] ss:$0 sm:$0xff] }
 0xbd8   :  { %v5441_v16 = vadd.f32 %v2850_v48, %v5014_v61  ;;  %v2885_v51 = vsel %vm58_vm0, %v2881_v5, 0.0 }
 0xbd9   :  { %v2874_v53 = vsel %vm58_vm0, %v5437_v30, 0.0  ;;  %v2884_v4 = vmul.f32 %v5437_v30, %v5437_v30 }
 0xbda   :  { %2889 = vadd.xlane.f32.xlu1 %v2888_v49  ;;  %v2871_v60 = vsel %vm58_vm0, %v5441_v16, 0.0  ;;  %v2883_v9 = vmul.f32 %v5441_v16, %v5441_v16 }
 0xbdb   :  { %2886 = vadd.xlane.f32.xlu0 %v2885_v51  ;;  %v2894_v61 = vsel %vm58_vm0, %v2884_v4, 0.0 }
 0xbdc   :  { %v2891_v45 = vsel %vm58_vm0, %v2883_v9, 0.0 }
 0xbde   :  { %2875 = vadd.xlane.f32.xlu1 %v2874_v53 }
 0xbdf   :  { %2872 = vadd.xlane.f32.xlu0 %v2871_v60 }
 0xbe2   :  { %2895 = vadd.xlane.f32.xlu1 %v2894_v61 }
 0xbe3   :  { %2892 = vadd.xlane.f32.xlu0 %v2891_v45 }
 0xc63   :  { %v2870_v14 = vpop.xlane.xlu1 %2869 }
 0xc64   :  { %v2878_v31 = vmul.f32 0.03125, %v2870_v14  ;;  %v2867_v38 = vpop.xlane.xlu0 %2866 }
 0xc65   :  { %v2877_v0 = vmul.f32 0.03125, %v2867_v38 }
 0xc66   :  { %v2902_v34 = vmul.f32 %v2878_v31, %v2878_v31  ;;  %v2910_v40 = vsub.f32 %v5423_v58, %v2878_v31 }
 0xc67   :  { %v2890_v41 = vpop.xlane.xlu1 %2889  ;;  %v2901_v22 = vmul.f32 %v2877_v0, %v2877_v0  ;;  %v2909_v8 = vsub.f32 %v5426_v44, %v2877_v0 }
 0xc68   :  { %v2898_v43 = vmul.f32 0.03125, %v2890_v41  ;;  %v2887_v50 = vpop.xlane.xlu0 %2886 }
 0xc69   :  { %v2897_v54 = vmul.f32 0.03125, %v2887_v50 }
 0xc6a   :  { %v2906_v55 = vsub.f32 %v2898_v43, %v2902_v34 }
 0xc6b   :  { %v2905_v24 = vsub.f32 %v2897_v54, %v2901_v22  ;;  %v2876_v20 = vpop.xlane.xlu1 %2875 }
 0xc6c   :  { %v2914_v17 = vadd.f32 1e-05, %v2906_v55  ;;  %v2880_v57 = vmul.f32 0.03125, %v2876_v20  ;;  %v2873_v59 = vpop.xlane.xlu0 %2872 }
 0xc6d   :  { %v2913_v62 = vadd.f32 1e-05, %v2905_v24  ;;  %v2879_v63 = vmul.f32 0.03125, %v2873_v59 }
 0xc6e   :  { %4374 = vrsqrt.f32 %v2914_v17  ;;  %v2904_v35 = vmul.f32 %v2880_v57, %v2880_v57  ;;  %v2912_v48 = vsub.f32 %v5437_v30, %v2880_v57 }
 0xc6f   :  { %4376 = vrsqrt.f32 %v2913_v62  ;;  %v2896_v25 = vpop.xlane.xlu1 %2895  ;;  %v2903_v19 = vmul.f32 %v2879_v63, %v2879_v63  ;;  %v2911_v53 = vsub.f32 %v5441_v16, %v2879_v63 }
 0xc70   :  { %v2900_v37 = vmul.f32 0.03125, %v2896_v25  ;;  %v2893_v21 = vpop.xlane.xlu0 %2892 }
 0xc71   :  { %v2899_v3 = vmul.f32 0.03125, %v2893_v21 }
 0xc72   :  { %v2908_v42 = vsub.f32 %v2900_v37, %v2904_v35 }
 0xc73   :  { %v2907_v39 = vsub.f32 %v2899_v3, %v2903_v19 }
 0xc74   :  { %v2916_v36 = vadd.f32 1e-05, %v2908_v42 }
 0xc75   :  { %v2915_v1 = vadd.f32 1e-05, %v2907_v39 }
 0xc76   :  { %4378 = vrsqrt.f32 %v2916_v36 }
 0xc77   :  { %4380 = vrsqrt.f32 %v2915_v1 }
 0xc78   :  { %v4375_v6 = vpop.eup %4374 }
 0xc79   :  { %v4377_v46 = vpop.eup %4376  ;;  %v2922_v56 = vmul.f32 %v4375_v6, %v2910_v40 }
 0xc7a   :  { %v2921_v33 = vmul.f32 %v4377_v46, %v2909_v8  ;;  %v3458_v8 = vld [vmem:[%s5510_s2 + $0x11] ss:$0 sm:$0xff]  ;;  %s4438_s2 = scalar_lea.vmem %s3304_s19, 512 }
 0xc7b   :  { %v2930_v2 = vmul.f32 %v3456_v26, %v2922_v56  ;;  %p4439_p2 = scmp.ne.s32.totalorder %s3304_s19, %s4438_s2  ;;  %p4444_p4 = scmp.lt.s32.totalorder %s4438_s2, %s4438_s2 }
 0xc7c   :  { %v2929_v7 = vmul.f32 %v3456_v26, %v2921_v33 }
 0xc7d   :  { %v2938_v49 = vadd.f32 %v3457_v47, %v2930_v2  ;;  %p4445_p5 = por %p4444_p4, %p4443_p3 }
 0xc7e   :  { %v2937_v5 = vadd.f32 %v3457_v47, %v2929_v7 }
 0xc7f   :  { %p4446_p6 = pnand %p4445_p5, %p4439_p2 }
 0xc80   :  { %v4379_v51 = vpop.eup %4378  ;;  %3983 = vmatprep.mubr.msk.f32.mxu0 %vm58_vm0, %v2937_v5  ;;  %3997 = vmatprep.mubr.msk.f32.mxu1 %vm58_vm0, %v2937_v5 }
 0xc81   :  { %v4381_v4 = vpop.eup %4380  ;;  %3984 = vmatmul.mubr.msk.f32.vlgmr.msra.gmra.mrb[48].mxu0 %vm58_vm0, %v2938_v49  ;;  %3998 = vmatmul.mubr.msk.f32.vlgmr.msra.gmra.mrb[52].mxu1 %vm58_vm0, %v2938_v49  ;;  %v2924_v60 = vmul.f32 %v4379_v51, %v2912_v48 }
 0xc82   :  { %v2923_v9 = vmul.f32 %v4381_v4, %v2911_v53  ;;  %4224 = vmatpush3.bf16.msra.mxu0 %v4221_v10  ;;  %4231 = vmatpush3.bf16.msra.mxu1 %v4221_v10 }
 0xc83   :  { %v2932_v61 = vmul.f32 %v3456_v26, %v2924_v60  ;;  %4226 = vmatprep.subr.bf16.mxu0 %v4225_v23  ;;  %4230 = vmatprep.subr.bf16.mxu1 %v4225_v23 }
 0xc84   :  { %v2931_v45 = vmul.f32 %v3456_v26, %v2923_v9 }
 0xc85   :  { %v2940_v12 = vadd.f32 %v3457_v47, %v2932_v61 }
 0xc86   :  { %v2939_v11 = vadd.f32 %v3457_v47, %v2931_v45  ;;  %4228 = vmatpush3.bf16.msra.mxu0 %v4225_v23  ;;  %4232 = vmatpush3.bf16.msra.mxu1 %v4225_v23 }
 0xc88   :  { %3986 = vmatprep.mubr.msk.f32.mxu0 %vm58_vm0, %v2939_v11  ;;  %4000 = vmatprep.mubr.msk.f32.mxu1 %vm58_vm0, %v2939_v11 }
 0xc89   :  { %3987 = vmatmul.mubr.msk.f32.gmra.mrb[50].mxu0 %vm58_vm0, %v2940_v12  ;;  %4001 = vmatmul.mubr.msk.f32.gmra.mrb[54].mxu1 %vm58_vm0, %v2940_v12 }
 0xd54   :  { %v3985_v27 = vpop.f32.mrb[48].mxu0  ;;  %v3999_v28 = vpop.f32.mrb[52].mxu1 }
 0xd55   :  { %v3130_v29 = vadd.f32 %v3999_v28, %v3463_v13  ;;  %v3029_v14 = vpop.f32.mrb[49].mxu0  ;;  %v3124_v31 = vpop.f32.mrb[53].mxu1  ;;  %v3035_v2 = vadd.f32 %v3985_v27, %v3458_v8 }
 0xd56   :  { %v3125_v38 = vadd.f32 %v3463_v13, %v3124_v31  ;;  %v3030_v5 = vadd.f32 %v3458_v8, %v3029_v14 }
 0xd57   :  { %v3148_v0 = vmul.f32 0.044715, %v3130_v29  ;;  %v3144_v46 = vmul.f32 0.5, %v3130_v29 }
 0xd58   :  { %v3147_v41 = vmul.f32 0.044715, %v3125_v38  ;;  %v3143_v33 = vmul.f32 0.5, %v3125_v38 }
 0xd59   :  { %v3152_v34 = vmul.f32 %v3148_v0, %v3130_v29 }
 0xd5a   :  { %v3151_v43 = vmul.f32 %v3147_v41, %v3125_v38 }
 0xd5b   :  { %v3156_v50 = vmul.f32 %v3152_v34, %v3130_v29 }
 0xd5c   :  { %v3155_v22 = vmul.f32 %v3151_v43, %v3125_v38  ;;  %v3988_v54 = vpop.f32.mrb[50].mxu0  ;;  %v4002_v55 = vpop.f32.mrb[54].mxu1 }
 0xd5d   :  { %v3160_v24 = vadd.f32 %v3156_v50, %v3130_v29  ;;  %v3140_v20 = vadd.f32 %v4002_v55, %v3463_v13  ;;  %v3039_v17 = vpop.f32.mrb[51].mxu0  ;;  %v3134_v57 = vpop.f32.mrb[55].mxu1  ;;  %v3045_v11 = vadd.f32 %v3988_v54, %v3458_v8 }
 0xd5e   :  { %v3159_v59 = vadd.f32 %v3155_v22, %v3125_v38  ;;  %v3135_v62 = vadd.f32 %v3463_v13, %v3134_v57  ;;  %v3040_v15 = vadd.f32 %v3458_v8, %v3039_v17 }
 0xd5f   :  { %v3164_v63 = vmul.f32 0.7978846, %v3160_v24  ;;  %v3150_v25 = vmul.f32 0.044715, %v3140_v20  ;;  %v3146_v60 = vmul.f32 0.5, %v3140_v20 }
 0xd60   :  { %v3163_v35 = vmul.f32 0.7978846, %v3159_v59  ;;  %v3149_v37 = vmul.f32 0.044715, %v3135_v62  ;;  %v3145_v61 = vmul.f32 0.5, %v3135_v62 }
 0xd61   :  { %4382 = vtanh.f32 %v3164_v63  ;;  %v3154_v21 = vmul.f32 %v3150_v25, %v3140_v20 }
 0xd62   :  { %4384 = vtanh.f32 %v3163_v35  ;;  %v3153_v19 = vmul.f32 %v3149_v37, %v3135_v62 }
 0xd63   :  { %v3158_v3 = vmul.f32 %v3154_v21, %v3140_v20 }
 0xd64   :  { %v3157_v42 = vmul.f32 %v3153_v19, %v3135_v62 }
 0xd65   :  { %v3162_v39 = vadd.f32 %v3158_v3, %v3140_v20 }
 0xd66   :  { %v3161_v36 = vadd.f32 %v3157_v42, %v3135_v62 }
 0xd67   :  { %v3166_v1 = vmul.f32 0.7978846, %v3162_v39 }
 0xd68   :  { %v3165_v40 = vmul.f32 0.7978846, %v3161_v36 }
 0xd69   :  { %4386 = vtanh.f32 %v3166_v1 }
 0xd6a   :  { %4388 = vtanh.f32 %v3165_v40 }
 0xd6b   :  { %v4383_v6 = vpop.eup %4382 }
 0xd6c   :  { %v4385_v26 = vpop.eup %4384  ;;  %v3172_v56 = vadd.f32 1.0, %v4383_v6 }
 0xd6d   :  { %v3171_v47 = vadd.f32 1.0, %v4385_v26 }
 0xd6e   :  { %v3176_v7 = vmul.f32 %v3172_v56, %v3144_v46 }
 0xd6f   :  { %v3175_v48 = vmul.f32 %v3171_v47, %v3143_v33 }
 0xd70   :  { %v3180_v49 = vmul.f32 %v3176_v7, %v3035_v2 }
 0xd71   :  { %v3179_v51 = vmul.f32 %v3175_v48, %v3030_v5 }
 0xd73   :  { %v4387_v53 = vpop.eup %4386  ;;  %4011 = vmatprep.mubr.msk.f32.mxu0 %vm58_vm0, %v3179_v51 }
 0xd74   :  { %v4389_v4 = vpop.eup %4388  ;;  %v3174_v9 = vadd.f32 1.0, %v4387_v53  ;;  %4012 = vmatmul.mubr.msk.f32.vlgmr.msra.gmra.mrb[52].mxu0 %vm58_vm0, %v3180_v49 }
 0xd75   :  { %v3173_v45 = vadd.f32 1.0, %v4389_v4 }
 0xd76   :  { %v3178_v12 = vmul.f32 %v3174_v9, %v3146_v60 }
 0xd77   :  { %v3177_v18 = vmul.f32 %v3173_v45, %v3145_v61 }
 0xd78   :  { %v3182_v52 = vmul.f32 %v3178_v12, %v3045_v11 }
 0xd79   :  { %v3181_v10 = vmul.f32 %v3177_v18, %v3040_v15 }
 0xd7b   :  { %4014 = vmatprep.mubr.msk.f32.mxu1 %vm58_vm0, %v3181_v10 }
 0xd7c   :  { %4015 = vmatmul.mubr.msk.f32.vlgmr.msra.gmra.mrb[56].mxu1 %vm58_vm0, %v3182_v52 }
 0xe47   :  { %v4013_v23 = vpop.f32.mrb[52].mxu0 }
 0xe48   :  { %v3277_v13 = vadd.f32 %v4013_v23, %v3468_v32  ;;  %v3271_v27 = vpop.f32.mrb[53].mxu0 }
 0xe49   :  { %v3272_v28 = vadd.f32 %v3468_v32, %v3271_v27 }
 0xe4a   :  { %v3291_v29 = vadd.f32 %v3277_v13, %v5423_v58 }
 0xe4b   :  { %v3290_v14 = vadd.f32 %v3272_v28, %v5426_v44 }
 0xe4c   :  { %3295 = vst.msk [vmem:[#allocation8 + $0x8] sm:$0xff] %vm58_vm0, %v3291_v29 }
 0xe4d   :  { %3294 = vst.msk [vmem:[#allocation8] sm:$0xff] %vm58_vm0, %v3290_v14 }
 0xe4f   :  { %v4016_v31 = vpop.f32.mrb[56].mxu1 }
 0xe50   :  { %v3287_v38 = vadd.f32 %v4016_v31, %v3468_v32  ;;  %v3281_v0 = vpop.f32.mrb[57].mxu1 }
 0xe51   :  { %v3282_v41 = vadd.f32 %v3468_v32, %v3281_v0 }
 0xe52   :  { %v3293_v34 = vadd.f32 %v3287_v38, %v5437_v30 }
 0xe53   :  { %v3292_v43 = vadd.f32 %v3282_v41, %v5441_v16 }
 0xe54   :  { %3297 = vst.msk [vmem:[#allocation8 + $0x18] sm:$0xff] %vm58_vm0, %v3293_v34 }
 0xe55   :  { %3296 = vst.msk [vmem:[#allocation8 + $0x10] sm:$0xff] %vm58_vm0, %v3292_v43 }
 0xe56   :  { %4449 = shalt.err (!%p4446_p6)
}
 0xe57   :  { %s4450_s21 = scalar_lea.hbm %s5514_s6, 512 }
 0xe58   :  { %p4451_p7 = scmp.ne.s32.totalorder %s5514_s6, %s4450_s21  ;;  %p4454_p8 = scmp.lt.u32.totalorder %s4450_s21, %s5514_s6 }
 0xe5a   :  { %p4456_p9 = pnand %p4454_p8, %p4451_p7 }
 0xe5c   :  { %4459 = shalt.err (!%p4456_p9)
}
 0xe5d   :  { %3309 = dma.vmem_to_hbm [thread:$0]  %s3304_s19, 512, %s5514_s6, [#allocation5], %s4467_s7, %s4467_s7, %s4468_s8  }
 0xe5e   :  { %4464 = dma.done.wait [#allocation5], 512  }
 0xe5f   :  { %4465 = vsyncadd [#allocation5], 4294966784 }
 0xe60   :  { %3313 = vsyncpa [#allocation4], 1 }
 0xe61   :  { %3314 = vsyncpa [#allocation7], 1 }
 0xe62   :  { %3315 = vsyncpa [#allocation5], 1 }

</bundles_post_ra>
